<compile_context>
chip_gen: v7x
topology: tpu7x:2x2x1
jax: 0.10.0
libtpu: 0.0.40
codegen_flags: <defaults>
</compile_context>

<pallas_src>
import functools

import numpy as np
import jax
import jax.numpy as jnp
from jax import lax
from jax.experimental import pallas as pl
from jax.experimental.pallas import tpu as pltpu


def _round_up(x: int, m: int) -> int:
    return ((x + m - 1) // m) * m


def _vmem_bytes(bb, tk, lk_pad, d, cbytes, obytes):
    """Rough resident-VMEM estimate for the chosen tiling (double-buffered operands)."""
    weights = 2 * (2 * d * d * cbytes)           # WqT + WkT
    vecs = 2 * (2 * d * 4)                       # bias + w_score (f32)
    qbuf = 2 * (bb * d * cbytes)
    keybuf = 2 * (bb * tk * d * cbytes)
    ctxbuf = 2 * (bb * d * obytes)
    attnbuf = 2 * (bb * lk_pad * obytes)
    scratch = bb * d * 4 * 2 + bb * 4 * 2 + bb * max(lk_pad // max(tk, 1), 128) * 4
    return weights + vecs + qbuf + keybuf + ctxbuf + attnbuf + scratch


def _additive_attention_kernel(
    q_ref,      # (BB, D)         queries for this batch tile (compute dtype)
    k_ref,      # (BB, TK, D)     key tile (compute dtype)
    wqT_ref,    # (D, D)          query_proj.weight, pre-transposed to (in, out)
    wkT_ref,    # (D, D)          key_proj.weight,  pre-transposed to (in, out)
    b_ref,      # (1, D)   f32    additive bias
    ws_ref,     # (1, D)   f32    score_proj.weight
    ctx_ref,    # (BB, 1, D)      out: context
    attn_ref,   # (BB, LK_PAD)    out: attention row (resident across key tiles)
    qb_ref,     # (BB, 1, D) f32  scratch: query projection + bias
    m_ref,      # (BB, 1)   f32   scratch: running max
    l_ref,      # (BB, 1)   f32   scratch: running softmax denominator
    acc_ref,    # (BB, 1, D) f32  scratch: unnormalized context accumulator
    mt_ref,     # (BB, NK)  f32   scratch: per-tile softmax reference max
    *,
    num_k_blocks: int,
    seq_len: int,
    mask_last: bool,
    tanh_dtype,
):
    ki = pl.program_id(1)
    bb, tk, d = k_ref.shape

    @pl.when(ki == 0)
    def _init():
        # q @ Wq^T + bias, computed once per batch tile and kept resident (f32).
        qp = lax.dot_general(
            q_ref[...], wqT_ref[...],
            dimension_numbers=(((1,), (0,)), ((), ())),
            preferred_element_type=jnp.float32)                       # (BB, D)
        qb_ref[...] = (qp + b_ref[...].astype(jnp.float32))[:, None, :]
        m_ref[...] = jnp.full(m_ref.shape, -jnp.inf, dtype=m_ref.dtype)
        l_ref[...] = jnp.zeros(l_ref.shape, l_ref.dtype)
        acc_ref[...] = jnp.zeros(acc_ref.shape, acc_ref.dtype)
        mt_ref[...] = jnp.zeros(mt_ref.shape, mt_ref.dtype)

    k_tile = k_ref[...]                                               # (BB, TK, D)

    # key_proj: (BB*TK, D) @ (D, D) on the MXU, f32 accumulation.  Weights arrive
    # pre-transposed so this is the MXU-native contraction (no transpose generated).
    kp = lax.dot_general(
        k_tile.reshape(bb * tk, d), wkT_ref[...],
        dimension_numbers=(((1,), (0,)), ((), ())),
        preferred_element_type=jnp.float32).reshape(bb, tk, d)        # (BB, TK, D) f32

    # tanh on the EUP; bf16 when compute dtype is bf16 (~2x EUP rate on v6e/v7x).
    t = jnp.tanh((kp + qb_ref[...]).astype(tanh_dtype))               # (BB, TK, D)

    # score_proj as multiply + lane reduction: keeps the score row lane-oriented and
    # avoids feeding a transposed (TK, D) operand to an M=1 matmul.  score_proj.bias
    # is omitted on purpose — softmax is shift invariant so it cancels exactly.
    ws = ws_ref[...].astype(t.dtype)                                  # (1, D)
    sc = jnp.sum((t * ws).astype(jnp.float32), axis=-1)               # (BB, TK) f32

    if mask_last:
        col = lax.broadcasted_iota(jnp.int32, sc.shape, 1) + ki * tk
        sc = jnp.where(col < seq_len, sc, -jnp.inf)

    # Exact online softmax accumulation of the context vector.
    m_prev = m_ref[...]                                               # (BB, 1)
    m_new = jnp.maximum(m_prev, jnp.max(sc, axis=-1, keepdims=True))
    alpha = jnp.exp(m_prev - m_new)                                   # (BB, 1)
    p = jnp.exp(sc - m_new)                                           # (BB, TK) f32
    l_ref[...] = alpha * l_ref[...] + jnp.sum(p, axis=-1, keepdims=True)

    pv = jnp.einsum("bqt,btd->bqd", p[:, None, :].astype(k_tile.dtype), k_tile,
                    preferred_element_type=jnp.float32)               # (BB, 1, D)
    acc_ref[...] = alpha[:, :, None] * acc_ref[...] + pv
    m_ref[...] = m_new

    # Stash this tile's (still un-normalized) probabilities into the resident,
    # lane-dense attention row; remember which running max they were referenced to.
    lane = lax.broadcasted_iota(jnp.int32, mt_ref.shape, 1)
    mt_ref[...] = jnp.where(lane == ki, m_new, mt_ref[...])
    start = pl.multiple_of(ki * tk, 128)
    attn_ref[:, pl.ds(start, tk)] = p.astype(attn_ref.dtype)

    @pl.when(ki == num_k_blocks - 1)
    def _finalize():
        inv_l = pl.reciprocal(l_ref[...], approx=False)               # (BB, 1)
        ctx_ref[...] = (acc_ref[...] * inv_l[:, :, None]).astype(ctx_ref.dtype)
        m_fin = m_ref[...]
        # Static loop: num_k_blocks = Lk / tk is small for the intended tile sizes.
        for j in range(num_k_blocks):
            scale = jnp.exp(mt_ref[:, j:j + 1] - m_fin) * inv_l       # (BB, 1)
            cols = attn_ref[:, j * tk:(j + 1) * tk].astype(jnp.float32)
            attn_ref[:, j * tk:(j + 1) * tk] = (cols * scale).astype(attn_ref.dtype)


def additive_attention(query, key, wq, wk, bias, w_score, b_score=None, *,
                       block_k=512, batch_block=None, compute_dtype=None,
                       vmem_budget_bytes=48 * 1024 * 1024):
    """Pallas TPU forward of AdditiveAttention.

    query:   (B, 1, D)   decoder state (canonical single-step Bahdanau query)
    key:     (B, Lk, D)  encoder outputs
    wq, wk:  (D, D)      query_proj / key_proj weights (PyTorch (out, in) layout)
    bias:    (D,)        additive bias
    w_score: (1, D)      score_proj weight
    b_score: (1,)        score_proj bias (cancels under softmax; kept for API compat)
    compute_dtype: e.g. jnp.bfloat16 to feed the MXU / key stream in bf16
                   (f32 accumulation).  Defaults to the input dtype.
    returns: context (B, 1, D), attn (B, Lk)
    """
    B, Lq, D = query.shape
    Bk, Lk, Dk = key.shape
    assert Lq == 1, "kernel implements the canonical q_len == 1 Bahdanau query"
    # TODO(synk): support the q_len == v_len elementwise-broadcast variant of the module.
    assert B == Bk and D == Dk, "query/key batch and feature dims must match"

    out_dtype = query.dtype
    cdt = np.dtype(compute_dtype) if compute_dtype is not None else np.dtype(query.dtype)
    # bf16 tanh pays on v6e/v7x (EUP has bf16 there); on v5e pass compute_dtype=float32.
    tanh_dtype = jnp.bfloat16 if cdt == jnp.bfloat16 else jnp.float32

    # Batch tile: fill the 8 (f32) / 16 (bf16) sublanes of a vreg.
    if batch_block is None:
        batch_block = 16 if cdt == jnp.bfloat16 else 8
    bb = min(batch_block, B)
    b_pad = _round_up(B, bb)

    cbytes = np.dtype(cdt).itemsize
    obytes = np.dtype(out_dtype).itemsize

    # Key tile: as large as the VMEM budget allows (multiple of 128, >= 128); the
    # ragged tail is zero-padded + masked — never a full-Lk or grid-blowing fallback.
    tk = min(_round_up(block_k, 128), _round_up(Lk, 128))
    while tk > 128 and _vmem_bytes(bb, tk, _round_up(Lk, tk), D, cbytes, obytes) > vmem_budget_bytes:
        tk -= 128
    lk_pad = _round_up(Lk, tk)
    nk = lk_pad // tk

    # Operand prep (plain XLA, outside the kernel): pre-transpose projection weights to
    # the MXU-native (K, N) layout and pre-cast key/query/weights to the compute dtype
    # so the streamed key DMA is already narrow.
    q2 = query.reshape(B, D).astype(cdt)
    k2 = key.astype(cdt)
    if b_pad != B:
        q2 = jnp.pad(q2, ((0, b_pad - B), (0, 0)))
        k2 = jnp.pad(k2, ((0, b_pad - B), (0, 0), (0, 0)))
    if lk_pad != Lk:
        k2 = jnp.pad(k2, ((0, 0), (0, lk_pad - Lk), (0, 0)))
    wqT = wq.T.astype(cdt)
    wkT = wk.T.astype(cdt)
    bias2 = bias.reshape(1, D).astype(jnp.float32)
    ws2 = w_score.reshape(1, D).astype(jnp.float32)
    # b_score is intentionally not fed to the kernel (shift invariance of softmax).

    kernel = functools.partial(
        _additive_attention_kernel,
        num_k_blocks=nk, seq_len=Lk, mask_last=(lk_pad != Lk), tanh_dtype=tanh_dtype)

    need = _vmem_bytes(bb, tk, lk_pad, D, cbytes, obytes)
    vmem_limit = int(min(128 * 1024 * 1024, max(16 * 1024 * 1024, need * 5 // 4)))

    flops = 2 * b_pad * D * D * (lk_pad + 1) + 4 * b_pad * lk_pad * D
    transcendentals = b_pad * lk_pad * (D + 2)
    bytes_accessed = (k2.size * cbytes + q2.size * cbytes + 2 * D * D * cbytes
                      + b_pad * D * obytes + b_pad * lk_pad * obytes)

    ctx, attn = pl.pallas_call(
        kernel,
        grid=(b_pad // bb, nk),
        in_specs=[
            pl.BlockSpec((bb, D), lambda b, k: (b, 0)),        # query rows
            pl.BlockSpec((bb, tk, D), lambda b, k: (b, k, 0)),  # key tiles (streamed)
            pl.BlockSpec((D, D), lambda b, k: (0, 0)),          # WqT (resident)
            pl.BlockSpec((D, D), lambda b, k: (0, 0)),          # WkT (resident)
            pl.BlockSpec((1, D), lambda b, k: (0, 0)),          # bias
            pl.BlockSpec((1, D), lambda b, k: (0, 0)),          # w_score
        ],
        out_specs=[
            pl.BlockSpec((bb, 1, D), lambda b, k: (b, 0, 0)),   # context
            pl.BlockSpec((bb, lk_pad), lambda b, k: (b, 0)),    # attention row (resident)
        ],
        out_shape=(
            jax.ShapeDtypeStruct((b_pad, 1, D), out_dtype),
            jax.ShapeDtypeStruct((b_pad, lk_pad), out_dtype),
        ),
        scratch_shapes=[
            pltpu.VMEM((bb, 1, D), jnp.float32),   # query projection + bias
            pltpu.VMEM((bb, 1), jnp.float32),      # running max
            pltpu.VMEM((bb, 1), jnp.float32),      # running denominator
            pltpu.VMEM((bb, 1, D), jnp.float32),   # context accumulator
            pltpu.VMEM((bb, nk), jnp.float32),     # per-tile softmax reference max
        ],
        compiler_params=pltpu.CompilerParams(
            dimension_semantics=("parallel", "arbitrary"),
            vmem_limit_bytes=vmem_limit,
        ),
        cost_estimate=pl.CostEstimate(
            flops=int(flops),
            transcendentals=int(transcendentals),
            bytes_accessed=int(bytes_accessed),
        ),
    )(q2, k2, wqT, wkT, bias2, ws2)

    return ctx[:B], attn[:B, :Lk]


def _reference(query, key, wq, wk, bias, w_score, b_score):
    """Pure-JAX mirror of the PyTorch module's forward (f32)."""
    qp = jnp.einsum("bqd,ed->bqe", query, wq)                      # query_proj
    kp = jnp.einsum("bkd,ed->bke", key, wk)                        # key_proj
    t = jnp.tanh(kp + qp + bias)
    score = jnp.einsum("bkd,od->bko", t, w_score)[..., 0] + b_score  # (B, Lk)
    attn = jax.nn.softmax(score, axis=-1)
    context = jnp.einsum("bk,bkd->bd", attn, key)[:, None, :]      # (B, 1, D)
    return context, attn


if __name__ == "__main__":
    # Small deterministic shapes: batch=10, q_len=1, k_len=320, hidden_dim=32.
    # block_k=128 -> 3 key tiles with a masked ragged tail; B=10 with an 8-row batch
    # tile exercises batch tiling + batch padding.
    B, Lk, D = 10, 320, 32
    root = jax.random.PRNGKey(0)
    kq, kk, kwq, kwk, kb, kws, kbs = jax.random.split(root, 7)

    query = jax.random.normal(kq, (B, 1, D), dtype=jnp.float32)
    key = jax.random.normal(kk, (B, Lk, D), dtype=jnp.float32)
    wq = jax.random.normal(kwq, (D, D), dtype=jnp.float32) * (D ** -0.5)
    wk = jax.random.normal(kwk, (D, D), dtype=jnp.float32) * (D ** -0.5)
    bias = jax.random.uniform(kb, (D,), jnp.float32, -0.1, 0.1)
    w_score = jax.random.normal(kws, (1, D), dtype=jnp.float32) * (D ** -0.5)
    b_score = jax.random.normal(kbs, (1,), dtype=jnp.float32) * 0.1

    ctx_gold, attn_gold = _reference(query, key, wq, wk, bias, w_score, b_score)

    # Exact (f32-compute) path.
    context, attn = additive_attention(query, key, wq, wk, bias, w_score, b_score,
                                       block_k=128)
    jax.block_until_ready(context)
    jax.block_until_ready(attn)
    assert context.shape == (B, 1, D) and attn.shape == (B, Lk)
    assert jnp.allclose(attn, attn_gold, atol=1e-4, rtol=1e-4), "attn mismatch (f32)"
    assert jnp.allclose(context, ctx_gold, atol=1e-4, rtol=1e-4), "context mismatch (f32)"

    # bf16 MXU / bf16 key-stream path (single larger key tile); looser tolerance.
    ctx_bf, attn_bf = additive_attention(query, key, wq, wk, bias, w_score, b_score,
                                         block_k=512, compute_dtype=jnp.bfloat16)
    jax.block_until_ready(ctx_bf)
    jax.block_until_ready(attn_bf)
    assert jnp.allclose(attn_bf, attn_gold, atol=3e-2, rtol=5e-2), "attn mismatch (bf16)"
    assert jnp.allclose(ctx_bf, ctx_gold, atol=3e-2, rtol=5e-2), "context mismatch (bf16)"

    print("KERNEL_OK")
</pallas_src>

<mosaic_0001>
module attributes {stable_mosaic.version = 11 : i64} {
  func.func @_additive_attention_kernel(%arg0: i32, %arg1: i32, %arg2: memref<8x32xf32, #tpu.memory_space<vmem>>, %arg3: memref<8x128x32xf32, #tpu.memory_space<vmem>>, %arg4: memref<32x32xf32, #tpu.memory_space<vmem>>, %arg5: memref<32x32xf32, #tpu.memory_space<vmem>>, %arg6: memref<1x32xf32, #tpu.memory_space<vmem>>, %arg7: memref<1x32xf32, #tpu.memory_space<vmem>>, %arg8: memref<8x1x32xf32, #tpu.memory_space<vmem>>, %arg9: memref<8x384xf32, #tpu.memory_space<vmem>>, %arg10: memref<8x1x32xf32, #tpu.memory_space<vmem>>, %arg11: memref<8x1xf32, #tpu.memory_space<vmem>>, %arg12: memref<8x1xf32, #tpu.memory_space<vmem>>, %arg13: memref<8x1x32xf32, #tpu.memory_space<vmem>>, %arg14: memref<8x3xf32, #tpu.memory_space<vmem>>) attributes {dimension_semantics = [#tpu.dimension_semantics<parallel>, #tpu.dimension_semantics<arbitrary>], iteration_bounds = array<i64: 2, 3>, scalar_prefetch = 0 : i64, scratch_operands = 5 : i64, tpu.core_type = #tpu.core_type<tc>, window_params = [{transform_indices = @transform_0, window_bounds = array<i64: 8, 32>}, {transform_indices = @transform_1, window_bounds = array<i64: 8, 128, 32>}, {pipeline_mode = #tpu.pipeline_mode<synchronous>, transform_indices = @transform_2, window_bounds = array<i64: 32, 32>}, {pipeline_mode = #tpu.pipeline_mode<synchronous>, transform_indices = @transform_3, window_bounds = array<i64: 32, 32>}, {pipeline_mode = #tpu.pipeline_mode<synchronous>, transform_indices = @transform_4, window_bounds = array<i64: 1, 32>}, {pipeline_mode = #tpu.pipeline_mode<synchronous>, transform_indices = @transform_5, window_bounds = array<i64: 1, 32>}, {transform_indices = @transform_6, window_bounds = array<i64: 8, 1, 32>}, {transform_indices = @transform_7, window_bounds = array<i64: 8, 384>}]} {
    %c0_i32 = arith.constant 0 : i32
    %0 = arith.cmpi eq, %arg1, %c0_i32 : i32
    %1 = arith.extui %0 : i1 to i32
    %c0_i32_0 = arith.constant 0 : i32
    %2 = arith.cmpi ne, %1, %c0_i32_0 : i32
    scf.if %2 {
      %c0_36 = arith.constant 0 : index
      %c0_37 = arith.constant 0 : index
      %64 = vector.load %arg2[%c0_36, %c0_37] : memref<8x32xf32, #tpu.memory_space<vmem>>, vector<8x32xf32>
      %c0_38 = arith.constant 0 : index
      %c0_39 = arith.constant 0 : index
      %65 = vector.load %arg4[%c0_38, %c0_39] : memref<32x32xf32, #tpu.memory_space<vmem>>, vector<32x32xf32>
      %cst_40 = arith.constant dense<0.000000e+00> : vector<8x32xf32>
      %66 = tpu.matmul %64, %65, %cst_40 {dimension_numbers = #tpu.dot_dimension_numbers<[1], [0], [0], [1], [0, 0, 1, 1], [], []>} : vector<8x32xf32>, vector<32x32xf32>, vector<8x32xf32> -> vector<8x32xf32>
      %c0_41 = arith.constant 0 : index
      %c0_42 = arith.constant 0 : index
      %67 = vector.load %arg6[%c0_41, %c0_42] : memref<1x32xf32, #tpu.memory_space<vmem>>, vector<1x32xf32>
      %68 = vector.broadcast %67 : vector<1x32xf32> to vector<8x32xf32>
      %69 = arith.addf %66, %68 : vector<8x32xf32>
      %70 = vector.shape_cast %69 : vector<8x32xf32> to vector<8x1x32xf32>
      %c0_43 = arith.constant 0 : index
      %c0_44 = arith.constant 0 : index
      %c0_45 = arith.constant 0 : index
      %71 = vector.load %arg10[%c0_43, %c0_44, %c0_45] : memref<8x1x32xf32, #tpu.memory_space<vmem>>, vector<8x1x32xf32>
      tpu.vector_store %arg10[%c0_43, %c0_44, %c0_45], %70 {strides = array<i32>} : memref<8x1x32xf32, #tpu.memory_space<vmem>>, vector<8x1x32xf32>,
      %cst_46 = arith.constant 0xFF800000 : f32
      %72 = vector.broadcast %cst_46 : f32 to vector<8x1xf32>
      %c0_47 = arith.constant 0 : index
      %c0_48 = arith.constant 0 : index
      %73 = vector.load %arg11[%c0_47, %c0_48] : memref<8x1xf32, #tpu.memory_space<vmem>>, vector<8x1xf32>
      tpu.vector_store %arg11[%c0_47, %c0_48], %72 {strides = array<i32>} : memref<8x1xf32, #tpu.memory_space<vmem>>, vector<8x1xf32>,
      %cst_49 = arith.constant 0.000000e+00 : f32
      %74 = vector.broadcast %cst_49 : f32 to vector<8x1xf32>
      %c0_50 = arith.constant 0 : index
      %c0_51 = arith.constant 0 : index
      %75 = vector.load %arg12[%c0_50, %c0_51] : memref<8x1xf32, #tpu.memory_space<vmem>>, vector<8x1xf32>
      tpu.vector_store %arg12[%c0_50, %c0_51], %74 {strides = array<i32>} : memref<8x1xf32, #tpu.memory_space<vmem>>, vector<8x1xf32>,
      %cst_52 = arith.constant 0.000000e+00 : f32
      %76 = vector.broadcast %cst_52 : f32 to vector<8x1x32xf32>
      %c0_53 = arith.constant 0 : index
      %c0_54 = arith.constant 0 : index
      %c0_55 = arith.constant 0 : index
      %77 = vector.load %arg13[%c0_53, %c0_54, %c0_55] : memref<8x1x32xf32, #tpu.memory_space<vmem>>, vector<8x1x32xf32>
      tpu.vector_store %arg13[%c0_53, %c0_54, %c0_55], %76 {strides = array<i32>} : memref<8x1x32xf32, #tpu.memory_space<vmem>>, vector<8x1x32xf32>,
      %cst_56 = arith.constant 0.000000e+00 : f32
      %78 = vector.broadcast %cst_56 : f32 to vector<8x3xf32>
      %c0_57 = arith.constant 0 : index
      %c0_58 = arith.constant 0 : index
      %79 = vector.load %arg14[%c0_57, %c0_58] : memref<8x3xf32, #tpu.memory_space<vmem>>, vector<8x3xf32>
      tpu.vector_store %arg14[%c0_57, %c0_58], %78 {strides = array<i32>} : memref<8x3xf32, #tpu.memory_space<vmem>>, vector<8x3xf32>,
    } else {
    }
    %c0 = arith.constant 0 : index
    %c0_1 = arith.constant 0 : index
    %c0_2 = arith.constant 0 : index
    %3 = vector.load %arg3[%c0, %c0_1, %c0_2] : memref<8x128x32xf32, #tpu.memory_space<vmem>>, vector<8x128x32xf32>
    %4 = vector.shape_cast %3 : vector<8x128x32xf32> to vector<1024x32xf32>
    %c0_3 = arith.constant 0 : index
    %c0_4 = arith.constant 0 : index
    %5 = vector.load %arg5[%c0_3, %c0_4] : memref<32x32xf32, #tpu.memory_space<vmem>>, vector<32x32xf32>
    %cst = arith.constant dense<0.000000e+00> : vector<1024x32xf32>
    %6 = tpu.matmul %4, %5, %cst {dimension_numbers = #tpu.dot_dimension_numbers<[1], [0], [0], [1], [0, 0, 1, 1], [], []>} : vector<1024x32xf32>, vector<32x32xf32>, vector<1024x32xf32> -> vector<1024x32xf32>
    %7 = vector.shape_cast %6 : vector<1024x32xf32> to vector<8x128x32xf32>
    %c0_5 = arith.constant 0 : index
    %c0_6 = arith.constant 0 : index
    %c0_7 = arith.constant 0 : index
    %8 = vector.load %arg10[%c0_5, %c0_6, %c0_7] : memref<8x1x32xf32, #tpu.memory_space<vmem>>, vector<8x1x32xf32>
    %9 = vector.broadcast %8 : vector<8x1x32xf32> to vector<8x128x32xf32>
    %10 = arith.addf %7, %9 : vector<8x128x32xf32>
    %11 = math.tanh %10 : vector<8x128x32xf32>
    %c0_8 = arith.constant 0 : index
    %c0_9 = arith.constant 0 : index
    %12 = vector.load %arg7[%c0_8, %c0_9] : memref<1x32xf32, #tpu.memory_space<vmem>>, vector<1x32xf32>
    %13 = vector.shape_cast %12 : vector<1x32xf32> to vector<1x1x32xf32>
    %14 = vector.broadcast %13 : vector<1x1x32xf32> to vector<8x128x32xf32>
    %15 = arith.mulf %11, %14 : vector<8x128x32xf32>
    %cst_10 = arith.constant dense<0.000000e+00> : vector<8x128xf32>
    %16 = vector.multi_reduction <add>, %15, %cst_10 [2] : vector<8x128x32xf32> to vector<8x128xf32>
    %17 = tpu.iota {dimensions = array<i32: 1>} : vector<8x128xi32>
    %c128_i32 = arith.constant 128 : i32
    %18 = arith.muli %arg1, %c128_i32 : i32
    %19 = vector.broadcast %18 : i32 to vector<8x128xi32>
    %20 = arith.addi %17, %19 : vector<8x128xi32>
    %c320_i32 = arith.constant 320 : i32
    %21 = vector.broadcast %c320_i32 : i32 to vector<8x128xi32>
    %22 = arith.cmpi slt, %20, %21 : vector<8x128xi32>
    %cst_11 = arith.constant 0xFF800000 : f32
    %23 = vector.broadcast %cst_11 : f32 to vector<8x128xf32>
    %24 = arith.select %22, %16, %23 : vector<8x128xi1>, vector<8x128xf32>
    %c0_12 = arith.constant 0 : index
    %c0_13 = arith.constant 0 : index
    %25 = vector.load %arg11[%c0_12, %c0_13] : memref<8x1xf32, #tpu.memory_space<vmem>>, vector<8x1xf32>
    %cst_14 = arith.constant dense<0xFF800000> : vector<8xf32>
    %26 = vector.multi_reduction <maximumf>, %24, %cst_14 [1] : vector<8x128xf32> to vector<8xf32>
    %27 = vector.shape_cast %26 : vector<8xf32> to vector<8x1xf32>
    %28 = arith.maximumf %25, %27 : vector<8x1xf32>
    %29 = arith.subf %25, %28 : vector<8x1xf32>
    %30 = math.exp %29 : vector<8x1xf32>
    %31 = vector.broadcast %28 : vector<8x1xf32> to vector<8x128xf32>
    %32 = arith.subf %24, %31 : vector<8x128xf32>
    %33 = math.exp %32 : vector<8x128xf32>
    %c0_15 = arith.constant 0 : index
    %c0_16 = arith.constant 0 : index
    %34 = vector.load %arg12[%c0_15, %c0_16] : memref<8x1xf32, #tpu.memory_space<vmem>>, vector<8x1xf32>
    %35 = arith.mulf %30, %34 : vector<8x1xf32>
    %cst_17 = arith.constant dense<0.000000e+00> : vector<8xf32>
    %36 = vector.multi_reduction <add>, %33, %cst_17 [1] : vector<8x128xf32> to vector<8xf32>
    %37 = vector.shape_cast %36 : vector<8xf32> to vector<8x1xf32>
    %38 = arith.addf %35, %37 : vector<8x1xf32>
    %c0_18 = arith.constant 0 : index
    %c0_19 = arith.constant 0 : index
    %39 = vector.load %arg12[%c0_18, %c0_19] : memref<8x1xf32, #tpu.memory_space<vmem>>, vector<8x1xf32>
    tpu.vector_store %arg12[%c0_18, %c0_19], %38 {strides = array<i32>} : memref<8x1xf32, #tpu.memory_space<vmem>>, vector<8x1xf32>,
    %40 = vector.shape_cast %33 : vector<8x128xf32> to vector<8x1x128xf32>
    "tpu.trace_start"() <{level = 10 : i32, message = "bqt,btd->bqd"}> : () -> ()
    %cst_20 = arith.constant dense<0.000000e+00> : vector<8x1x32xf32>
    %41 = tpu.matmul %40, %3, %cst_20 {dimension_numbers = #tpu.dot_dimension_numbers<[2], [1], [1], [2], [0, 0, 0, 1, 1, 2], [0], [0]>} : vector<8x1x128xf32>, vector<8x128x32xf32>, vector<8x1x32xf32> -> vector<8x1x32xf32>
    "tpu.trace_stop"() : () -> ()
    %42 = vector.shape_cast %30 : vector<8x1xf32> to vector<8x1x1xf32>
    %c0_21 = arith.constant 0 : index
    %c0_22 = arith.constant 0 : index
    %c0_23 = arith.constant 0 : index
    %43 = vector.load %arg13[%c0_21, %c0_22, %c0_23] : memref<8x1x32xf32, #tpu.memory_space<vmem>>, vector<8x1x32xf32>
    %44 = vector.broadcast %42 : vector<8x1x1xf32> to vector<8x1x32xf32>
    %45 = arith.mulf %44, %43 : vector<8x1x32xf32>
    %46 = arith.addf %45, %41 : vector<8x1x32xf32>
    %c0_24 = arith.constant 0 : index
    %c0_25 = arith.constant 0 : index
    %c0_26 = arith.constant 0 : index
    %47 = vector.load %arg13[%c0_24, %c0_25, %c0_26] : memref<8x1x32xf32, #tpu.memory_space<vmem>>, vector<8x1x32xf32>
    tpu.vector_store %arg13[%c0_24, %c0_25, %c0_26], %46 {strides = array<i32>} : memref<8x1x32xf32, #tpu.memory_space<vmem>>, vector<8x1x32xf32>,
    %c0_27 = arith.constant 0 : index
    %c0_28 = arith.constant 0 : index
    %48 = vector.load %arg11[%c0_27, %c0_28] : memref<8x1xf32, #tpu.memory_space<vmem>>, vector<8x1xf32>
    tpu.vector_store %arg11[%c0_27, %c0_28], %28 {strides = array<i32>} : memref<8x1xf32, #tpu.memory_space<vmem>>, vector<8x1xf32>,
    %49 = tpu.iota {dimensions = array<i32: 1>} : vector<8x3xi32>
    %50 = vector.broadcast %arg1 : i32 to vector<8x3xi32>
    %51 = arith.cmpi eq, %49, %50 : vector<8x3xi32>
    %c0_29 = arith.constant 0 : index
    %c0_30 = arith.constant 0 : index
    %52 = vector.load %arg14[%c0_29, %c0_30] : memref<8x3xf32, #tpu.memory_space<vmem>>, vector<8x3xf32>
    %53 = vector.shape_cast %28 : vector<8x1xf32> to vector<8x1xf32>
    %54 = vector.broadcast %53 : vector<8x1xf32> to vector<8x3xf32>
    %55 = arith.select %51, %54, %52 : vector<8x3xi1>, vector<8x3xf32>
    %c0_31 = arith.constant 0 : index
    %c0_32 = arith.constant 0 : index
    %56 = vector.load %arg14[%c0_31, %c0_32] : memref<8x3xf32, #tpu.memory_space<vmem>>, vector<8x3xf32>
    tpu.vector_store %arg14[%c0_31, %c0_32], %55 {strides = array<i32>} : memref<8x3xf32, #tpu.memory_space<vmem>>, vector<8x3xf32>,
    %c128_i32_33 = arith.constant 128 : i32
    %57 = arith.muli %arg1, %c128_i32_33 : i32
    %58 = tpu.assume_multiple %57, 128 : i32
    %c0_34 = arith.constant 0 : index
    %59 = arith.index_cast %58 : i32 to index
    %60 = vector.load %arg9[%c0_34, %59] : memref<8x384xf32, #tpu.memory_space<vmem>>, vector<8x128xf32>
    tpu.vector_store %arg9[%c0_34, %59], %33 {strides = array<i32>} : memref<8x384xf32, #tpu.memory_space<vmem>>, vector<8x128xf32>,
    %c2_i32 = arith.constant 2 : i32
    %61 = arith.cmpi eq, %arg1, %c2_i32 : i32
    %62 = arith.extui %61 : i1 to i32
    %c0_i32_35 = arith.constant 0 : i32
    %63 = arith.cmpi ne, %62, %c0_i32_35 : i32
    scf.if %63 {
      %c0_36 = arith.constant 0 : index
      %c0_37 = arith.constant 0 : index
      %64 = vector.load %arg12[%c0_36, %c0_37] : memref<8x1xf32, #tpu.memory_space<vmem>>, vector<8x1xf32>
      %65 = tpu.reciprocal %64 : vector<8x1xf32> -> vector<8x1xf32>
      %c0_38 = arith.constant 0 : index
      %c0_39 = arith.constant 0 : index
      %c0_40 = arith.constant 0 : index
      %66 = vector.load %arg13[%c0_38, %c0_39, %c0_40] : memref<8x1x32xf32, #tpu.memory_space<vmem>>, vector<8x1x32xf32>
      %67 = vector.shape_cast %65 : vector<8x1xf32> to vector<8x1x1xf32>
      %68 = vector.broadcast %67 : vector<8x1x1xf32> to vector<8x1x32xf32>
      %69 = arith.mulf %66, %68 : vector<8x1x32xf32>
      %c0_41 = arith.constant 0 : index
      %c0_42 = arith.constant 0 : index
      %c0_43 = arith.constant 0 : index
      %70 = vector.load %arg8[%c0_41, %c0_42, %c0_43] : memref<8x1x32xf32, #tpu.memory_space<vmem>>, vector<8x1x32xf32>
      tpu.vector_store %arg8[%c0_41, %c0_42, %c0_43], %69 {strides = array<i32>} : memref<8x1x32xf32, #tpu.memory_space<vmem>>, vector<8x1x32xf32>,
      %c0_44 = arith.constant 0 : index
      %c0_45 = arith.constant 0 : index
      %71 = vector.load %arg11[%c0_44, %c0_45] : memref<8x1xf32, #tpu.memory_space<vmem>>, vector<8x1xf32>
      %c0_46 = arith.constant 0 : index
      %c0_47 = arith.constant 0 : index
      %72 = vector.load %arg14[%c0_46, %c0_47] : memref<8x3xf32, #tpu.memory_space<vmem>>, vector<8x1xf32>
      %73 = arith.subf %72, %71 : vector<8x1xf32>
      %74 = math.exp %73 : vector<8x1xf32>
      %75 = arith.mulf %74, %65 : vector<8x1xf32>
      %c0_48 = arith.constant 0 : index
      %c0_49 = arith.constant 0 : index
      %76 = vector.load %arg9[%c0_48, %c0_49] : memref<8x384xf32, #tpu.memory_space<vmem>>, vector<8x128xf32>
      %77 = vector.broadcast %75 : vector<8x1xf32> to vector<8x128xf32>
      %78 = arith.mulf %76, %77 : vector<8x128xf32>
      %c0_50 = arith.constant 0 : index
      %c0_51 = arith.constant 0 : index
      %79 = vector.load %arg9[%c0_50, %c0_51] : memref<8x384xf32, #tpu.memory_space<vmem>>, vector<8x128xf32>
      tpu.vector_store %arg9[%c0_50, %c0_51], %78 {strides = array<i32>} : memref<8x384xf32, #tpu.memory_space<vmem>>, vector<8x128xf32>,
      %c0_52 = arith.constant 0 : index
      %c1 = arith.constant 1 : index
      %80 = vector.load %arg14[%c0_52, %c1] : memref<8x3xf32, #tpu.memory_space<vmem>>, vector<8x1xf32>
      %81 = arith.subf %80, %71 : vector<8x1xf32>
      %82 = math.exp %81 : vector<8x1xf32>
      %83 = arith.mulf %82, %65 : vector<8x1xf32>
      %c0_53 = arith.constant 0 : index
      %c128 = arith.constant 128 : index
      %84 = vector.load %arg9[%c0_53, %c128] : memref<8x384xf32, #tpu.memory_space<vmem>>, vector<8x128xf32>
      %85 = vector.broadcast %83 : vector<8x1xf32> to vector<8x128xf32>
      %86 = arith.mulf %84, %85 : vector<8x128xf32>
      %c0_54 = arith.constant 0 : index
      %c128_55 = arith.constant 128 : index
      %87 = vector.load %arg9[%c0_54, %c128_55] : memref<8x384xf32, #tpu.memory_space<vmem>>, vector<8x128xf32>
      tpu.vector_store %arg9[%c0_54, %c128_55], %86 {strides = array<i32>} : memref<8x384xf32, #tpu.memory_space<vmem>>, vector<8x128xf32>,
      %c0_56 = arith.constant 0 : index
      %c2 = arith.constant 2 : index
      %88 = vector.load %arg14[%c0_56, %c2] : memref<8x3xf32, #tpu.memory_space<vmem>>, vector<8x1xf32>
      %89 = arith.subf %88, %71 : vector<8x1xf32>
      %90 = math.exp %89 : vector<8x1xf32>
      %91 = arith.mulf %90, %65 : vector<8x1xf32>
      %c0_57 = arith.constant 0 : index
      %c256 = arith.constant 256 : index
      %92 = vector.load %arg9[%c0_57, %c256] : memref<8x384xf32, #tpu.memory_space<vmem>>, vector<8x128xf32>
      %93 = vector.broadcast %91 : vector<8x1xf32> to vector<8x128xf32>
      %94 = arith.mulf %92, %93 : vector<8x128xf32>
      %c0_58 = arith.constant 0 : index
      %c256_59 = arith.constant 256 : index
      %95 = vector.load %arg9[%c0_58, %c256_59] : memref<8x384xf32, #tpu.memory_space<vmem>>, vector<8x128xf32>
      tpu.vector_store %arg9[%c0_58, %c256_59], %94 {strides = array<i32>} : memref<8x384xf32, #tpu.memory_space<vmem>>, vector<8x128xf32>,
    } else {
    }
    return
  }
  func.func @transform_0(%arg0: i32, %arg1: i32) -> (i32, i32) {
    %c0_i32 = arith.constant 0 : i32
    %c0_i32_0 = arith.constant 0 : i32
    return %arg0, %c0_i32 : i32, i32
  }
  func.func @transform_1(%arg0: i32, %arg1: i32) -> (i32, i32, i32) {
    %c0_i32 = arith.constant 0 : i32
    %c0_i32_0 = arith.constant 0 : i32
    return %arg0, %arg1, %c0_i32 : i32, i32, i32
  }
  func.func @transform_2(%arg0: i32, %arg1: i32) -> (i32, i32) {
    %c0_i32 = arith.constant 0 : i32
    %c0_i32_0 = arith.constant 0 : i32
    %c0_i32_1 = arith.constant 0 : i32
    return %c0_i32, %c0_i32_0 : i32, i32
  }
  func.func @transform_3(%arg0: i32, %arg1: i32) -> (i32, i32) {
    %c0_i32 = arith.constant 0 : i32
    %c0_i32_0 = arith.constant 0 : i32
    %c0_i32_1 = arith.constant 0 : i32
    return %c0_i32, %c0_i32_0 : i32, i32
  }
  func.func @transform_4(%arg0: i32, %arg1: i32) -> (i32, i32) {
    %c0_i32 = arith.constant 0 : i32
    %c0_i32_0 = arith.constant 0 : i32
    %c0_i32_1 = arith.constant 0 : i32
    return %c0_i32, %c0_i32_0 : i32, i32
  }
  func.func @transform_5(%arg0: i32, %arg1: i32) -> (i32, i32) {
    %c0_i32 = arith.constant 0 : i32
    %c0_i32_0 = arith.constant 0 : i32
    %c0_i32_1 = arith.constant 0 : i32
    return %c0_i32, %c0_i32_0 : i32, i32
  }
  func.func @transform_6(%arg0: i32, %arg1: i32) -> (i32, i32, i32) {
    %c0_i32 = arith.constant 0 : i32
    %c0_i32_0 = arith.constant 0 : i32
    %c0_i32_1 = arith.constant 0 : i32
    return %arg0, %c0_i32, %c0_i32_0 : i32, i32, i32
  }
  func.func @transform_7(%arg0: i32, %arg1: i32) -> (i32, i32) {
    %c0_i32 = arith.constant 0 : i32
    %c0_i32_0 = arith.constant 0 : i32
    return %arg0, %c0_i32 : i32, i32
  }
}

</mosaic_0001>

<bundles_post_ra>
// kernel: tpu_custom_call.1
= control target key start
LH: loop header
LB: loop body
LE: loop exit
PB: predicated region body
PF: predicated region fallthrough
CT: control target
= control target key end

     0   :  { %s8891_s0 = inlined_call_operand.vmem [shape: f32[16,32], index: 0, kind: input, shape index: {}]   ;;  %s8892_s1 = inlined_call_operand.vmem [shape: f32[16,384,32], index: 1, kind: input, shape index: {}]   ;;  %s8893_s2 = inlined_call_operand.vmem [shape: f32[32,32], index: 2, kind: input, shape index: {}]   ;;  %s8894_s3 = inlined_call_operand.vmem [shape: f32[32,32], index: 3, kind: input, shape index: {}]   ;;  %s8895_s4 = inlined_call_operand.vmem [shape: f32[1,32], index: 4, kind: input, shape index: {}]   ;;  %s8896_s5 = inlined_call_operand.vmem [shape: f32[1,32], index: 5, kind: input, shape index: {}]   ;;  %s8897_s6 = inlined_call_operand.hbm [shape: f32[16,1,32], index: 6, kind: output, shape index: {0}]   ;;  %s8898_s7 = inlined_call_operand.hbm [shape: f32[16,384], index: 7, kind: output, shape index: {1}]  }
   0x1   :  { %8911 = sst [smem:[#allocation26_spill]] %s8892_s1 }
   0x2   :  { %13 = vsyncpa [#allocation9], 0 }
   0x3   :  { %15 = vsyncpa [#allocation9 + $0x1], 0 }
   0x4   :  { %16 = vsyncpa [#allocation11], 0 }
   0x5   :  { %18 = vsyncpa [#allocation11 + $0x1], 0  ;;  %s6895_s24 = smov 0   ;;  %s6897_s25 = smov 0  }
   0x6   :  { %s6899_s26 = smov 0   ;;  %s6901_s27 = smov 0  }
   0x7   :  { %s6903_s28 = smov 0   ;;  %s6905_s29 = smov 0  }
   0x8   :  { %s6907_s30 = smov 0   ;;  %s6909_s8 = smov 0  }
   0x9   :  { %s6911_s9 = smov 0   ;;  %s6913_s10 = smov 0  }
   0xa LB: > { %8912 = sst [smem:[#allocation14_spill]] %s6826_s8  ;;  %s5060_s11 = sadd.s32 4294967295, %s6834_s10   ;;  %s6834_s10 = sphi %s6913_s10, %s24_s10   ;;  %s6830_s9 = sphi %s6911_s9, %s8952_s9   ;;  %s6826_s8 = sphi %s6909_s8, %s8951_s8   ;;  %s6822_s30 = sphi %s6907_s30, %s8950_s30   ;;  %s6818_s29 = sphi %s6905_s29, %s8949_s29   ;;  %s6814_s28 = sphi %s6903_s28, %s8957_s28   ;;  %s6810_s27 = sphi %s6901_s27, %s8956_s27   ;;  %s6806_s26 = sphi %s6899_s26, %s8955_s26   ;;  %s6802_s25 = sphi %s6897_s25, %s8954_s25   ;;  %s6798_s24 = sphi %s6895_s24, %s8953_s24  }
   0xb   : > { %8913 = sst [smem:[#allocation15_spill]] %s6830_s9  ;;  %s5061_s12 = sadd.s32 4294967294, %s6834_s10  }
   0xc   : > { %s33_s13 = sadd.s32 1, %s6826_s8  ;;  %s36_s14 = sadd.s32 1, %s6830_s9 }
   0xd   : > { %p34_p0 = scmp.ge.s32.totalorder %s33_s13, 3  ;;  %s71_s15 = sadd.s32 1, %s6814_s28 }
   0xe   : > { %p78_p1 = scmp.ne.s32.totalorder %s6814_s28, %s6810_s27  ;;  %p79_p2 = scmp.eq.s32.totalorder %s6834_s10, 0 }
   0xf   : > { %s8959_s13 = smov (%p34_p0, %s33_s13), 0  ;;  %s8961_s14 = smov (!%p34_p0, %s36_s14), %s6830_s9 }
  0x10   : > { %8914 = sst [smem:[#allocation16_spill]] %s8959_s13  ;;  %s67_s16 = ssub.s32 %s6826_s8, %s8959_s13 }
  0x11   : > { %p6958_p3 = por %p79_p2, %p78_p1  ;;  %p38_p4 = scmp.ge.s32.totalorder %s8961_s14, 2 }
  0x12   : > { %s181_s18 = sadd.s32 1, %s6806_s26  ;;  %p191_p5 = scmp.ne.s32.totalorder %s6806_s26, %s6802_s25 }
  0x13   : > { %p192_p6 = scmp.eq.s32.totalorder %s5060_s11, 5  ;;  %s8963_s14 = smov (%p38_p4, %s8961_s14), 0 }
  0x14   : > { %8916 = sst [smem:[#allocation17_spill]] %s8963_s14  ;;  %p197_p8 = scmp.ne.s32.totalorder %s6802_s25, %s6798_s24 }
  0x15   : > { %p6967_p7 = por %p192_p6, %p191_p5  ;;  %s66_s20 = ssub.s32 %s6830_s9, %s8963_s14 }
  0x16   : > { %p198_p9 = scmp.eq.s32.totalorder %s5061_s12, 5  ;;  %s68_s21 = sor.u32 %s67_s16, %s66_s20 }
  0x17   : > { %p179_p10 = scmp.eq.s32.totalorder %s66_s20, 0  ;;  %p69_p11 = scmp.eq.s32.totalorder %s68_s21, 0 }
  0x18   : > { %p6975_p12 = por %p198_p9, %p197_p8  ;;  %p5063_p13 = scmp.ge.s32.totalorder %s6834_s10, 6 }
  0x19   : > { %s6980_s23 = scalar_select %p179_p10, %s6806_s26, %s181_s18  }
  0x1a   : > { %s8918_s22 = scalar_select %p6975_p12, 1, 0 }
  0x1b   : > { %s6983_s11 = scalar_select %p69_p11, %s6814_s28, %s71_s15  }
  0x1c   : > { %8919 = sst [smem:[#allocation18_spill]] %s8918_s22  ;;  %252 = sbr.rel (%p5063_p13) target bundleno = 109 (0x6d), region = 32 }
  0x1d   : > { %8920 = sst [smem:[#allocation19_spill]] %s6983_s11 }
  0x23   : > { %262 = sbr.rel (!%p6958_p3) target bundleno = 109 (0x6d), region = 40  ;;  %s264_s12 = sand.u32 (%p6958_p3), 1, %s6814_s28  }
  0x24   : > { %s5066_s16 = sshll.u32 (%p6958_p3), %s6826_s8, 4  ;;  %s5064_s20 = sshll.u32 (%p6958_p3), %s264_s12, 10 }
  0x25   : > { %s6193_s21 = smul.u32 (%p6958_p3), 384, %s6830_s9  ;;  %s8921_s1 = sld [smem:[#allocation26_spill]] (%p6958_p3) }
  0x26   : > { %s6999_s17 = scalar_lea.vmem (%p6958_p3), [#allocation7], %s5064_s20 }
  0x27   : > { %s270_s14 = sadd.s32 (%p6958_p3), %s6193_s21, %s5066_s16 }
  0x28   : > { %s5068_s13 = sshll.u32 (%p6958_p3), %s270_s14, 3 }
  0x2b   : > { %s6994_s15 = scalar_lea.vmem %s8921_s1, %s5068_s13 }
  0x2c   : > { %v554_v0 = vld [vmem:[%s6994_s15] sm:$0xff]  ;;  %v556_v1 = vld [vmem:[%s6994_s15 + $0x8] sm:$0xff]  ;;  %v558_v2 = vld [vmem:[%s6994_s15 + $0x10] sm:$0xff] }
  0x2d   : > { %555 = vst [vmem:[%s6999_s17] sm:$0xff] %v554_v0  ;;  %557 = vst [vmem:[%s6999_s17 + $0x8] sm:$0xff] %v556_v1  ;;  %v560_v3 = vld [vmem:[%s6994_s15 + $0x18] sm:$0xff]  ;;  %v562_v4 = vld [vmem:[%s6994_s15 + $0x20] sm:$0xff] }
  0x2e   : > { %559 = vst [vmem:[%s6999_s17 + $0x10] sm:$0xff] %v558_v2  ;;  %v564_v5 = vld [vmem:[%s6994_s15 + $0x28] sm:$0xff]  ;;  %561 = vst [vmem:[%s6999_s17 + $0x18] sm:$0xff] %v560_v3  ;;  %v566_v6 = vld [vmem:[%s6994_s15 + $0x30] sm:$0xff] }
  0x2f   : > { %563 = vst [vmem:[%s6999_s17 + $0x20] sm:$0xff] %v562_v4  ;;  %565 = vst [vmem:[%s6999_s17 + $0x28] sm:$0xff] %v564_v5  ;;  %v568_v7 = vld [vmem:[%s6994_s15 + $0x38] sm:$0xff]  ;;  %v570_v8 = vld [vmem:[%s6994_s15 + $0x40] sm:$0xff] }
  0x30   : > { %567 = vst [vmem:[%s6999_s17 + $0x30] sm:$0xff] %v566_v6  ;;  %569 = vst [vmem:[%s6999_s17 + $0x38] sm:$0xff] %v568_v7  ;;  %v572_v9 = vld [vmem:[%s6994_s15 + $0x48] sm:$0xff]  ;;  %v574_v10 = vld [vmem:[%s6994_s15 + $0x50] sm:$0xff] }
  0x31   : > { %571 = vst [vmem:[%s6999_s17 + $0x40] sm:$0xff] %v570_v8  ;;  %v576_v11 = vld [vmem:[%s6994_s15 + $0x58] sm:$0xff]  ;;  %573 = vst [vmem:[%s6999_s17 + $0x48] sm:$0xff] %v572_v9  ;;  %v578_v12 = vld [vmem:[%s6994_s15 + $0x60] sm:$0xff] }
  0x32   : > { %575 = vst [vmem:[%s6999_s17 + $0x50] sm:$0xff] %v574_v10  ;;  %577 = vst [vmem:[%s6999_s17 + $0x58] sm:$0xff] %v576_v11  ;;  %v580_v13 = vld [vmem:[%s6994_s15 + $0x68] sm:$0xff]  ;;  %v582_v14 = vld [vmem:[%s6994_s15 + $0x70] sm:$0xff] }
  0x33   : > { %579 = vst [vmem:[%s6999_s17 + $0x60] sm:$0xff] %v578_v12  ;;  %581 = vst [vmem:[%s6999_s17 + $0x68] sm:$0xff] %v580_v13  ;;  %v584_v15 = vld [vmem:[%s6994_s15 + $0x78] sm:$0xff]  ;;  %v586_v16 = vld [vmem:[%s6994_s15 + $0x180] sm:$0xff] }
  0x34   : > { %583 = vst [vmem:[%s6999_s17 + $0x70] sm:$0xff] %v582_v14  ;;  %v588_v17 = vld [vmem:[%s6994_s15 + $0x188] sm:$0xff]  ;;  %585 = vst [vmem:[%s6999_s17 + $0x78] sm:$0xff] %v584_v15  ;;  %v590_v18 = vld [vmem:[%s6994_s15 + $0x190] sm:$0xff] }
  0x35   : > { %587 = vst [vmem:[%s6999_s17 + $0x80] sm:$0xff] %v586_v16  ;;  %589 = vst [vmem:[%s6999_s17 + $0x88] sm:$0xff] %v588_v17  ;;  %v592_v19 = vld [vmem:[%s6994_s15 + $0x198] sm:$0xff]  ;;  %v594_v20 = vld [vmem:[%s6994_s15 + $0x1a0] sm:$0xff] }
  0x36   : > { %591 = vst [vmem:[%s6999_s17 + $0x90] sm:$0xff] %v590_v18  ;;  %593 = vst [vmem:[%s6999_s17 + $0x98] sm:$0xff] %v592_v19  ;;  %v596_v21 = vld [vmem:[%s6994_s15 + $0x1a8] sm:$0xff]  ;;  %v598_v22 = vld [vmem:[%s6994_s15 + $0x1b0] sm:$0xff] }
  0x37   : > { %595 = vst [vmem:[%s6999_s17 + $0xa0] sm:$0xff] %v594_v20  ;;  %v600_v23 = vld [vmem:[%s6994_s15 + $0x1b8] sm:$0xff]  ;;  %597 = vst [vmem:[%s6999_s17 + $0xa8] sm:$0xff] %v596_v21  ;;  %v602_v24 = vld [vmem:[%s6994_s15 + $0x1c0] sm:$0xff] }
  0x38   : > { %599 = vst [vmem:[%s6999_s17 + $0xb0] sm:$0xff] %v598_v22  ;;  %601 = vst [vmem:[%s6999_s17 + $0xb8] sm:$0xff] %v600_v23  ;;  %v604_v25 = vld [vmem:[%s6994_s15 + $0x1c8] sm:$0xff]  ;;  %v606_v26 = vld [vmem:[%s6994_s15 + $0x1d0] sm:$0xff] }
  0x39   : > { %603 = vst [vmem:[%s6999_s17 + $0xc0] sm:$0xff] %v602_v24  ;;  %605 = vst [vmem:[%s6999_s17 + $0xc8] sm:$0xff] %v604_v25  ;;  %v608_v27 = vld [vmem:[%s6994_s15 + $0x1d8] sm:$0xff]  ;;  %v610_v28 = vld [vmem:[%s6994_s15 + $0x1e0] sm:$0xff] }
  0x3a   : > { %607 = vst [vmem:[%s6999_s17 + $0xd0] sm:$0xff] %v606_v26  ;;  %v612_v29 = vld [vmem:[%s6994_s15 + $0x1e8] sm:$0xff]  ;;  %609 = vst [vmem:[%s6999_s17 + $0xd8] sm:$0xff] %v608_v27  ;;  %v614_v30 = vld [vmem:[%s6994_s15 + $0x1f0] sm:$0xff] }
  0x3b   : > { %611 = vst [vmem:[%s6999_s17 + $0xe0] sm:$0xff] %v610_v28  ;;  %613 = vst [vmem:[%s6999_s17 + $0xe8] sm:$0xff] %v612_v29  ;;  %v616_v31 = vld [vmem:[%s6994_s15 + $0x1f8] sm:$0xff]  ;;  %v618_v32 = vld [vmem:[%s6994_s15 + $0x300] sm:$0xff] }
  0x3c   : > { %615 = vst [vmem:[%s6999_s17 + $0xf0] sm:$0xff] %v614_v30  ;;  %617 = vst [vmem:[%s6999_s17 + $0xf8] sm:$0xff] %v616_v31  ;;  %v620_v33 = vld [vmem:[%s6994_s15 + $0x308] sm:$0xff]  ;;  %v622_v34 = vld [vmem:[%s6994_s15 + $0x310] sm:$0xff] }
  0x3d   : > { %619 = vst [vmem:[%s6999_s17 + $0x100] sm:$0xff] %v618_v32  ;;  %v624_v35 = vld [vmem:[%s6994_s15 + $0x318] sm:$0xff]  ;;  %621 = vst [vmem:[%s6999_s17 + $0x108] sm:$0xff] %v620_v33  ;;  %v626_v36 = vld [vmem:[%s6994_s15 + $0x320] sm:$0xff] }
  0x3e   : > { %623 = vst [vmem:[%s6999_s17 + $0x110] sm:$0xff] %v622_v34  ;;  %625 = vst [vmem:[%s6999_s17 + $0x118] sm:$0xff] %v624_v35  ;;  %v628_v37 = vld [vmem:[%s6994_s15 + $0x328] sm:$0xff]  ;;  %v630_v38 = vld [vmem:[%s6994_s15 + $0x330] sm:$0xff] }
  0x3f   : > { %627 = vst [vmem:[%s6999_s17 + $0x120] sm:$0xff] %v626_v36  ;;  %629 = vst [vmem:[%s6999_s17 + $0x128] sm:$0xff] %v628_v37  ;;  %v632_v39 = vld [vmem:[%s6994_s15 + $0x338] sm:$0xff]  ;;  %v634_v40 = vld [vmem:[%s6994_s15 + $0x340] sm:$0xff] }
  0x40   : > { %631 = vst [vmem:[%s6999_s17 + $0x130] sm:$0xff] %v630_v38  ;;  %v636_v41 = vld [vmem:[%s6994_s15 + $0x348] sm:$0xff]  ;;  %633 = vst [vmem:[%s6999_s17 + $0x138] sm:$0xff] %v632_v39  ;;  %v638_v42 = vld [vmem:[%s6994_s15 + $0x350] sm:$0xff] }
  0x41   : > { %635 = vst [vmem:[%s6999_s17 + $0x140] sm:$0xff] %v634_v40  ;;  %637 = vst [vmem:[%s6999_s17 + $0x148] sm:$0xff] %v636_v41  ;;  %v640_v43 = vld [vmem:[%s6994_s15 + $0x358] sm:$0xff]  ;;  %v642_v44 = vld [vmem:[%s6994_s15 + $0x360] sm:$0xff] }
  0x42   : > { %639 = vst [vmem:[%s6999_s17 + $0x150] sm:$0xff] %v638_v42  ;;  %641 = vst [vmem:[%s6999_s17 + $0x158] sm:$0xff] %v640_v43  ;;  %v644_v45 = vld [vmem:[%s6994_s15 + $0x368] sm:$0xff]  ;;  %v646_v46 = vld [vmem:[%s6994_s15 + $0x370] sm:$0xff] }
  0x43   : > { %643 = vst [vmem:[%s6999_s17 + $0x160] sm:$0xff] %v642_v44  ;;  %v648_v47 = vld [vmem:[%s6994_s15 + $0x378] sm:$0xff]  ;;  %645 = vst [vmem:[%s6999_s17 + $0x168] sm:$0xff] %v644_v45  ;;  %v650_v48 = vld [vmem:[%s6994_s15 + $0x480] sm:$0xff] }
  0x44   : > { %647 = vst [vmem:[%s6999_s17 + $0x170] sm:$0xff] %v646_v46  ;;  %649 = vst [vmem:[%s6999_s17 + $0x178] sm:$0xff] %v648_v47  ;;  %v652_v49 = vld [vmem:[%s6994_s15 + $0x488] sm:$0xff]  ;;  %v654_v50 = vld [vmem:[%s6994_s15 + $0x490] sm:$0xff] }
  0x45   : > { %651 = vst [vmem:[%s6999_s17 + $0x180] sm:$0xff] %v650_v48  ;;  %653 = vst [vmem:[%s6999_s17 + $0x188] sm:$0xff] %v652_v49  ;;  %v656_v51 = vld [vmem:[%s6994_s15 + $0x498] sm:$0xff]  ;;  %v658_v52 = vld [vmem:[%s6994_s15 + $0x4a0] sm:$0xff] }
  0x46   : > { %655 = vst [vmem:[%s6999_s17 + $0x190] sm:$0xff] %v654_v50  ;;  %v660_v53 = vld [vmem:[%s6994_s15 + $0x4a8] sm:$0xff]  ;;  %657 = vst [vmem:[%s6999_s17 + $0x198] sm:$0xff] %v656_v51  ;;  %v662_v54 = vld [vmem:[%s6994_s15 + $0x4b0] sm:$0xff] }
  0x47   : > { %659 = vst [vmem:[%s6999_s17 + $0x1a0] sm:$0xff] %v658_v52  ;;  %661 = vst [vmem:[%s6999_s17 + $0x1a8] sm:$0xff] %v660_v53  ;;  %v664_v55 = vld [vmem:[%s6994_s15 + $0x4b8] sm:$0xff]  ;;  %v666_v56 = vld [vmem:[%s6994_s15 + $0x4c0] sm:$0xff] }
  0x48   : > { %663 = vst [vmem:[%s6999_s17 + $0x1b0] sm:$0xff] %v662_v54  ;;  %665 = vst [vmem:[%s6999_s17 + $0x1b8] sm:$0xff] %v664_v55  ;;  %v668_v57 = vld [vmem:[%s6994_s15 + $0x4c8] sm:$0xff]  ;;  %v670_v58 = vld [vmem:[%s6994_s15 + $0x4d0] sm:$0xff] }
  0x49   : > { %667 = vst [vmem:[%s6999_s17 + $0x1c0] sm:$0xff] %v666_v56  ;;  %v672_v59 = vld [vmem:[%s6994_s15 + $0x4d8] sm:$0xff]  ;;  %669 = vst [vmem:[%s6999_s17 + $0x1c8] sm:$0xff] %v668_v57  ;;  %v674_v60 = vld [vmem:[%s6994_s15 + $0x4e0] sm:$0xff] }
  0x4a   : > { %671 = vst [vmem:[%s6999_s17 + $0x1d0] sm:$0xff] %v670_v58  ;;  %673 = vst [vmem:[%s6999_s17 + $0x1d8] sm:$0xff] %v672_v59  ;;  %v676_v61 = vld [vmem:[%s6994_s15 + $0x4e8] sm:$0xff]  ;;  %v678_v62 = vld [vmem:[%s6994_s15 + $0x4f0] sm:$0xff] }
  0x4b   : > { %675 = vst [vmem:[%s6999_s17 + $0x1e0] sm:$0xff] %v674_v60  ;;  %677 = vst [vmem:[%s6999_s17 + $0x1e8] sm:$0xff] %v676_v61  ;;  %v680_v63 = vld [vmem:[%s6994_s15 + $0x4f8] sm:$0xff]  ;;  %v682_v0 = vld [vmem:[%s6994_s15 + $0x600] sm:$0xff] }
  0x4c   : > { %679 = vst [vmem:[%s6999_s17 + $0x1f0] sm:$0xff] %v678_v62  ;;  %v684_v1 = vld [vmem:[%s6994_s15 + $0x608] sm:$0xff]  ;;  %681 = vst [vmem:[%s6999_s17 + $0x1f8] sm:$0xff] %v680_v63  ;;  %v686_v2 = vld [vmem:[%s6994_s15 + $0x610] sm:$0xff] }
  0x4d   : > { %683 = vst [vmem:[%s6999_s17 + $0x200] sm:$0xff] %v682_v0  ;;  %685 = vst [vmem:[%s6999_s17 + $0x208] sm:$0xff] %v684_v1  ;;  %v688_v3 = vld [vmem:[%s6994_s15 + $0x618] sm:$0xff]  ;;  %v690_v4 = vld [vmem:[%s6994_s15 + $0x620] sm:$0xff] }
  0x4e   : > { %687 = vst [vmem:[%s6999_s17 + $0x210] sm:$0xff] %v686_v2  ;;  %689 = vst [vmem:[%s6999_s17 + $0x218] sm:$0xff] %v688_v3  ;;  %v692_v5 = vld [vmem:[%s6994_s15 + $0x628] sm:$0xff]  ;;  %v694_v6 = vld [vmem:[%s6994_s15 + $0x630] sm:$0xff] }
  0x4f   : > { %691 = vst [vmem:[%s6999_s17 + $0x220] sm:$0xff] %v690_v4  ;;  %v696_v7 = vld [vmem:[%s6994_s15 + $0x638] sm:$0xff]  ;;  %693 = vst [vmem:[%s6999_s17 + $0x228] sm:$0xff] %v692_v5  ;;  %v698_v8 = vld [vmem:[%s6994_s15 + $0x640] sm:$0xff] }
  0x50   : > { %695 = vst [vmem:[%s6999_s17 + $0x230] sm:$0xff] %v694_v6  ;;  %697 = vst [vmem:[%s6999_s17 + $0x238] sm:$0xff] %v696_v7  ;;  %v700_v9 = vld [vmem:[%s6994_s15 + $0x648] sm:$0xff]  ;;  %v702_v10 = vld [vmem:[%s6994_s15 + $0x650] sm:$0xff] }
  0x51   : > { %699 = vst [vmem:[%s6999_s17 + $0x240] sm:$0xff] %v698_v8  ;;  %701 = vst [vmem:[%s6999_s17 + $0x248] sm:$0xff] %v700_v9  ;;  %v704_v11 = vld [vmem:[%s6994_s15 + $0x658] sm:$0xff]  ;;  %v706_v12 = vld [vmem:[%s6994_s15 + $0x660] sm:$0xff] }
  0x52   : > { %703 = vst [vmem:[%s6999_s17 + $0x250] sm:$0xff] %v702_v10  ;;  %v708_v13 = vld [vmem:[%s6994_s15 + $0x668] sm:$0xff]  ;;  %705 = vst [vmem:[%s6999_s17 + $0x258] sm:$0xff] %v704_v11  ;;  %v710_v14 = vld [vmem:[%s6994_s15 + $0x670] sm:$0xff] }
  0x53   : > { %707 = vst [vmem:[%s6999_s17 + $0x260] sm:$0xff] %v706_v12  ;;  %709 = vst [vmem:[%s6999_s17 + $0x268] sm:$0xff] %v708_v13  ;;  %v712_v15 = vld [vmem:[%s6994_s15 + $0x678] sm:$0xff]  ;;  %v714_v16 = vld [vmem:[%s6994_s15 + $0x780] sm:$0xff] }
  0x54   : > { %711 = vst [vmem:[%s6999_s17 + $0x270] sm:$0xff] %v710_v14  ;;  %713 = vst [vmem:[%s6999_s17 + $0x278] sm:$0xff] %v712_v15  ;;  %v716_v17 = vld [vmem:[%s6994_s15 + $0x788] sm:$0xff]  ;;  %v718_v18 = vld [vmem:[%s6994_s15 + $0x790] sm:$0xff] }
  0x55   : > { %715 = vst [vmem:[%s6999_s17 + $0x280] sm:$0xff] %v714_v16  ;;  %v720_v19 = vld [vmem:[%s6994_s15 + $0x798] sm:$0xff]  ;;  %717 = vst [vmem:[%s6999_s17 + $0x288] sm:$0xff] %v716_v17  ;;  %v722_v20 = vld [vmem:[%s6994_s15 + $0x7a0] sm:$0xff] }
  0x56   : > { %719 = vst [vmem:[%s6999_s17 + $0x290] sm:$0xff] %v718_v18  ;;  %721 = vst [vmem:[%s6999_s17 + $0x298] sm:$0xff] %v720_v19  ;;  %v724_v21 = vld [vmem:[%s6994_s15 + $0x7a8] sm:$0xff]  ;;  %v726_v22 = vld [vmem:[%s6994_s15 + $0x7b0] sm:$0xff] }
  0x57   : > { %723 = vst [vmem:[%s6999_s17 + $0x2a0] sm:$0xff] %v722_v20  ;;  %725 = vst [vmem:[%s6999_s17 + $0x2a8] sm:$0xff] %v724_v21  ;;  %v728_v23 = vld [vmem:[%s6994_s15 + $0x7b8] sm:$0xff]  ;;  %v730_v24 = vld [vmem:[%s6994_s15 + $0x7c0] sm:$0xff] }
  0x58   : > { %727 = vst [vmem:[%s6999_s17 + $0x2b0] sm:$0xff] %v726_v22  ;;  %v732_v25 = vld [vmem:[%s6994_s15 + $0x7c8] sm:$0xff]  ;;  %729 = vst [vmem:[%s6999_s17 + $0x2b8] sm:$0xff] %v728_v23  ;;  %v734_v26 = vld [vmem:[%s6994_s15 + $0x7d0] sm:$0xff] }
  0x59   : > { %731 = vst [vmem:[%s6999_s17 + $0x2c0] sm:$0xff] %v730_v24  ;;  %733 = vst [vmem:[%s6999_s17 + $0x2c8] sm:$0xff] %v732_v25  ;;  %v736_v27 = vld [vmem:[%s6994_s15 + $0x7d8] sm:$0xff]  ;;  %v738_v28 = vld [vmem:[%s6994_s15 + $0x7e0] sm:$0xff] }
  0x5a   : > { %735 = vst [vmem:[%s6999_s17 + $0x2d0] sm:$0xff] %v734_v26  ;;  %737 = vst [vmem:[%s6999_s17 + $0x2d8] sm:$0xff] %v736_v27  ;;  %v740_v29 = vld [vmem:[%s6994_s15 + $0x7e8] sm:$0xff]  ;;  %v742_v30 = vld [vmem:[%s6994_s15 + $0x7f0] sm:$0xff] }
  0x5b   : > { %739 = vst [vmem:[%s6999_s17 + $0x2e0] sm:$0xff] %v738_v28  ;;  %v744_v31 = vld [vmem:[%s6994_s15 + $0x7f8] sm:$0xff]  ;;  %741 = vst [vmem:[%s6999_s17 + $0x2e8] sm:$0xff] %v740_v29  ;;  %v746_v32 = vld [vmem:[%s6994_s15 + $0x900] sm:$0xff] }
  0x5c   : > { %743 = vst [vmem:[%s6999_s17 + $0x2f0] sm:$0xff] %v742_v30  ;;  %745 = vst [vmem:[%s6999_s17 + $0x2f8] sm:$0xff] %v744_v31  ;;  %v748_v33 = vld [vmem:[%s6994_s15 + $0x908] sm:$0xff]  ;;  %v750_v34 = vld [vmem:[%s6994_s15 + $0x910] sm:$0xff] }
  0x5d   : > { %747 = vst [vmem:[%s6999_s17 + $0x300] sm:$0xff] %v746_v32  ;;  %749 = vst [vmem:[%s6999_s17 + $0x308] sm:$0xff] %v748_v33  ;;  %v752_v35 = vld [vmem:[%s6994_s15 + $0x918] sm:$0xff]  ;;  %v754_v36 = vld [vmem:[%s6994_s15 + $0x920] sm:$0xff] }
  0x5e   : > { %751 = vst [vmem:[%s6999_s17 + $0x310] sm:$0xff] %v750_v34  ;;  %v756_v37 = vld [vmem:[%s6994_s15 + $0x928] sm:$0xff]  ;;  %753 = vst [vmem:[%s6999_s17 + $0x318] sm:$0xff] %v752_v35  ;;  %v758_v38 = vld [vmem:[%s6994_s15 + $0x930] sm:$0xff] }
  0x5f   : > { %755 = vst [vmem:[%s6999_s17 + $0x320] sm:$0xff] %v754_v36  ;;  %757 = vst [vmem:[%s6999_s17 + $0x328] sm:$0xff] %v756_v37  ;;  %v760_v39 = vld [vmem:[%s6994_s15 + $0x938] sm:$0xff]  ;;  %v762_v40 = vld [vmem:[%s6994_s15 + $0x940] sm:$0xff] }
  0x60   : > { %759 = vst [vmem:[%s6999_s17 + $0x330] sm:$0xff] %v758_v38  ;;  %761 = vst [vmem:[%s6999_s17 + $0x338] sm:$0xff] %v760_v39  ;;  %v764_v41 = vld [vmem:[%s6994_s15 + $0x948] sm:$0xff]  ;;  %v766_v42 = vld [vmem:[%s6994_s15 + $0x950] sm:$0xff] }
  0x61   : > { %763 = vst [vmem:[%s6999_s17 + $0x340] sm:$0xff] %v762_v40  ;;  %v768_v43 = vld [vmem:[%s6994_s15 + $0x958] sm:$0xff]  ;;  %765 = vst [vmem:[%s6999_s17 + $0x348] sm:$0xff] %v764_v41  ;;  %v770_v44 = vld [vmem:[%s6994_s15 + $0x960] sm:$0xff] }
  0x62   : > { %767 = vst [vmem:[%s6999_s17 + $0x350] sm:$0xff] %v766_v42  ;;  %769 = vst [vmem:[%s6999_s17 + $0x358] sm:$0xff] %v768_v43  ;;  %v772_v45 = vld [vmem:[%s6994_s15 + $0x968] sm:$0xff]  ;;  %v774_v46 = vld [vmem:[%s6994_s15 + $0x970] sm:$0xff] }
  0x63   : > { %771 = vst [vmem:[%s6999_s17 + $0x360] sm:$0xff] %v770_v44  ;;  %773 = vst [vmem:[%s6999_s17 + $0x368] sm:$0xff] %v772_v45  ;;  %v776_v47 = vld [vmem:[%s6994_s15 + $0x978] sm:$0xff]  ;;  %v778_v48 = vld [vmem:[%s6994_s15 + $0xa80] sm:$0xff] }
  0x64   : > { %775 = vst [vmem:[%s6999_s17 + $0x370] sm:$0xff] %v774_v46  ;;  %v780_v49 = vld [vmem:[%s6994_s15 + $0xa88] sm:$0xff]  ;;  %777 = vst [vmem:[%s6999_s17 + $0x378] sm:$0xff] %v776_v47  ;;  %v782_v50 = vld [vmem:[%s6994_s15 + $0xa90] sm:$0xff] }
  0x65   : > { %779 = vst [vmem:[%s6999_s17 + $0x380] sm:$0xff] %v778_v48  ;;  %781 = vst [vmem:[%s6999_s17 + $0x388] sm:$0xff] %v780_v49  ;;  %v784_v51 = vld [vmem:[%s6994_s15 + $0xa98] sm:$0xff]  ;;  %v786_v52 = vld [vmem:[%s6994_s15 + $0xaa0] sm:$0xff] }
  0x66   : > { %783 = vst [vmem:[%s6999_s17 + $0x390] sm:$0xff] %v782_v50  ;;  %785 = vst [vmem:[%s6999_s17 + $0x398] sm:$0xff] %v784_v51  ;;  %v788_v53 = vld [vmem:[%s6994_s15 + $0xaa8] sm:$0xff]  ;;  %v790_v54 = vld [vmem:[%s6994_s15 + $0xab0] sm:$0xff] }
  0x67   : > { %787 = vst [vmem:[%s6999_s17 + $0x3a0] sm:$0xff] %v786_v52  ;;  %v792_v55 = vld [vmem:[%s6994_s15 + $0xab8] sm:$0xff]  ;;  %789 = vst [vmem:[%s6999_s17 + $0x3a8] sm:$0xff] %v788_v53  ;;  %v794_v56 = vld [vmem:[%s6994_s15 + $0xac0] sm:$0xff] }
  0x68   : > { %791 = vst [vmem:[%s6999_s17 + $0x3b0] sm:$0xff] %v790_v54  ;;  %793 = vst [vmem:[%s6999_s17 + $0x3b8] sm:$0xff] %v792_v55  ;;  %v796_v57 = vld [vmem:[%s6994_s15 + $0xac8] sm:$0xff]  ;;  %v798_v58 = vld [vmem:[%s6994_s15 + $0xad0] sm:$0xff] }
  0x69   : > { %795 = vst [vmem:[%s6999_s17 + $0x3c0] sm:$0xff] %v794_v56  ;;  %797 = vst [vmem:[%s6999_s17 + $0x3c8] sm:$0xff] %v796_v57  ;;  %v800_v59 = vld [vmem:[%s6994_s15 + $0xad8] sm:$0xff]  ;;  %v802_v60 = vld [vmem:[%s6994_s15 + $0xae0] sm:$0xff] }
  0x6a   : > { %799 = vst [vmem:[%s6999_s17 + $0x3d0] sm:$0xff] %v798_v58  ;;  %v804_v61 = vld [vmem:[%s6994_s15 + $0xae8] sm:$0xff]  ;;  %801 = vst [vmem:[%s6999_s17 + $0x3d8] sm:$0xff] %v800_v59  ;;  %v806_v62 = vld [vmem:[%s6994_s15 + $0xaf0] sm:$0xff] }
  0x6b   : > { %803 = vst [vmem:[%s6999_s17 + $0x3e0] sm:$0xff] %v802_v60  ;;  %805 = vst [vmem:[%s6999_s17 + $0x3e8] sm:$0xff] %v804_v61  ;;  %v808_v63 = vld [vmem:[%s6994_s15 + $0xaf8] sm:$0xff] }
  0x6c   : > { %807 = vst [vmem:[%s6999_s17 + $0x3f0] sm:$0xff] %v806_v62  ;;  %809 = vst [vmem:[%s6999_s17 + $0x3f8] sm:$0xff] %v808_v63 }
  0x6d PF: > { %p5069_p0 = scmp.ge.s32.totalorder %s6834_s10, 1  ;;  %p814_p1 = scmp.lt.s32.totalorder %s6834_s10, 7 }
  0x6f   : > { %p815_p2 = pnand %p5069_p0, %p814_p1 }
  0x71   : > { %818 = sbr.rel (%p815_p2) target bundleno = 1834 (0x72a), region = 78 }
  0x78   : > { %s821_s13 = sand.u32 1, %s6810_s27   ;;  %s7258_s14 = sand.u32 1, %s6802_s25  }
  0x79   : > { %s5070_s22 = sshll.u32 %s821_s13, 10  ;;  %s5071_s12 = sshll.u32 %s7258_s14, 3 }
  0x7a   : > { %s6194_s16 = smul.u32 24, %s7258_s14  ;;  %p861_p3 = scmp.lt.s32.totalorder %s6822_s30, 1 }
  0x7b   : > { %s7269_s1 = scalar_lea.vmem [#allocation7], %s5070_s22  ;;  %s7271_s9 = scalar_lea.vmem [#allocation8], %s5071_s12 }
  0x7c   : > { %s862_s20 = scalar_select %p861_p3, %s6822_s30, 1 }
  0x7d   : > { %s7273_s27 = scalar_lea.vmem [#allocation10], %s6194_s16  ;;  %p5073_p4 = scmp.ne.s32.totalorder %s6818_s29, 0 }
  0x7e   : > { %s5072_s21 = sshll.u32 %s862_s20, 3  ;;  %v873_v0 = vld [vmem:[%s8893_s2] sm:$0xff] (!%p5073_p4)  ;;  %v874_v1 = vld [vmem:[%s8893_s2 + $0x8] sm:$0xff] (!%p5073_p4)  ;;  %v875_v2 = vld [vmem:[%s8893_s2 + $0x10] sm:$0xff] (!%p5073_p4)  ;;  %v6836_v3 = vmov (!%p5073_p4), 0.0|0.0   ;;  %vm6837_vm0 = vmmov (!%p5073_p4), 0   ;;  %v963_v12 = vlaneseq (!%p5073_p4) }
  0x7f   : > { %s7267_s17 = scalar_lea.vmem %s8891_s0, %s5072_s21  ;;  %871 = sbr.rel (%p5073_p4) target bundleno = 361 (0x169), region = 86  ;;  %5987 = vmatprep.subr.bf16.mxu0 (!%p5073_p4), %v6836_v3  ;;  %v5988_v4 = vpack.c.bf16 (!%p5073_p4), %v874_v1, %v873_v0  ;;  %v876_v5 = vld [vmem:[%s8893_s2 + $0x18] sm:$0xff] (!%p5073_p4)  ;;  %v6838_v6 = vmov (!%p5073_p4), 0.0   ;;  %vm1016_vm1 = vcmask (!%p5073_p4), 253952   ;;  %vm1025_vm2 = vcmask (!%p5073_p4), 7168  }
  0x80   : > { %5504 = vmatprep.mubr.msk.f32.mxu0 (!%p5073_p4), %vm6837_vm0, %v6838_v6  ;;  %v6839_v7 = vmov (!%p5073_p4), -inf   ;;  %1027 = vst.msk [vmem:[#allocation4] sm:$0xff] (!%p5073_p4), %vm1025_vm2, %v6838_v6  ;;  %vm1036_vm3 = vcmask (!%p5073_p4), 23552   ;;  %v5991_v8 = vpack.c.bf16 (!%p5073_p4), %v876_v5, %v875_v2  ;;  %v872_v9 = vld [vmem:[%s7267_s17] sm:$0xff] (!%p5073_p4)  ;;  %vm884_vm4 = vcmask (!%p5073_p4), 261120  }
  0x81   : > { %1026 = vst.msk [vmem:[#allocation3] sm:$0xff] (!%p5073_p4), %vm1025_vm2, %v6839_v7  ;;  %5989 = vmatpush3.bf16.msra.mxu0 (!%p5073_p4), %v5988_v4  ;;  %v6840_v10 = vmov (!%p5073_p4), 1966171168   ;;  %v964_v14 = vshrl.u32 (!%p5073_p4), %v963_v12, 7  ;;  %v5074_v15 = vld [vmem:[%s8895_s4] ss:$0 sm:$0xff] (!%p5073_p4) }
  0x82   : > { %1028 = vst.msk [vmem:[#allocation5] sm:$0x1] (!%p5073_p4), %vm1016_vm1, %v6838_v6  ;;  %1029 = vst.msk [vmem:[#allocation5 + $0x1] sm:$0x1] (!%p5073_p4), %vm1016_vm1, %v6838_v6  ;;  %5990 = vmatprep.subr.bf16.mxu0 (!%p5073_p4), %v6836_v3  ;;  %v961_v11 = vunpack.c.l.s4 (!%p5073_p4), %v6840_v10 }
  0x83   : > { %1030 = vst.msk [vmem:[#allocation5 + $0x2] sm:$0x1] (!%p5073_p4), %vm1016_vm1, %v6838_v6  ;;  %1031 = vst.msk [vmem:[#allocation5 + $0x3] sm:$0x1] (!%p5073_p4), %vm1016_vm1, %v6838_v6 }
  0x84   : > { %1032 = vst.msk [vmem:[#allocation5 + $0x4] sm:$0x1] (!%p5073_p4), %vm1016_vm1, %v6838_v6  ;;  %1033 = vst.msk [vmem:[#allocation5 + $0x5] sm:$0x1] (!%p5073_p4), %vm1016_vm1, %v6838_v6  ;;  %v962_v13 = vunpack.c.0.s8 (!%p5073_p4), %v961_v11 }
  0x85   : > { %1034 = vst.msk [vmem:[#allocation5 + $0x6] sm:$0x1] (!%p5073_p4), %vm1016_vm1, %v6838_v6  ;;  %1035 = vst.msk [vmem:[#allocation5 + $0x7] sm:$0x1] (!%p5073_p4), %vm1016_vm1, %v6838_v6  ;;  %5992 = vmatpush3.bf16.msra.mxu0 (!%p5073_p4), %v5991_v8 }
  0x86   : > { %1037 = vst.msk [vmem:[#allocation6] sm:$0xff] %vm1036_vm3, %v6838_v6  ;;  %v965_v16 = vsub.s32 %v962_v13, %v964_v14 }
  0x88   : > { %5505 = vmatmul.mubr.msk.f32.vlgmr.msra.gmra.mrb[0].mxu0 %vm884_vm4, %v872_v9 }
 0x15b   : > { %v954_v17 = vpop.f32.mrb[0].mxu0 }
 0x15c   : > { %v955_v18 = vadd.f32 %v5074_v15, %v954_v17  ;;  %v5506_v19 = vpop.f32.mrb[1].mxu0 }
 0x15e   : > { %v959_v20 = vcombine.high %v955_v18, %v955_v18  ;;  %v966_v21 = vrot.slane %v955_v18, %v965_v16 }
 0x160   : > { %v973_v22 = vrot.slane %v959_v20, %v965_v16  ;;  %v974_v23 = vcombine.high %v966_v21, %v966_v21  ;;  %v982_v24 = vrot.slane %v966_v21, %v965_v16 }
 0x162   : > { %v975_v25 = vcombine.high %v973_v22, %v973_v22  ;;  %v989_v26 = vrot.slane %v973_v22, %v965_v16  ;;  %v996_v27 = vrot.slane %v974_v23, %v965_v16  ;;  %v1004_v28 = vcombine.high %v982_v24, %v982_v24  ;;  %1017 = vst.msk [vmem:[#allocation2] sm:$0x1] %vm1016_vm1, %v982_v24 }
 0x164   : > { %v1003_v29 = vrot.slane %v975_v25, %v965_v16  ;;  %v1005_v30 = vcombine.high %v989_v26, %v989_v26  ;;  %v1006_v31 = vcombine.high %v996_v27, %v996_v27  ;;  %1018 = vst.msk [vmem:[#allocation2 + $0x1] sm:$0x1] %vm1016_vm1, %v996_v27  ;;  %1019 = vst.msk [vmem:[#allocation2 + $0x2] sm:$0x1] %vm1016_vm1, %v1004_v28 }
 0x165   : > { %1021 = vst.msk [vmem:[#allocation2 + $0x4] sm:$0x1] %vm1016_vm1, %v989_v26 }
 0x166   : > { %v1007_v32 = vcombine.high %v1003_v29, %v1003_v29  ;;  %1020 = vst.msk [vmem:[#allocation2 + $0x3] sm:$0x1] %vm1016_vm1, %v1006_v31  ;;  %1022 = vst.msk [vmem:[#allocation2 + $0x5] sm:$0x1] %vm1016_vm1, %v1003_v29 }
 0x167   : > { %1023 = vst.msk [vmem:[#allocation2 + $0x6] sm:$0x1] %vm1016_vm1, %v1005_v30 }
 0x168   : > { %1024 = vst.msk [vmem:[#allocation2 + $0x7] sm:$0x1] %vm1016_vm1, %v1007_v32 }
 0x169 PF: > { %v1166_v33 = vld [vmem:[%s8894_s3] sm:$0xff]  ;;  %v1167_v34 = vld [vmem:[%s8894_s3 + $0x8] sm:$0xff]  ;;  %v1168_v35 = vld [vmem:[%s8894_s3 + $0x10] sm:$0xff]  ;;  %vm1170_vm5 = vcmask 261120   ;;  %vm3234_vm6 = vcmask 130112   ;;  %vm3241_vm7 = vcmask 195712  }
 0x16a   : > { %v5993_v36 = vpack.c.bf16 %v1167_v34, %v1166_v33  ;;  %v1169_v37 = vld [vmem:[%s8894_s3 + $0x18] sm:$0xff]  ;;  %v1038_v38 = vld [vmem:[%s7269_s1] sm:$0xff]  ;;  %v1039_v40 = vld [vmem:[%s7269_s1 + $0x8] sm:$0xff]  ;;  %vm3248_vm8 = vcmask 261312   ;;  %vm3255_vm9 = vcmask 326912   ;;  %vm3262_vm10 = vcmask 392512  }
 0x16b   : > { %v5997_v39 = vpack.c.bf16 %v1169_v37, %v1168_v35  ;;  %5515 = vmatprep.mubr.msk.f32.mxu0 %vm1170_vm5, %v1038_v38  ;;  %v7324_v41 = vld [vmem:[%s7269_s1 + $0x80] sm:$0xff]  ;;  %v1040_v42 = vld [vmem:[%s7269_s1 + $0x10] sm:$0xff]  ;;  %v7328_v43 = vld [vmem:[%s7269_s1 + $0x88] sm:$0xff]  ;;  %vm3269_vm11 = vcmask 458112   ;;  %vm3276_vm12 = vcmask 523712   ;;  %vm3283_vm13 = vcmask 589312  }
 0x16c   : > { %5994 = vmatprep.subr.bf16.mxu0 %v5993_v36  ;;  %v7331_v44 = vld [vmem:[%s7269_s1 + $0x90] sm:$0xff]  ;;  %v7334_v45 = vld [vmem:[%s7269_s1 + $0x98] sm:$0xff]  ;;  %v7341_v48 = vld [vmem:[%s7269_s1 + $0xa0] sm:$0xff]  ;;  %vm8910_vm14 = vcmask 654912   ;;  %vm3297_vm15 = vcmask 720512   ;;  %vm3304_vm0 = vcmask 786112  }
 0x16d   : > { %5996 = vmatpush3.bf16.msra.mxu0 %v5993_v36  ;;  %v7344_v49 = vld [vmem:[%s7269_s1 + $0xa8] sm:$0xff]  ;;  %v7347_v50 = vld [vmem:[%s7269_s1 + $0xb0] sm:$0xff]  ;;  %v7352_v52 = vld [vmem:[%s7269_s1 + $0xb8] sm:$0xff]  ;;  %vm3311_vm1 = vcmask 851712   ;;  %vm3318_vm2 = vcmask 917312   ;;  %vm3325_vm3 = vcmask 982912  }
 0x16e   : > { %5998 = vmatprep.subr.bf16.mxu0 %v5997_v39  ;;  %v7355_v53 = vld [vmem:[%s7269_s1 + $0xc0] sm:$0xff]  ;;  %v7358_v54 = vld [vmem:[%s7269_s1 + $0xc8] sm:$0xff]  ;;  %v7365_v57 = vld [vmem:[%s7269_s1 + $0xd0] sm:$0xff]  ;;  %vm3332_vm4 = vcmask 1048512   ;;  %s5213_s13 = sshll.u32 %s6818_s29, 7  ;;  %p5215_p5 = scmp.ne.s32.totalorder %s6818_s29, 2 }
 0x16f   : > { %v7368_v58 = vld [vmem:[%s7269_s1 + $0xd8] sm:$0xff]  ;;  %v7371_v59 = vld [vmem:[%s7269_s1 + $0xe0] sm:$0xff]  ;;  %v7377_v61 = vld [vmem:[%s7269_s1 + $0xe8] sm:$0xff]  ;;  %s4697_s20 = sshra.s32 %s5213_s13, 7  ;;  %s6848_s22 = smov (!%p5215_p5), 2  }
 0x170   : > { %8922 = vst [vmem:[#allocation20_spill] sm:$0xff] %v7371_v59  ;;  %8923 = vst [vmem:[#allocation21_spill] sm:$0xff] %v7377_v61  ;;  %v7380_v62 = vld [vmem:[%s7269_s1 + $0xf0] sm:$0xff]  ;;  %v7383_v63 = vld [vmem:[%s7269_s1 + $0xf8] sm:$0xff]  ;;  %s5214_s18 = sshll.u32 %s4697_s20, 3 }
 0x171   : > { %6000 = vmatpush3.bf16.msra.mxu0 %v5997_v39  ;;  %8924 = vst [vmem:[#allocation22_spill] sm:$0xff] %v7380_v62  ;;  %8925 = vst [vmem:[#allocation23_spill] sm:$0xff] %v7383_v63  ;;  %v1041_v0 = vld [vmem:[%s7269_s1 + $0x18] sm:$0xff]  ;;  %v7392_v3 = vld [vmem:[%s7269_s1 + $0x100] sm:$0xff]  ;;  %s4700_s21 = scalar_lea.vmem %s7273_s27, %s5214_s18 [#allocation10] }
 0x172   : > { %8926 = vst [vmem:[#allocation24_spill] sm:$0xff] %v7392_v3  ;;  %v7395_v4 = vld [vmem:[%s7269_s1 + $0x108] sm:$0xff]  ;;  %v1042_v5 = vld [vmem:[%s7269_s1 + $0x20] sm:$0xff]  ;;  %v1044_v8 = vld [vmem:[%s7269_s1 + $0x30] sm:$0xff] }
 0x173   : > { %8927 = vst [vmem:[#allocation25_spill] sm:$0xff] %v7395_v4  ;;  %v1043_v7 = vld [vmem:[%s7269_s1 + $0x28] sm:$0xff]  ;;  %v1045_v9 = vld [vmem:[%s7269_s1 + $0x38] sm:$0xff]  ;;  %v1046_v10 = vld [vmem:[%s7269_s1 + $0x40] sm:$0xff] }
 0x174   : > { %5516 = vmatmul.mubr.msk.f32.vlgmr.msra.gmra.mrb[0].mxu0 %vm1170_vm5, %v1039_v40  ;;  %v1047_v11 = vld [vmem:[%s7269_s1 + $0x48] sm:$0xff]  ;;  %v1048_v12 = vld [vmem:[%s7269_s1 + $0x50] sm:$0xff]  ;;  %v1049_v13 = vld [vmem:[%s7269_s1 + $0x58] sm:$0xff] }
 0x175   : > { %5518 = vmatprep.mubr.msk.f32.mxu0 %vm1170_vm5, %v1040_v42  ;;  %v1050_v14 = vld [vmem:[%s7269_s1 + $0x60] sm:$0xff]  ;;  %v1051_v15 = vld [vmem:[%s7269_s1 + $0x68] sm:$0xff]  ;;  %v1052_v16 = vld [vmem:[%s7269_s1 + $0x70] sm:$0xff] }
 0x176   : > { %v1053_v17 = vld [vmem:[%s7269_s1 + $0x78] sm:$0xff]  ;;  %v1072_v18 = vld [vmem:[%s7269_s1 + $0x110] sm:$0xff]  ;;  %v1074_v20 = vld [vmem:[%s7269_s1 + $0x120] sm:$0xff] }
 0x177   : > { %v1073_v19 = vld [vmem:[%s7269_s1 + $0x118] sm:$0xff]  ;;  %v1075_v21 = vld [vmem:[%s7269_s1 + $0x128] sm:$0xff]  ;;  %v1076_v22 = vld [vmem:[%s7269_s1 + $0x130] sm:$0xff] }
 0x178   : > { %5519 = vmatmul.mubr.msk.f32.gmra.mrb[2].mxu0 %vm1170_vm5, %v1041_v0  ;;  %v1077_v23 = vld [vmem:[%s7269_s1 + $0x138] sm:$0xff]  ;;  %v1078_v24 = vld [vmem:[%s7269_s1 + $0x140] sm:$0xff]  ;;  %v1079_v25 = vld [vmem:[%s7269_s1 + $0x148] sm:$0xff] }
 0x179   : > { %5521 = vmatprep.mubr.msk.f32.mxu0 %vm1170_vm5, %v1042_v5  ;;  %v1080_v26 = vld [vmem:[%s7269_s1 + $0x150] sm:$0xff]  ;;  %v1081_v27 = vld [vmem:[%s7269_s1 + $0x158] sm:$0xff]  ;;  %v1082_v28 = vld [vmem:[%s7269_s1 + $0x160] sm:$0xff] }
 0x17a   : > { %v1083_v29 = vld [vmem:[%s7269_s1 + $0x168] sm:$0xff]  ;;  %v1084_v30 = vld [vmem:[%s7269_s1 + $0x170] sm:$0xff]  ;;  %v1085_v31 = vld [vmem:[%s7269_s1 + $0x178] sm:$0xff] }
 0x17b   : > { %v1086_v32 = vld [vmem:[%s7269_s1 + $0x180] sm:$0xff]  ;;  %v1087_v33 = vld [vmem:[%s7269_s1 + $0x188] sm:$0xff]  ;;  %v1088_v34 = vld [vmem:[%s7269_s1 + $0x190] sm:$0xff] }
 0x17c   : > { %5522 = vmatmul.mubr.msk.f32.gmra.mrb[4].mxu0 %vm1170_vm5, %v1043_v7  ;;  %v1089_v35 = vld [vmem:[%s7269_s1 + $0x198] sm:$0xff]  ;;  %v1090_v36 = vld [vmem:[%s7269_s1 + $0x1a0] sm:$0xff]  ;;  %v1091_v37 = vld [vmem:[%s7269_s1 + $0x1a8] sm:$0xff] }
 0x17d   : > { %5524 = vmatprep.mubr.msk.f32.mxu0 %vm1170_vm5, %v1044_v8  ;;  %v1092_v38 = vld [vmem:[%s7269_s1 + $0x1b0] sm:$0xff]  ;;  %v1093_v39 = vld [vmem:[%s7269_s1 + $0x1b8] sm:$0xff]  ;;  %v1094_v40 = vld [vmem:[%s7269_s1 + $0x1c0] sm:$0xff] }
 0x17e   : > { %v1095_v42 = vld [vmem:[%s7269_s1 + $0x1c8] sm:$0xff]  ;;  %v1096_v0 = vld [vmem:[%s7269_s1 + $0x1d0] sm:$0xff]  ;;  %v1097_v5 = vld [vmem:[%s7269_s1 + $0x1d8] sm:$0xff] }
 0x17f   : > { %v1098_v7 = vld [vmem:[%s7269_s1 + $0x1e0] sm:$0xff]  ;;  %v1099_v8 = vld [vmem:[%s7269_s1 + $0x1e8] sm:$0xff] }
 0x180   : > { %5525 = vmatmul.mubr.msk.f32.gmra.mrb[6].mxu0 %vm1170_vm5, %v1045_v9  ;;  %v1100_v9 = vld [vmem:[%s7269_s1 + $0x1f0] sm:$0xff] }
 0x181   : > { %5527 = vmatprep.mubr.msk.f32.mxu0 %vm1170_vm5, %v1046_v10  ;;  %v1101_v10 = vld [vmem:[%s7269_s1 + $0x1f8] sm:$0xff] }
 0x184   : > { %5528 = vmatmul.mubr.msk.f32.gmra.mrb[8].mxu0 %vm1170_vm5, %v1047_v11  ;;  %v1102_v11 = vld [vmem:[%s7269_s1 + $0x200] sm:$0xff] }
 0x185   : > { %5530 = vmatprep.mubr.msk.f32.mxu0 %vm1170_vm5, %v1048_v12  ;;  %v1103_v12 = vld [vmem:[%s7269_s1 + $0x208] sm:$0xff] }
 0x188   : > { %5531 = vmatmul.mubr.msk.f32.gmra.mrb[10].mxu0 %vm1170_vm5, %v1049_v13  ;;  %v1104_v13 = vld [vmem:[%s7269_s1 + $0x210] sm:$0xff] }
 0x189   : > { %5533 = vmatprep.mubr.msk.f32.mxu0 %vm1170_vm5, %v1050_v14  ;;  %v1105_v14 = vld [vmem:[%s7269_s1 + $0x218] sm:$0xff] }
 0x18c   : > { %5534 = vmatmul.mubr.msk.f32.gmra.mrb[12].mxu0 %vm1170_vm5, %v1051_v15  ;;  %v1106_v15 = vld [vmem:[%s7269_s1 + $0x220] sm:$0xff] }
 0x18d   : > { %5536 = vmatprep.mubr.msk.f32.mxu0 %vm1170_vm5, %v1052_v16  ;;  %v1107_v16 = vld [vmem:[%s7269_s1 + $0x228] sm:$0xff] }
 0x190   : > { %5537 = vmatmul.mubr.msk.f32.gmra.mrb[14].mxu0 %vm1170_vm5, %v1053_v17  ;;  %v1108_v17 = vld [vmem:[%s7269_s1 + $0x230] sm:$0xff] }
 0x191   : > { %5539 = vmatprep.mubr.msk.f32.mxu0 %vm1170_vm5, %v7324_v41 }
 0x194   : > { %5540 = vmatmul.mubr.msk.f32.gmra.mrb[16].mxu0 %vm1170_vm5, %v7328_v43 }
 0x195   : > { %5542 = vmatprep.mubr.msk.f32.mxu0 %vm1170_vm5, %v7331_v44 }
 0x198   : > { %5543 = vmatmul.mubr.msk.f32.gmra.mrb[18].mxu0 %vm1170_vm5, %v7334_v45 }
 0x199   : > { %5545 = vmatprep.mubr.msk.f32.mxu0 %vm1170_vm5, %v7341_v48 }
 0x19c   : > { %5546 = vmatmul.mubr.msk.f32.gmra.mrb[20].mxu0 %vm1170_vm5, %v7344_v49 }
 0x19d   : > { %5548 = vmatprep.mubr.msk.f32.mxu0 %vm1170_vm5, %v7347_v50 }
 0x1a0   : > { %5549 = vmatmul.mubr.msk.f32.gmra.mrb[22].mxu0 %vm1170_vm5, %v7352_v52 }
 0x1a1   : > { %5551 = vmatprep.mubr.msk.f32.mxu0 %vm1170_vm5, %v7355_v53 }
 0x1a4   : > { %5552 = vmatmul.mubr.msk.f32.gmra.mrb[24].mxu0 %vm1170_vm5, %v7358_v54 }
 0x1a5   : > { %5554 = vmatprep.mubr.msk.f32.mxu0 %vm1170_vm5, %v7365_v57 }
 0x1a8   : > { %5555 = vmatmul.mubr.msk.f32.gmra.mrb[26].mxu0 %vm1170_vm5, %v7368_v58 }
 0x1a9   : > { %5557 = vmatprep.mubr.msk.f32.mxu0 %vm1170_vm5, %v7371_v59 }
 0x1ac   : > { %5558 = vmatmul.mubr.msk.f32.gmra.mrb[28].mxu0 %vm1170_vm5, %v7377_v61 }
 0x1ad   : > { %5560 = vmatprep.mubr.msk.f32.mxu0 %vm1170_vm5, %v7380_v62 }
 0x1b0   : > { %5561 = vmatmul.mubr.msk.f32.gmra.mrb[30].mxu0 %vm1170_vm5, %v7383_v63 }
 0x1b1   : > { %5563 = vmatprep.mubr.msk.f32.mxu0 %vm1170_vm5, %v7392_v3 }
 0x1b4   : > { %5564 = vmatmul.mubr.msk.f32.gmra.mrb[32].mxu0 %vm1170_vm5, %v7395_v4 }
 0x1b5   : > { %5566 = vmatprep.mubr.msk.f32.mxu0 %vm1170_vm5, %v1072_v18  ;;  %v1109_v18 = vld [vmem:[%s7269_s1 + $0x238] sm:$0xff] }
 0x1b8   : > { %5567 = vmatmul.mubr.msk.f32.gmra.mrb[34].mxu0 %vm1170_vm5, %v1073_v19  ;;  %v1110_v19 = vld [vmem:[%s7269_s1 + $0x240] sm:$0xff] }
 0x1b9   : > { %5569 = vmatprep.mubr.msk.f32.mxu0 %vm1170_vm5, %v1074_v20  ;;  %v1111_v20 = vld [vmem:[%s7269_s1 + $0x248] sm:$0xff] }
 0x1bc   : > { %5570 = vmatmul.mubr.msk.f32.gmra.mrb[36].mxu0 %vm1170_vm5, %v1075_v21  ;;  %v1112_v21 = vld [vmem:[%s7269_s1 + $0x250] sm:$0xff] }
 0x1bd   : > { %5572 = vmatprep.mubr.msk.f32.mxu0 %vm1170_vm5, %v1076_v22  ;;  %v1113_v22 = vld [vmem:[%s7269_s1 + $0x258] sm:$0xff] }
 0x1c0   : > { %5573 = vmatmul.mubr.msk.f32.gmra.mrb[38].mxu0 %vm1170_vm5, %v1077_v23  ;;  %v1114_v23 = vld [vmem:[%s7269_s1 + $0x260] sm:$0xff] }
 0x1c1   : > { %5575 = vmatprep.mubr.msk.f32.mxu0 %vm1170_vm5, %v1078_v24  ;;  %v1115_v24 = vld [vmem:[%s7269_s1 + $0x268] sm:$0xff] }
 0x1c4   : > { %5576 = vmatmul.mubr.msk.f32.gmra.mrb[40].mxu0 %vm1170_vm5, %v1079_v25  ;;  %v1116_v25 = vld [vmem:[%s7269_s1 + $0x270] sm:$0xff] }
 0x1c5   : > { %5578 = vmatprep.mubr.msk.f32.mxu0 %vm1170_vm5, %v1080_v26  ;;  %v1117_v26 = vld [vmem:[%s7269_s1 + $0x278] sm:$0xff] }
 0x1c8   : > { %5579 = vmatmul.mubr.msk.f32.gmra.mrb[42].mxu0 %vm1170_vm5, %v1081_v27  ;;  %v1118_v27 = vld [vmem:[%s7269_s1 + $0x280] sm:$0xff] }
 0x1c9   : > { %5581 = vmatprep.mubr.msk.f32.mxu0 %vm1170_vm5, %v1082_v28  ;;  %v1119_v28 = vld [vmem:[%s7269_s1 + $0x288] sm:$0xff] }
 0x1cc   : > { %5582 = vmatmul.mubr.msk.f32.gmra.mrb[44].mxu0 %vm1170_vm5, %v1083_v29  ;;  %v1120_v29 = vld [vmem:[%s7269_s1 + $0x290] sm:$0xff] }
 0x1cd   : > { %5584 = vmatprep.mubr.msk.f32.mxu0 %vm1170_vm5, %v1084_v30  ;;  %v1121_v30 = vld [vmem:[%s7269_s1 + $0x298] sm:$0xff] }
 0x1d0   : > { %5585 = vmatmul.mubr.msk.f32.gmra.mrb[46].mxu0 %vm1170_vm5, %v1085_v31  ;;  %v1122_v31 = vld [vmem:[%s7269_s1 + $0x2a0] sm:$0xff] }
 0x1d1   : > { %5587 = vmatprep.mubr.msk.f32.mxu0 %vm1170_vm5, %v1086_v32  ;;  %v1123_v32 = vld [vmem:[%s7269_s1 + $0x2a8] sm:$0xff] }
 0x1d4   : > { %5588 = vmatmul.mubr.msk.f32.gmra.mrb[48].mxu0 %vm1170_vm5, %v1087_v33  ;;  %v1124_v33 = vld [vmem:[%s7269_s1 + $0x2b0] sm:$0xff] }
 0x1d5   : > { %5590 = vmatprep.mubr.msk.f32.mxu0 %vm1170_vm5, %v1088_v34  ;;  %v1125_v34 = vld [vmem:[%s7269_s1 + $0x2b8] sm:$0xff] }
 0x1d8   : > { %5591 = vmatmul.mubr.msk.f32.gmra.mrb[50].mxu0 %vm1170_vm5, %v1089_v35  ;;  %v1126_v35 = vld [vmem:[%s7269_s1 + $0x2c0] sm:$0xff] }
 0x1d9   : > { %5593 = vmatprep.mubr.msk.f32.mxu0 %vm1170_vm5, %v1090_v36  ;;  %v1127_v36 = vld [vmem:[%s7269_s1 + $0x2c8] sm:$0xff] }
 0x1dc   : > { %5594 = vmatmul.mubr.msk.f32.gmra.mrb[52].mxu0 %vm1170_vm5, %v1091_v37  ;;  %v1128_v37 = vld [vmem:[%s7269_s1 + $0x2d0] sm:$0xff] }
 0x1dd   : > { %5596 = vmatprep.mubr.msk.f32.mxu0 %vm1170_vm5, %v1092_v38  ;;  %v1129_v38 = vld [vmem:[%s7269_s1 + $0x2d8] sm:$0xff] }
 0x1e0   : > { %5597 = vmatmul.mubr.msk.f32.gmra.mrb[54].mxu0 %vm1170_vm5, %v1093_v39  ;;  %v1130_v39 = vld [vmem:[%s7269_s1 + $0x2e0] sm:$0xff] }
 0x1e1   : > { %5599 = vmatprep.mubr.msk.f32.mxu0 %vm1170_vm5, %v1094_v40  ;;  %v1131_v40 = vld [vmem:[%s7269_s1 + $0x2e8] sm:$0xff] }
 0x1e4   : > { %5600 = vmatmul.mubr.msk.f32.gmra.mrb[56].mxu0 %vm1170_vm5, %v1095_v42  ;;  %v1132_v42 = vld [vmem:[%s7269_s1 + $0x2f0] sm:$0xff] }
 0x1e5   : > { %5602 = vmatprep.mubr.msk.f32.mxu0 %vm1170_vm5, %v1096_v0  ;;  %v1133_v0 = vld [vmem:[%s7269_s1 + $0x2f8] sm:$0xff] }
 0x1e8   : > { %5603 = vmatmul.mubr.msk.f32.gmra.mrb[58].mxu0 %vm1170_vm5, %v1097_v5  ;;  %v1134_v5 = vld [vmem:[%s7269_s1 + $0x300] sm:$0xff] }
 0x1e9   : > { %5605 = vmatprep.mubr.msk.f32.mxu0 %vm1170_vm5, %v1098_v7  ;;  %v1135_v7 = vld [vmem:[%s7269_s1 + $0x308] sm:$0xff] }
 0x1ec   : > { %5606 = vmatmul.mubr.msk.f32.gmra.mrb[60].mxu0 %vm1170_vm5, %v1099_v8  ;;  %v1136_v8 = vld [vmem:[%s7269_s1 + $0x310] sm:$0xff] }
 0x1ed   : > { %5608 = vmatprep.mubr.msk.f32.mxu0 %vm1170_vm5, %v1100_v9  ;;  %v1137_v9 = vld [vmem:[%s7269_s1 + $0x318] sm:$0xff] }
 0x1f0   : > { %5609 = vmatmul.mubr.msk.f32.gmra.mrb[62].mxu0 %vm1170_vm5, %v1101_v10  ;;  %v1138_v10 = vld [vmem:[%s7269_s1 + $0x320] sm:$0xff] }
 0x1f1   : > { %5611 = vmatprep.mubr.msk.f32.mxu0 %vm1170_vm5, %v1102_v11  ;;  %v1139_v11 = vld [vmem:[%s7269_s1 + $0x328] sm:$0xff] }
 0x1f4   : > { %5612 = vmatmul.mubr.msk.f32.gmra.mrb[64].mxu0 %vm1170_vm5, %v1103_v12  ;;  %v1140_v12 = vld [vmem:[%s7269_s1 + $0x330] sm:$0xff] }
 0x1f5   : > { %5614 = vmatprep.mubr.msk.f32.mxu0 %vm1170_vm5, %v1104_v13  ;;  %v1141_v13 = vld [vmem:[%s7269_s1 + $0x338] sm:$0xff] }
 0x1f8   : > { %5615 = vmatmul.mubr.msk.f32.gmra.mrb[66].mxu0 %vm1170_vm5, %v1105_v14  ;;  %v1142_v14 = vld [vmem:[%s7269_s1 + $0x340] sm:$0xff] }
 0x1f9   : > { %5617 = vmatprep.mubr.msk.f32.mxu0 %vm1170_vm5, %v1106_v15  ;;  %v1143_v15 = vld [vmem:[%s7269_s1 + $0x348] sm:$0xff] }
 0x1fc   : > { %5618 = vmatmul.mubr.msk.f32.gmra.mrb[68].mxu0 %vm1170_vm5, %v1107_v16  ;;  %v1144_v16 = vld [vmem:[%s7269_s1 + $0x350] sm:$0xff] }
 0x1fd   : > { %5620 = vmatprep.mubr.msk.f32.mxu0 %vm1170_vm5, %v1108_v17  ;;  %v7605_v17 = vld [vmem:[#allocation2] ss:$0 sm:$0xff] }
 0x200   : > { %5621 = vmatmul.mubr.msk.f32.gmra.mrb[70].mxu0 %vm1170_vm5, %v1109_v18  ;;  %v1145_v18 = vld [vmem:[%s7269_s1 + $0x358] sm:$0xff] }
 0x201   : > { %5623 = vmatprep.mubr.msk.f32.mxu0 %vm1170_vm5, %v1110_v19  ;;  %v1146_v19 = vld [vmem:[%s7269_s1 + $0x360] sm:$0xff] }
 0x204   : > { %5624 = vmatmul.mubr.msk.f32.gmra.mrb[72].mxu0 %vm1170_vm5, %v1111_v20 }
 0x205   : > { %5626 = vmatprep.mubr.msk.f32.mxu0 %vm1170_vm5, %v1112_v21 }
 0x208   : > { %5627 = vmatmul.mubr.msk.f32.gmra.mrb[74].mxu0 %vm1170_vm5, %v1113_v22 }
 0x209   : > { %5629 = vmatprep.mubr.msk.f32.mxu0 %vm1170_vm5, %v1114_v23 }
 0x20c   : > { %5630 = vmatmul.mubr.msk.f32.gmra.mrb[76].mxu0 %vm1170_vm5, %v1115_v24  ;;  %v1147_v24 = vld [vmem:[%s7269_s1 + $0x368] sm:$0xff] }
 0x20d   : > { %5632 = vmatprep.mubr.msk.f32.mxu0 %vm1170_vm5, %v1116_v25  ;;  %v1148_v25 = vld [vmem:[%s7269_s1 + $0x370] sm:$0xff] }
 0x210   : > { %5633 = vmatmul.mubr.msk.f32.gmra.mrb[78].mxu0 %vm1170_vm5, %v1117_v26 }
 0x211   : > { %5635 = vmatprep.mubr.msk.f32.mxu0 %vm1170_vm5, %v1118_v27 }
 0x214   : > { %5636 = vmatmul.mubr.msk.f32.gmra.mrb[80].mxu0 %vm1170_vm5, %v1119_v28 }
 0x215   : > { %5638 = vmatprep.mubr.msk.f32.mxu0 %vm1170_vm5, %v1120_v29 }
 0x218   : > { %5639 = vmatmul.mubr.msk.f32.gmra.mrb[82].mxu0 %vm1170_vm5, %v1121_v30  ;;  %v1149_v30 = vld [vmem:[%s7269_s1 + $0x378] sm:$0xff] }
 0x219   : > { %5641 = vmatprep.mubr.msk.f32.mxu0 %vm1170_vm5, %v1122_v31  ;;  %v1150_v31 = vld [vmem:[%s7269_s1 + $0x380] sm:$0xff] }
 0x21c   : > { %5642 = vmatmul.mubr.msk.f32.gmra.mrb[84].mxu0 %vm1170_vm5, %v1123_v32 }
 0x21d   : > { %5644 = vmatprep.mubr.msk.f32.mxu0 %vm1170_vm5, %v1124_v33 }
 0x220   : > { %5645 = vmatmul.mubr.msk.f32.gmra.mrb[86].mxu0 %vm1170_vm5, %v1125_v34 }
 0x221   : > { %5647 = vmatprep.mubr.msk.f32.mxu0 %vm1170_vm5, %v1126_v35 }
 0x224   : > { %5648 = vmatmul.mubr.msk.f32.gmra.mrb[88].mxu0 %vm1170_vm5, %v1127_v36  ;;  %v1151_v36 = vld [vmem:[%s7269_s1 + $0x388] sm:$0xff] }
 0x225   : > { %5650 = vmatprep.mubr.msk.f32.mxu0 %vm1170_vm5, %v1128_v37  ;;  %v1152_v37 = vld [vmem:[%s7269_s1 + $0x390] sm:$0xff] }
 0x228   : > { %5651 = vmatmul.mubr.msk.f32.gmra.mrb[90].mxu0 %vm1170_vm5, %v1129_v38  ;;  %v7631_v38 = vld [vmem:[%s8896_s5] ss:$0 sm:$0xff] }
 0x229   : > { %5653 = vmatprep.mubr.msk.f32.mxu0 %vm1170_vm5, %v1130_v39 }
 0x22c   : > { %5654 = vmatmul.mubr.msk.f32.gmra.mrb[92].mxu0 %vm1170_vm5, %v1131_v40 }
 0x22d   : > { %5656 = vmatprep.mubr.msk.f32.mxu0 %vm1170_vm5, %v1132_v42 }
 0x230   : > { %5657 = vmatmul.mubr.msk.f32.gmra.mrb[94].mxu0 %vm1170_vm5, %v1133_v0 }
 0x231   : > { %5659 = vmatprep.mubr.msk.f32.mxu0 %vm1170_vm5, %v1134_v5 }
 0x234   : > { %5660 = vmatmul.mubr.msk.f32.gmra.mrb[96].mxu0 %vm1170_vm5, %v1135_v7 }
 0x235   : > { %5662 = vmatprep.mubr.msk.f32.mxu0 %vm1170_vm5, %v1136_v8  ;;  %v1153_v8 = vld [vmem:[%s7269_s1 + $0x398] sm:$0xff] }
 0x238   : > { %5663 = vmatmul.mubr.msk.f32.gmra.mrb[98].mxu0 %vm1170_vm5, %v1137_v9 }
 0x239   : > { %5665 = vmatprep.mubr.msk.f32.mxu0 %vm1170_vm5, %v1138_v10  ;;  %v1154_v10 = vld [vmem:[%s7269_s1 + $0x3a0] sm:$0xff] }
 0x23c   : > { %5666 = vmatmul.mubr.msk.f32.gmra.mrb[100].mxu0 %vm1170_vm5, %v1139_v11 }
 0x23d   : > { %5668 = vmatprep.mubr.msk.f32.mxu0 %vm1170_vm5, %v1140_v12 }
 0x240   : > { %5669 = vmatmul.mubr.msk.f32.gmra.mrb[102].mxu0 %vm1170_vm5, %v1141_v13 }
 0x241   : > { %5671 = vmatprep.mubr.msk.f32.mxu0 %vm1170_vm5, %v1142_v14 }
 0x244   : > { %5672 = vmatmul.mubr.msk.f32.gmra.mrb[104].mxu0 %vm1170_vm5, %v1143_v15 }
 0x245   : > { %5674 = vmatprep.mubr.msk.f32.mxu0 %vm1170_vm5, %v1144_v16 }
 0x247   : > { %v5517_v20 = vpop.f32.mrb[0].mxu0 }
 0x248   : > { %v2317_v21 = vadd.f32 %v5517_v20, %v7605_v17  ;;  %v1621_v22 = vpop.f32.mrb[1].mxu0  ;;  %5675 = vmatmul.mubr.msk.f32.gmra.mrb[106].mxu0 %vm1170_vm5, %v1145_v18  ;;  %v1156_v20 = vld [vmem:[%s7269_s1 + $0x3b0] sm:$0xff] }
 0x249   : > { %v2316_v23 = vadd.f32 %v7605_v17, %v1621_v22  ;;  %5677 = vmatprep.mubr.msk.f32.mxu0 %vm1170_vm5, %v1146_v19  ;;  %v1155_v19 = vld [vmem:[%s7269_s1 + $0x3a8] sm:$0xff] }
 0x24a   : > { %6307 = vtanh.f32 %v2317_v21 }
 0x24b   : > { %6309 = vtanh.f32 %v2316_v23  ;;  %v5520_v26 = vpop.f32.mrb[2].mxu0 }
 0x24c   : > { %v2319_v27 = vadd.f32 %v5520_v26, %v7605_v17  ;;  %v1631_v28 = vpop.f32.mrb[3].mxu0  ;;  %5678 = vmatmul.mubr.msk.f32.gmra.mrb[108].mxu0 %vm1170_vm5, %v1147_v24 }
 0x24d   : > { %v2318_v29 = vadd.f32 %v7605_v17, %v1631_v28  ;;  %5680 = vmatprep.mubr.msk.f32.mxu0 %vm1170_vm5, %v1148_v25 }
 0x24e   : > { %6311 = vtanh.f32 %v2319_v27 }
 0x24f   : > { %v5523_v32 = vpop.f32.mrb[4].mxu0  ;;  %6313 = vtanh.f32 %v2318_v29 }
 0x250   : > { %v2321_v33 = vadd.f32 %v5523_v32, %v7605_v17  ;;  %v1641_v34 = vpop.f32.mrb[5].mxu0  ;;  %5681 = vmatmul.mubr.msk.f32.gmra.mrb[110].mxu0 %vm1170_vm5, %v1149_v30 }
 0x251   : > { %v2320_v35 = vadd.f32 %v7605_v17, %v1641_v34  ;;  %5683 = vmatprep.mubr.msk.f32.mxu0 %vm1170_vm5, %v1150_v31  ;;  %v1157_v31 = vld [vmem:[%s7269_s1 + $0x3b8] sm:$0xff] }
 0x252   : > { %6315 = vtanh.f32 %v2321_v33 }
 0x253   : > { %6317 = vtanh.f32 %v2320_v35  ;;  %v5526_v39 = vpop.f32.mrb[6].mxu0 }
 0x254   : > { %v6308_v40 = vpop.eup %6307  ;;  %v2323_v42 = vadd.f32 %v5526_v39, %v7605_v17  ;;  %v1651_v0 = vpop.f32.mrb[7].mxu0  ;;  %5684 = vmatmul.mubr.msk.f32.gmra.mrb[112].mxu0 %vm1170_vm5, %v1151_v36 }
 0x255   : > { %v6310_v5 = vpop.eup %6309  ;;  %v2322_v7 = vadd.f32 %v7605_v17, %v1651_v0  ;;  %5686 = vmatprep.mubr.msk.f32.mxu0 %vm1170_vm5, %v1152_v37  ;;  %v2580_v9 = vmul.f32 %v6308_v40, %v7631_v38  ;;  %v1158_v37 = vld [vmem:[%s7269_s1 + $0x3c0] sm:$0xff]  ;;  %v1159_v0 = vld [vmem:[%s7269_s1 + $0x3c8] sm:$0xff] }
 0x256   : > { %6319 = vtanh.f32 %v2323_v42  ;;  %v2579_v13 = vmul.f32 %v6310_v5, %v7631_v38 }
 0x257   : > { %v5529_v11 = vpop.f32.mrb[8].mxu0  ;;  %v2710_v12 = vsel %vm1170_vm5, %v2580_v9, 0.0  ;;  %6321 = vtanh.f32 %v2322_v7 }
 0x258   : > { %v6312_v14 = vpop.eup %6311  ;;  %v2325_v15 = vadd.f32 %v5529_v11, %v7605_v17  ;;  %5687 = vmatmul.mubr.msk.f32.gmra.mrb[114].mxu0 %vm1170_vm5, %v1153_v8  ;;  %2711 = vadd.xlane.f32.xlu0 %v2710_v12  ;;  %v1661_v16 = vpop.f32.mrb[9].mxu0  ;;  %v2707_v23 = vsel %vm1170_vm5, %v2579_v13, 0.0  ;;  %v1160_v11 = vld [vmem:[%s7269_s1 + $0x3d0] sm:$0xff] }
 0x259   : > { %v2324_v18 = vadd.f32 %v7605_v17, %v1661_v16  ;;  %5689 = vmatprep.mubr.msk.f32.mxu0 %vm1170_vm5, %v1154_v10  ;;  %v6314_v21 = vpop.eup %6313  ;;  %v2582_v24 = vmul.f32 %v6312_v14, %v7631_v38 }
 0x25a   : > { %6323 = vtanh.f32 %v2325_v15  ;;  %v2581_v35 = vmul.f32 %v6314_v21, %v7631_v38 }
 0x25b   : > { %6325 = vtanh.f32 %v2324_v18  ;;  %v5532_v22 = vpop.f32.mrb[10].mxu0  ;;  %v2716_v33 = vsel %vm1170_vm5, %v2582_v24, 0.0  ;;  %v1161_v18 = vld [vmem:[%s7269_s1 + $0x3d8] sm:$0xff]  ;;  %v1162_v24 = vld [vmem:[%s7269_s1 + $0x3e0] sm:$0xff] }
 0x25c   : > { %v6316_v25 = vpop.eup %6315  ;;  %v2327_v26 = vadd.f32 %v5532_v22, %v7605_v17  ;;  %2708 = vadd.xlane.f32.xlu0 %v2707_v23  ;;  %v1671_v27 = vpop.f32.mrb[11].mxu0  ;;  %5690 = vmatmul.mubr.msk.f32.gmra.mrb[116].mxu0 %vm1170_vm5, %v1155_v19  ;;  %v2713_v8 = vsel %vm1170_vm5, %v2581_v35, 0.0 }
 0x25d   : > { %v6318_v28 = vpop.eup %6317  ;;  %v2584_v29 = vmul.f32 %v6316_v25, %v7631_v38  ;;  %5692 = vmatprep.mubr.msk.f32.mxu0 %vm1170_vm5, %v1156_v20  ;;  %v2326_v30 = vadd.f32 %v7605_v17, %v1671_v27 }
 0x25e   : > { %6327 = vtanh.f32 %v2327_v26  ;;  %v2583_v36 = vmul.f32 %v6318_v28, %v7631_v38  ;;  %v1163_v28 = vld [vmem:[%s7269_s1 + $0x3e8] sm:$0xff] }
 0x25f   : > { %v5535_v32 = vpop.f32.mrb[12].mxu0  ;;  %v2722_v34 = vsel %vm1170_vm5, %v2584_v29, 0.0  ;;  %6329 = vtanh.f32 %v2326_v30 }
 0x260   : > { %v6320_v39 = vpop.eup %6319  ;;  %2717 = vadd.xlane.f32.xlu0 %v2716_v33  ;;  %2723 = vadd.xlane.f32.xlu1 %v2722_v34  ;;  %v1681_v40 = vpop.f32.mrb[13].mxu0  ;;  %v2329_v42 = vadd.f32 %v5535_v32, %v7605_v17  ;;  %v2719_v9 = vsel %vm1170_vm5, %v2583_v36, 0.0  ;;  %v1164_v33 = vld [vmem:[%s7269_s1 + $0x3f0] sm:$0xff] }
 0x261   : > { %5693 = vmatmul.mubr.msk.f32.gmra.mrb[118].mxu0 %vm1170_vm5, %v1157_v31  ;;  %v6322_v5 = vpop.eup %6321  ;;  %v2586_v10 = vmul.f32 %v6320_v39, %v7631_v38  ;;  %v2328_v16 = vadd.f32 %v7605_v17, %v1681_v40  ;;  %v7691_v39 = vld [vmem:[#allocation2 + $0x1] ss:$0 sm:$0xff] }
 0x262   : > { %5695 = vmatprep.mubr.msk.f32.mxu0 %vm1170_vm5, %v1158_v37  ;;  %6331 = vtanh.f32 %v2329_v42  ;;  %v2585_v22 = vmul.f32 %v6322_v5, %v7631_v38  ;;  %v1165_v37 = vld [vmem:[%s7269_s1 + $0x3f8] sm:$0xff] }
 0x263   : > { %v5538_v7 = vpop.f32.mrb[14].mxu0  ;;  %v2728_v20 = vsel %vm1170_vm5, %v2586_v10, 0.0  ;;  %6333 = vtanh.f32 %v2328_v16 }
 0x264   : > { %v6324_v12 = vpop.eup %6323  ;;  %2714 = vadd.xlane.f32.xlu0 %v2713_v8  ;;  %2720 = vadd.xlane.f32.xlu1 %v2719_v9  ;;  %v1691_v13 = vpop.f32.mrb[15].mxu0  ;;  %v2331_v27 = vadd.f32 %v5538_v7, %v7605_v17  ;;  %v2725_v30 = vsel %vm1170_vm5, %v2585_v22, 0.0 }
 0x265   : > { %v6326_v14 = vpop.eup %6325  ;;  %v2588_v15 = vmul.f32 %v6324_v12, %v7631_v38  ;;  %5696 = vmatmul.mubr.msk.f32.gmra.mrb[120].mxu0 %vm1170_vm5, %v1159_v0  ;;  %v2330_v36 = vadd.f32 %v7605_v17, %v1691_v13 }
 0x266   : > { %5698 = vmatprep.mubr.msk.f32.mxu0 %vm1170_vm5, %v1160_v11  ;;  %v2587_v23 = vmul.f32 %v6326_v14, %v7631_v38  ;;  %6335 = vtanh.f32 %v2331_v27 }
 0x267   : > { %v5541_v19 = vpop.f32.mrb[16].mxu0  ;;  %v2734_v21 = vsel %vm1170_vm5, %v2588_v15, 0.0  ;;  %6337 = vtanh.f32 %v2330_v36 }
 0x268   : > { %v6328_v25 = vpop.eup %6327  ;;  %2729 = vadd.xlane.f32.xlu0 %v2728_v20  ;;  %2735 = vadd.xlane.f32.xlu1 %v2734_v21  ;;  %v1701_v26 = vpop.f32.mrb[17].mxu0  ;;  %v2731_v31 = vsel %vm1170_vm5, %v2587_v23, 0.0  ;;  %v2333_v9 = vadd.f32 %v5541_v19, %v7691_v39 }
 0x269   : > { %5699 = vmatmul.mubr.msk.f32.gmra.mrb[122].mxu0 %vm1170_vm5, %v1161_v18  ;;  %v2590_v32 = vmul.f32 %v6328_v25, %v7631_v38  ;;  %v6330_v34 = vpop.eup %6329  ;;  %v2332_v15 = vadd.f32 %v7691_v39, %v1701_v26 }
 0x26a   : > { %5701 = vmatprep.mubr.msk.f32.mxu0 %vm1170_vm5, %v1162_v24  ;;  %v2589_v0 = vmul.f32 %v6330_v34, %v7631_v38 }
 0x26b   : > { %v5544_v29 = vpop.f32.mrb[18].mxu0  ;;  %v2740_v42 = vsel %vm1170_vm5, %v2590_v32, 0.0 }
 0x26c   : > { %2726 = vadd.xlane.f32.xlu0 %v2725_v30  ;;  %2732 = vadd.xlane.f32.xlu1 %v2731_v31  ;;  %v1711_v35 = vpop.f32.mrb[19].mxu0  ;;  %v6332_v5 = vpop.eup %6331  ;;  %v2737_v11 = vsel %vm1170_vm5, %v2589_v0, 0.0  ;;  %v2335_v23 = vadd.f32 %v5544_v29, %v7691_v39 }
 0x26d   : > { %5702 = vmatmul.mubr.msk.f32.gmra.mrb[124].mxu0 %vm1170_vm5, %v1163_v28  ;;  %v2592_v12 = vmul.f32 %v6332_v5, %v7631_v38  ;;  %v6334_v13 = vpop.eup %6333  ;;  %v2334_v34 = vadd.f32 %v7691_v39, %v1711_v35 }
 0x26e   : > { %5704 = vmatprep.mubr.msk.f32.mxu0 %vm1170_vm5, %v1164_v33  ;;  %v2591_v20 = vmul.f32 %v6334_v13, %v7631_v38 }
 0x26f   : > { %v5547_v40 = vpop.f32.mrb[20].mxu0  ;;  %v2746_v18 = vsel %vm1170_vm5, %v2592_v12, 0.0 }
 0x270   : > { %v2337_v7 = vadd.f32 %v5547_v40, %v7691_v39  ;;  %2741 = vadd.xlane.f32.xlu1 %v2740_v42  ;;  %v1721_v8 = vpop.f32.mrb[21].mxu0  ;;  %v6336_v21 = vpop.eup %6335  ;;  %v2743_v27 = vsel %vm1170_vm5, %v2591_v20, 0.0 }
 0x271   : > { %v2336_v17 = vadd.f32 %v7691_v39, %v1721_v8  ;;  %5705 = vmatmul.mubr.msk.f32.gmra.mrb[126].mxu0 %vm1170_vm5, %v1165_v37  ;;  %v6338_v25 = vpop.eup %6337  ;;  %v2594_v28 = vmul.f32 %v6336_v21, %v7631_v38 }
 0x272   : > { %6339 = vtanh.f32 %v2337_v7  ;;  %v2593_v0 = vmul.f32 %v6338_v25, %v7631_v38 }
 0x273   : > { %6341 = vtanh.f32 %v2336_v17  ;;  %v5550_v10 = vpop.f32.mrb[22].mxu0  ;;  %v2752_v40 = vsel %vm1170_vm5, %v2594_v28, 0.0 }
 0x274   : > { %2738 = vadd.xlane.f32.xlu1 %v2737_v11  ;;  %v1731_v14 = vpop.f32.mrb[23].mxu0  ;;  %6343 = vtanh.f32 %v2333_v9  ;;  %v2339_v35 = vadd.f32 %v5550_v10, %v7691_v39  ;;  %v2749_v12 = vsel %vm1170_vm5, %v2593_v0, 0.0 }
 0x275   : > { %6345 = vtanh.f32 %v2332_v15  ;;  %v2338_v21 = vadd.f32 %v7691_v39, %v1731_v14 }
 0x277   : > { %v5553_v16 = vpop.f32.mrb[24].mxu0 }
 0x278   : > { %v2341_v19 = vadd.f32 %v5553_v16, %v7691_v39  ;;  %2747 = vadd.xlane.f32.xlu1 %v2746_v18  ;;  %v1741_v22 = vpop.f32.mrb[25].mxu0 }
 0x279   : > { %v2340_v24 = vadd.f32 %v7691_v39, %v1741_v22 }
 0x27a   : > { %6347 = vtanh.f32 %v2341_v19 }
 0x27b   : > { %6349 = vtanh.f32 %v2340_v24  ;;  %v5556_v26 = vpop.f32.mrb[26].mxu0  ;;  %v7725_v24 = vld [vmem:[#allocation2 + $0x2] ss:$0 sm:$0xff] }
 0x27c   : > { %v6340_v30 = vpop.eup %6339  ;;  %v2343_v31 = vadd.f32 %v5556_v26, %v7691_v39  ;;  %2744 = vadd.xlane.f32.xlu1 %v2743_v27  ;;  %v1751_v32 = vpop.f32.mrb[27].mxu0  ;;  %6351 = vtanh.f32 %v2335_v23 }
 0x27d   : > { %v6342_v33 = vpop.eup %6341  ;;  %v2600_v29 = vmul.f32 %v6340_v30, %v7631_v38  ;;  %v2342_v36 = vadd.f32 %v7691_v39, %v1751_v32 }
 0x27e   : > { %6353 = vtanh.f32 %v2343_v31  ;;  %v2599_v5 = vmul.f32 %v6342_v33, %v7631_v38  ;;  %v6344_v7 = vpop.eup %6343 }
 0x27f   : > { %v5559_v37 = vpop.f32.mrb[28].mxu0  ;;  %v2770_v42 = vsel %vm1170_vm5, %v2600_v29, 0.0  ;;  %6355 = vtanh.f32 %v2334_v34  ;;  %v6346_v9 = vpop.eup %6345  ;;  %v2596_v15 = vmul.f32 %v6344_v7, %v7631_v38 }
 0x280   : > { %2753 = vadd.xlane.f32.xlu1 %v2752_v40  ;;  %2771 = vadd.xlane.f32.xlu0 %v2770_v42  ;;  %v1761_v8 = vpop.f32.mrb[29].mxu0  ;;  %6357 = vtanh.f32 %v2342_v36  ;;  %v2345_v17 = vadd.f32 %v5559_v37, %v7691_v39  ;;  %v2767_v13 = vsel %vm1170_vm5, %v2599_v5, 0.0  ;;  %v2595_v27 = vmul.f32 %v6346_v9, %v7631_v38 }
 0x281   : > { %6359 = vtanh.f32 %v2339_v35  ;;  %v2344_v19 = vadd.f32 %v7691_v39, %v1761_v8  ;;  %v2758_v25 = vsel %vm1170_vm5, %v2596_v15, 0.0 }
 0x282   : > { %6361 = vtanh.f32 %v2345_v17  ;;  %v2755_v29 = vsel %vm1170_vm5, %v2595_v27, 0.0 }
 0x283   : > { %v5562_v11 = vpop.f32.mrb[30].mxu0  ;;  %6363 = vtanh.f32 %v2338_v21 }
 0x284   : > { %v6348_v16 = vpop.eup %6347  ;;  %2750 = vadd.xlane.f32.xlu1 %v2749_v12  ;;  %2768 = vadd.xlane.f32.xlu0 %v2767_v13  ;;  %v1771_v18 = vpop.f32.mrb[31].mxu0  ;;  %v2347_v31 = vadd.f32 %v5562_v11, %v7691_v39  ;;  %6365 = vtanh.f32 %v2344_v19 }
 0x285   : > { %v6350_v20 = vpop.eup %6349  ;;  %v2604_v10 = vmul.f32 %v6348_v16, %v7631_v38  ;;  %v2346_v5 = vadd.f32 %v7691_v39, %v1771_v18 }
 0x286   : > { %v6352_v22 = vpop.eup %6351  ;;  %v2603_v28 = vmul.f32 %v6350_v20, %v7631_v38  ;;  %6367 = vtanh.f32 %v2347_v31 }
 0x287   : > { %v5565_v23 = vpop.f32.mrb[32].mxu0  ;;  %v2782_v26 = vsel %vm1170_vm5, %v2604_v10, 0.0  ;;  %v2598_v37 = vmul.f32 %v6352_v22, %v7631_v38 }
 0x288   : > { %v6354_v30 = vpop.eup %6353  ;;  %2759 = vadd.xlane.f32.xlu1 %v2758_v25  ;;  %2783 = vadd.xlane.f32.xlu0 %v2782_v26  ;;  %v1781_v14 = vpop.f32.mrb[33].mxu0  ;;  %v2349_v32 = vadd.f32 %v5565_v23, %v7725_v24  ;;  %v2779_v36 = vsel %vm1170_vm5, %v2603_v28, 0.0 }
 0x289   : > { %v6356_v33 = vpop.eup %6355  ;;  %v2606_v40 = vmul.f32 %v6354_v30, %v7631_v38  ;;  %v2764_v17 = vsel %vm1170_vm5, %v2598_v37, 0.0  ;;  %v2348_v39 = vadd.f32 %v7725_v24, %v1781_v14 }
 0x28a   : > { %v6358_v42 = vpop.eup %6357  ;;  %6369 = vtanh.f32 %v2349_v32  ;;  %v2597_v11 = vmul.f32 %v6356_v33, %v7631_v38 }
 0x28b   : > { %v5568_v34 = vpop.f32.mrb[34].mxu0  ;;  %v6360_v8 = vpop.eup %6359  ;;  %v2788_v9 = vsel %vm1170_vm5, %v2606_v40, 0.0  ;;  %v2605_v12 = vmul.f32 %v6358_v42, %v7631_v38  ;;  %6371 = vtanh.f32 %v2346_v5 }
 0x28c   : > { %2756 = vadd.xlane.f32.xlu1 %v2755_v29  ;;  %2780 = vadd.xlane.f32.xlu0 %v2779_v36  ;;  %v1791_v0 = vpop.f32.mrb[35].mxu0  ;;  %v2351_v7 = vadd.f32 %v5568_v34, %v7725_v24  ;;  %v6362_v13 = vpop.eup %6361  ;;  %v2761_v21 = vsel %vm1170_vm5, %v2597_v11, 0.0  ;;  %v2602_v19 = vmul.f32 %v6360_v8, %v7631_v38 }
 0x28d   : > { %v6364_v18 = vpop.eup %6363  ;;  %v2785_v10 = vsel %vm1170_vm5, %v2605_v12, 0.0  ;;  %v2608_v22 = vmul.f32 %v6362_v13, %v7631_v38  ;;  %v2350_v26 = vadd.f32 %v7725_v24, %v1791_v0 }
 0x28e   : > { %6373 = vtanh.f32 %v2351_v7  ;;  %v6366_v23 = vpop.eup %6365  ;;  %v2776_v14 = vsel %vm1170_vm5, %v2602_v19, 0.0  ;;  %v2601_v32 = vmul.f32 %v6364_v18, %v7631_v38 }
 0x28f   : > { %v5571_v35 = vpop.f32.mrb[36].mxu0  ;;  %6375 = vtanh.f32 %v2348_v39  ;;  %v2794_v31 = vsel %vm1170_vm5, %v2608_v22, 0.0  ;;  %v2607_v33 = vmul.f32 %v6366_v23, %v7631_v38 }
 0x290   : > { %2765 = vadd.xlane.f32.xlu1 %v2764_v17  ;;  %2789 = vadd.xlane.f32.xlu0 %v2788_v9  ;;  %v1801_v15 = vpop.f32.mrb[37].mxu0  ;;  %v6368_v28 = vpop.eup %6367  ;;  %v2353_v36 = vadd.f32 %v5571_v35, %v7725_v24  ;;  %v2773_v0 = vsel %vm1170_vm5, %v2601_v32, 0.0 }
 0x291   : > { %v2352_v16 = vadd.f32 %v7725_v24, %v1801_v15  ;;  %v2791_v5 = vsel %vm1170_vm5, %v2607_v33, 0.0  ;;  %v2610_v7 = vmul.f32 %v6368_v28, %v7631_v38 }
 0x293   : > { %v5574_v20 = vpop.f32.mrb[38].mxu0  ;;  %6377 = vtanh.f32 %v2352_v16  ;;  %v2800_v15 = vsel %vm1170_vm5, %v2610_v7, 0.0 }
 0x294   : > { %2762 = vadd.xlane.f32.xlu1 %v2761_v21  ;;  %2786 = vadd.xlane.f32.xlu0 %v2785_v10  ;;  %v1811_v25 = vpop.f32.mrb[39].mxu0  ;;  %v2355_v27 = vadd.f32 %v5574_v20, %v7725_v24  ;;  %v6370_v34 = vpop.eup %6369  ;;  %6379 = vtanh.f32 %v2350_v26 }
 0x295   : > { %v6372_v40 = vpop.eup %6371  ;;  %v2612_v8 = vmul.f32 %v6370_v34, %v7631_v38  ;;  %v2354_v35 = vadd.f32 %v7725_v24, %v1811_v25 }
 0x296   : > { %6381 = vtanh.f32 %v2355_v27  ;;  %v2609_v16 = vmul.f32 %v6372_v40, %v7631_v38 }
 0x297   : > { %v5577_v30 = vpop.f32.mrb[40].mxu0  ;;  %6383 = vtanh.f32 %v2353_v36  ;;  %v2806_v39 = vsel %vm1170_vm5, %v2612_v8, 0.0 }
 0x298   : > { %2777 = vadd.xlane.f32.xlu1 %v2776_v14  ;;  %2795 = vadd.xlane.f32.xlu0 %v2794_v31  ;;  %v1821_v29 = vpop.f32.mrb[41].mxu0  ;;  %v2357_v37 = vadd.f32 %v5577_v30, %v7725_v24  ;;  %v6374_v17 = vpop.eup %6373  ;;  %v2797_v23 = vsel %vm1170_vm5, %v2609_v16, 0.0  ;;  %v7773_v31 = vld [vmem:[#allocation2 + $0x3] ss:$0 sm:$0xff] }
 0x299   : > { %v2356_v11 = vadd.f32 %v7725_v24, %v1821_v29  ;;  %v6376_v12 = vpop.eup %6375  ;;  %v2614_v18 = vmul.f32 %v6374_v17, %v7631_v38 }
 0x29a   : > { %6385 = vtanh.f32 %v2357_v37  ;;  %v2611_v26 = vmul.f32 %v6376_v12, %v7631_v38 }
 0x29b   : > { %v5580_v42 = vpop.f32.mrb[42].mxu0  ;;  %6387 = vtanh.f32 %v2354_v35  ;;  %v2812_v25 = vsel %vm1170_vm5, %v2614_v18, 0.0 }
 0x29c   : > { %2774 = vadd.xlane.f32.xlu1 %v2773_v0  ;;  %2792 = vadd.xlane.f32.xlu0 %v2791_v5  ;;  %v1831_v9 = vpop.f32.mrb[43].mxu0  ;;  %6389 = vtanh.f32 %v2356_v11  ;;  %v2359_v10 = vadd.f32 %v5580_v42, %v7725_v24  ;;  %v2803_v34 = vsel %vm1170_vm5, %v2611_v26, 0.0 }
 0x29d   : > { %v6378_v20 = vpop.eup %6377  ;;  %v2358_v14 = vadd.f32 %v7725_v24, %v1831_v9 }
 0x29e   : > { %v6380_v19 = vpop.eup %6379  ;;  %v2615_v27 = vmul.f32 %v6378_v20, %v7631_v38  ;;  %6391 = vtanh.f32 %v2359_v10 }
 0x29f   : > { %v5583_v13 = vpop.f32.mrb[44].mxu0  ;;  %v2613_v36 = vmul.f32 %v6380_v19, %v7631_v38  ;;  %6393 = vtanh.f32 %v2358_v14 }
 0x2a0   : > { %2801 = vadd.xlane.f32.xlu0 %v2800_v15  ;;  %2807 = vadd.xlane.f32.xlu1 %v2806_v39  ;;  %v1841_v21 = vpop.f32.mrb[45].mxu0  ;;  %v6382_v28 = vpop.eup %6381  ;;  %v2815_v29 = vsel %vm1170_vm5, %v2615_v27, 0.0  ;;  %v2361_v5 = vadd.f32 %v5583_v13, %v7725_v24 }
 0x2a1   : > { %v6384_v32 = vpop.eup %6383  ;;  %v2618_v37 = vmul.f32 %v6382_v28, %v7631_v38  ;;  %v2809_v9 = vsel %vm1170_vm5, %v2613_v36, 0.0  ;;  %v2360_v16 = vadd.f32 %v7725_v24, %v1841_v21 }
 0x2a2   : > { %v2616_v7 = vmul.f32 %v6384_v32, %v7631_v38 }
 0x2a3   : > { %v5586_v22 = vpop.f32.mrb[46].mxu0  ;;  %v2824_v35 = vsel %vm1170_vm5, %v2618_v37, 0.0 }
 0x2a4   : > { %2798 = vadd.xlane.f32.xlu0 %v2797_v23  ;;  %2813 = vadd.xlane.f32.xlu1 %v2812_v25  ;;  %v1851_v30 = vpop.f32.mrb[47].mxu0  ;;  %v6386_v40 = vpop.eup %6385  ;;  %v2818_v18 = vsel %vm1170_vm5, %v2616_v7, 0.0  ;;  %v2363_v27 = vadd.f32 %v5586_v22, %v7725_v24 }
 0x2a5   : > { %v6388_v8 = vpop.eup %6387  ;;  %v2620_v11 = vmul.f32 %v6386_v40, %v7631_v38  ;;  %v2362_v37 = vadd.f32 %v7725_v24, %v1851_v30 }
 0x2a6   : > { %v6390_v12 = vpop.eup %6389  ;;  %v2617_v19 = vmul.f32 %v6388_v8, %v7631_v38 }
 0x2a7   : > { %v5589_v33 = vpop.f32.mrb[48].mxu0  ;;  %v2830_v10 = vsel %vm1170_vm5, %v2620_v11, 0.0  ;;  %v2619_v23 = vmul.f32 %v6390_v12, %v7631_v38 }
 0x2a8   : > { %v2365_v42 = vadd.f32 %v5589_v33, %v7773_v31  ;;  %2804 = vadd.xlane.f32.xlu0 %v2803_v34  ;;  %2816 = vadd.xlane.f32.xlu1 %v2815_v29  ;;  %v1861_v0 = vpop.f32.mrb[49].mxu0  ;;  %v6392_v25 = vpop.eup %6391  ;;  %v2821_v14 = vsel %vm1170_vm5, %v2617_v19, 0.0 }
 0x2a9   : > { %v6394_v28 = vpop.eup %6393  ;;  %v2827_v32 = vsel %vm1170_vm5, %v2619_v23, 0.0  ;;  %v2622_v33 = vmul.f32 %v6392_v25, %v7631_v38  ;;  %v2364_v11 = vadd.f32 %v7773_v31, %v1861_v0 }
 0x2aa   : > { %6395 = vtanh.f32 %v2365_v42 }
 0x2ab   : > { %v5592_v17 = vpop.f32.mrb[50].mxu0  ;;  %6397 = vtanh.f32 %v2361_v5  ;;  %v2836_v7 = vsel %vm1170_vm5, %v2622_v33, 0.0 }
 0x2ac   : > { %v2367_v15 = vadd.f32 %v5592_v17, %v7773_v31  ;;  %2810 = vadd.xlane.f32.xlu0 %v2809_v9  ;;  %2825 = vadd.xlane.f32.xlu1 %v2824_v35  ;;  %v1871_v39 = vpop.f32.mrb[51].mxu0  ;;  %v2621_v17 = vmul.f32 %v6394_v28, %v7631_v38 }
 0x2ad   : > { %v2366_v13 = vadd.f32 %v7773_v31, %v1871_v39 }
 0x2ae   : > { %6399 = vtanh.f32 %v2367_v15 }
 0x2af   : > { %6401 = vtanh.f32 %v2366_v13  ;;  %v5595_v20 = vpop.f32.mrb[52].mxu0  ;;  %v2833_v13 = vsel %vm1170_vm5, %v2621_v17, 0.0 }
 0x2b0   : > { %2819 = vadd.xlane.f32.xlu0 %v2818_v18  ;;  %2831 = vadd.xlane.f32.xlu1 %v2830_v10  ;;  %v1881_v26 = vpop.f32.mrb[53].mxu0  ;;  %6403 = vtanh.f32 %v2360_v16  ;;  %v2369_v0 = vadd.f32 %v5595_v20, %v7773_v31 }
 0x2b1   : > { %6405 = vtanh.f32 %v2363_v27 }
 0x2b3   : > { %v5598_v21 = vpop.f32.mrb[54].mxu0 }
 0x2b4   : > { %v6396_v34 = vpop.eup %6395  ;;  %v2371_v29 = vadd.f32 %v5598_v21, %v7773_v31  ;;  %2822 = vadd.xlane.f32.xlu0 %v2821_v14  ;;  %2828 = vadd.xlane.f32.xlu1 %v2827_v32  ;;  %v1891_v36 = vpop.f32.mrb[55].mxu0 }
 0x2b5   : > { %v2370_v22 = vadd.f32 %v7773_v31, %v1891_v36  ;;  %v2628_v40 = vmul.f32 %v6396_v34, %v7631_v38  ;;  %v6398_v42 = vpop.eup %6397  ;;  %v2368_v36 = vadd.f32 %v7773_v31, %v1881_v26 }
 0x2b6   : > { %6407 = vtanh.f32 %v2371_v29  ;;  %v2624_v18 = vmul.f32 %v6398_v42, %v7631_v38 }
 0x2b7   : > { %6409 = vtanh.f32 %v2370_v22  ;;  %v5601_v5 = vpop.f32.mrb[56].mxu0  ;;  %v2854_v8 = vsel %vm1170_vm5, %v2628_v40, 0.0 }
 0x2b8   : > { %v6400_v9 = vpop.eup %6399  ;;  %v2373_v35 = vadd.f32 %v5601_v5, %v7773_v31  ;;  %2837 = vadd.xlane.f32.xlu1 %v2836_v7  ;;  %2855 = vadd.xlane.f32.xlu0 %v2854_v8  ;;  %v1901_v24 = vpop.f32.mrb[57].mxu0  ;;  %6411 = vtanh.f32 %v2362_v37  ;;  %v2842_v21 = vsel %vm1170_vm5, %v2624_v18, 0.0 }
 0x2b9   : > { %v6402_v30 = vpop.eup %6401  ;;  %v2630_v12 = vmul.f32 %v6400_v9, %v7631_v38  ;;  %v2372_v15 = vadd.f32 %v7773_v31, %v1901_v24 }
 0x2ba   : > { %6413 = vtanh.f32 %v2373_v35  ;;  %v2629_v10 = vmul.f32 %v6402_v30, %v7631_v38  ;;  %v6404_v19 = vpop.eup %6403 }
 0x2bb   : > { %v5604_v39 = vpop.f32.mrb[58].mxu0  ;;  %v2860_v16 = vsel %vm1170_vm5, %v2630_v12, 0.0  ;;  %6415 = vtanh.f32 %v2364_v11  ;;  %v6406_v27 = vpop.eup %6405  ;;  %v2623_v32 = vmul.f32 %v6404_v19, %v7631_v38  ;;  %v7825_v11 = vld [vmem:[#allocation2 + $0x4] ss:$0 sm:$0xff] }
 0x2bc   : > { %2834 = vadd.xlane.f32.xlu1 %v2833_v13  ;;  %2861 = vadd.xlane.f32.xlu0 %v2860_v16  ;;  %v1911_v23 = vpop.f32.mrb[59].mxu0  ;;  %6417 = vtanh.f32 %v2372_v15  ;;  %v2375_v25 = vadd.f32 %v5604_v39, %v7773_v31  ;;  %v2857_v14 = vsel %vm1170_vm5, %v2629_v10, 0.0  ;;  %v2626_v7 = vmul.f32 %v6406_v27, %v7631_v38 }
 0x2bd   : > { %6419 = vtanh.f32 %v2369_v0  ;;  %v2374_v37 = vadd.f32 %v7773_v31, %v1911_v23  ;;  %v2839_v42 = vsel %vm1170_vm5, %v2623_v32, 0.0 }
 0x2be   : > { %6421 = vtanh.f32 %v2375_v25  ;;  %v2848_v12 = vsel %vm1170_vm5, %v2626_v7, 0.0 }
 0x2bf   : > { %v5607_v28 = vpop.f32.mrb[60].mxu0  ;;  %6423 = vtanh.f32 %v2368_v36 }
 0x2c0   : > { %v6408_v33 = vpop.eup %6407  ;;  %2843 = vadd.xlane.f32.xlu1 %v2842_v21  ;;  %2858 = vadd.xlane.f32.xlu0 %v2857_v14  ;;  %v1921_v34 = vpop.f32.mrb[61].mxu0  ;;  %v2377_v26 = vadd.f32 %v5607_v28, %v7773_v31  ;;  %6425 = vtanh.f32 %v2374_v37 }
 0x2c1   : > { %v6410_v29 = vpop.eup %6409  ;;  %v2634_v20 = vmul.f32 %v6408_v33, %v7631_v38  ;;  %v2376_v10 = vadd.f32 %v7773_v31, %v1921_v34 }
 0x2c2   : > { %v6412_v22 = vpop.eup %6411  ;;  %v2633_v8 = vmul.f32 %v6410_v29, %v7631_v38  ;;  %6427 = vtanh.f32 %v2377_v26 }
 0x2c3   : > { %v5610_v40 = vpop.f32.mrb[62].mxu0  ;;  %v2872_v5 = vsel %vm1170_vm5, %v2634_v20, 0.0  ;;  %v2625_v39 = vmul.f32 %v6412_v22, %v7631_v38 }
 0x2c4   : > { %v6414_v17 = vpop.eup %6413  ;;  %2840 = vadd.xlane.f32.xlu1 %v2839_v42  ;;  %2873 = vadd.xlane.f32.xlu0 %v2872_v5  ;;  %v1931_v9 = vpop.f32.mrb[63].mxu0  ;;  %v2379_v35 = vadd.f32 %v5610_v40, %v7773_v31  ;;  %v2869_v15 = vsel %vm1170_vm5, %v2633_v8, 0.0 }
 0x2c5   : > { %v6416_v24 = vpop.eup %6415  ;;  %v2636_v13 = vmul.f32 %v6414_v17, %v7631_v38  ;;  %v2845_v25 = vsel %vm1170_vm5, %v2625_v39, 0.0  ;;  %v2378_v33 = vadd.f32 %v7773_v31, %v1931_v9 }
 0x2c6   : > { %v6418_v16 = vpop.eup %6417  ;;  %6429 = vtanh.f32 %v2379_v35  ;;  %v2627_v28 = vmul.f32 %v6416_v24, %v7631_v38 }
 0x2c7   : > { %v5613_v30 = vpop.f32.mrb[64].mxu0  ;;  %v6420_v23 = vpop.eup %6419  ;;  %v2878_v27 = vsel %vm1170_vm5, %v2636_v13, 0.0  ;;  %v2635_v21 = vmul.f32 %v6418_v16, %v7631_v38  ;;  %6431 = vtanh.f32 %v2376_v10 }
 0x2c8   : > { %2849 = vadd.xlane.f32.xlu1 %v2848_v12  ;;  %2870 = vadd.xlane.f32.xlu0 %v2869_v15  ;;  %v1941_v18 = vpop.f32.mrb[65].mxu0  ;;  %v6422_v14 = vpop.eup %6421  ;;  %v2851_v20 = vsel %vm1170_vm5, %v2627_v28, 0.0  ;;  %v2632_v22 = vmul.f32 %v6420_v23, %v7631_v38  ;;  %v2381_v31 = vadd.f32 %v5613_v30, %v7825_v11  ;;  %v3091_v28 = vlaneseq }
 0x2c9   : > { %v2380_v19 = vadd.f32 %v7825_v11, %v1941_v18  ;;  %v6424_v29 = vpop.eup %6423  ;;  %v2875_v37 = vsel %vm1170_vm5, %v2635_v21, 0.0  ;;  %v2638_v40 = vmul.f32 %v6422_v14, %v7631_v38 }
 0x2ca   : > { %v6426_v42 = vpop.eup %6425  ;;  %v2866_v9 = vsel %vm1170_vm5, %v2632_v22, 0.0  ;;  %v2631_v35 = vmul.f32 %v6424_v29, %v7631_v38 }
 0x2cb   : > { %v5616_v0 = vpop.f32.mrb[66].mxu0  ;;  %6433 = vtanh.f32 %v2380_v19  ;;  %v2884_v26 = vsel %vm1170_vm5, %v2638_v40, 0.0  ;;  %v2637_v24 = vmul.f32 %v6426_v42, %v7631_v38  ;;  %v7862_v40 = vand.u32 127, %v3091_v28 }
 0x2cc   : > { %2846 = vadd.xlane.f32.xlu1 %v2845_v25  ;;  %2879 = vadd.xlane.f32.xlu0 %v2878_v27  ;;  %v1951_v32 = vpop.f32.mrb[67].mxu0  ;;  %6435 = vtanh.f32 %v2378_v33  ;;  %v6428_v8 = vpop.eup %6427  ;;  %v2383_v30 = vadd.f32 %v5616_v0, %v7825_v11  ;;  %v2863_v18 = vsel %vm1170_vm5, %v2631_v35, 0.0 }
 0x2cd   : > { %v2382_v34 = vadd.f32 %v7825_v11, %v1951_v32  ;;  %v2881_v10 = vsel %vm1170_vm5, %v2637_v24, 0.0  ;;  %v2640_v19 = vmul.f32 %v6428_v8, %v7631_v38  ;;  %v7873_v24 = vshrl.u32 %v3091_v28, 7 }
 0x2ce   : > { %v3243_v28 = vadd.s32 4294967272, %v7862_v40 }
 0x2cf   : > { %v5619_v36 = vpop.f32.mrb[68].mxu0  ;;  %6437 = vtanh.f32 %v2382_v34  ;;  %v2890_v33 = vsel %vm1170_vm5, %v2640_v19, 0.0 }
 0x2d0   : > { %2852 = vadd.xlane.f32.xlu1 %v2851_v20  ;;  %2876 = vadd.xlane.f32.xlu0 %v2875_v37  ;;  %v1961_v5 = vpop.f32.mrb[69].mxu0  ;;  %v2385_v7 = vadd.f32 %v5619_v36, %v7825_v11  ;;  %v6430_v12 = vpop.eup %6429  ;;  %6439 = vtanh.f32 %v2381_v31 }
 0x2d1   : > { %v6432_v13 = vpop.eup %6431  ;;  %v2642_v23 = vmul.f32 %v6430_v12, %v7631_v38  ;;  %v2384_v0 = vadd.f32 %v7825_v11, %v1961_v5  ;;  %v3229_v12 = vadd.s32 4294967288, %v7862_v40 }
 0x2d2   : > { %6441 = vtanh.f32 %v2385_v7  ;;  %v2639_v29 = vmul.f32 %v6432_v13, %v7631_v38 }
 0x2d3   : > { %v5622_v17 = vpop.f32.mrb[70].mxu0  ;;  %6443 = vtanh.f32 %v2383_v30  ;;  %v2896_v34 = vsel %vm1170_vm5, %v2642_v23, 0.0 }
 0x2d4   : > { %2867 = vadd.xlane.f32.xlu1 %v2866_v9  ;;  %2885 = vadd.xlane.f32.xlu0 %v2884_v26  ;;  %v1971_v15 = vpop.f32.mrb[71].mxu0  ;;  %v2387_v39 = vadd.f32 %v5622_v17, %v7825_v11  ;;  %v2887_v31 = vsel %vm1170_vm5, %v2639_v29, 0.0 }
 0x2d5   : > { %v6434_v25 = vpop.eup %6433  ;;  %v2386_v21 = vadd.f32 %v7825_v11, %v1971_v15 }
 0x2d6   : > { %6445 = vtanh.f32 %v2387_v39  ;;  %v6436_v14 = vpop.eup %6435  ;;  %v2643_v36 = vmul.f32 %v6434_v25, %v7631_v38 }
 0x2d7   : > { %v5625_v16 = vpop.f32.mrb[72].mxu0  ;;  %6447 = vtanh.f32 %v2384_v0  ;;  %v2641_v8 = vmul.f32 %v6436_v14, %v7631_v38  ;;  %v7888_v0 = vsub.s32 %v3229_v12, %v7873_v24  ;;  %v7894_v14 = vld [vmem:[#allocation2 + $0x5] ss:$0 sm:$0xff] }
 0x2d8   : > { %2864 = vadd.xlane.f32.xlu1 %v2863_v18  ;;  %2882 = vadd.xlane.f32.xlu0 %v2881_v10  ;;  %v1981_v27 = vpop.f32.mrb[73].mxu0  ;;  %v2389_v22 = vadd.f32 %v5625_v16, %v7825_v11  ;;  %6449 = vtanh.f32 %v2386_v21  ;;  %v2899_v7 = vsel %vm1170_vm5, %v2643_v36, 0.0  ;;  %v7882_v18 = vld [vmem:[%s8896_s5] ss:$0 sm:$0xff] }
 0x2d9   : > { %v6438_v20 = vpop.eup %6437  ;;  %v2388_v26 = vadd.f32 %v7825_v11, %v1981_v27  ;;  %v2893_v39 = vsel %vm1170_vm5, %v2641_v8, 0.0  ;;  %v3236_v8 = vadd.s32 4294967280, %v7862_v40 }
 0x2da   : > { %v6440_v42 = vpop.eup %6439  ;;  %v2645_v17 = vmul.f32 %v6438_v20, %v7631_v38  ;;  %6451 = vtanh.f32 %v2389_v22 }
 0x2db   : > { %v5628_v32 = vpop.f32.mrb[74].mxu0  ;;  %v2644_v16 = vmul.f32 %v6440_v42, %v7631_v38  ;;  %6453 = vtanh.f32 %v2388_v26 }
 0x2dc   : > { %2891 = vadd.xlane.f32.xlu0 %v2890_v33  ;;  %2897 = vadd.xlane.f32.xlu1 %v2896_v34  ;;  %v1991_v37 = vpop.f32.mrb[75].mxu0  ;;  %v6442_v9 = vpop.eup %6441  ;;  %v2905_v13 = vsel %vm1170_vm5, %v2645_v17, 0.0  ;;  %v2391_v21 = vadd.f32 %v5628_v32, %v7825_v11  ;;  %v3257_v34 = vadd.s32 4294967256, %v7862_v40  ;;  %v3250_v17 = vadd.s32 4294967264, %v7862_v40 }
 0x2dd   : > { %v6444_v15 = vpop.eup %6443  ;;  %v2648_v10 = vmul.f32 %v7882_v18, %v6442_v9  ;;  %v2902_v20 = vsel %vm1170_vm5, %v2644_v16, 0.0  ;;  %v2390_v9 = vadd.f32 %v7825_v11, %v1991_v37  ;;  %v3264_v16 = vadd.s32 4294967248, %v7862_v40 }
 0x2de   : > { %v2646_v33 = vmul.f32 %v7882_v18, %v6444_v15  ;;  %v7912_v15 = vsub.s32 %v3243_v28, %v7873_v24  ;;  %v7928_v28 = vsub.s32 %v3236_v8, %v7873_v24 }
 0x2df   : > { %v7864_v5 = vpop.f32.mrb[76].mxu0  ;;  %v2914_v22 = vsel %vm1170_vm5, %v2648_v10, 0.0 }
 0x2e0   : > { %2888 = vadd.xlane.f32.xlu0 %v2887_v31  ;;  %2900 = vadd.xlane.f32.xlu1 %v2899_v7  ;;  %v7871_v35 = vpop.f32.mrb[77].mxu0  ;;  %v6446_v19 = vpop.eup %6445  ;;  %v7905_v7 = vsub.s32 %v7862_v40, %v7873_v24 }
 0x2e1   : > { %v6448_v29 = vpop.eup %6447  ;;  %v2650_v42 = vmul.f32 %v7882_v18, %v6446_v19 }
 0x2e2   : > { %v6450_v31 = vpop.eup %6449 }
 0x2e3   : > { %v5634_v30 = vpop.f32.mrb[78].mxu0  ;;  %v2920_v37 = vsel %vm1170_vm5, %v2650_v42, 0.0 }
 0x2e4   : > { %v2395_v23 = vadd.f32 %v5634_v30, %v7825_v11  ;;  %2894 = vadd.xlane.f32.xlu0 %v2893_v39  ;;  %2906 = vadd.xlane.f32.xlu1 %v2905_v13  ;;  %v2011_v25 = vpop.f32.mrb[79].mxu0  ;;  %v3271_v30 = vadd.s32 4294967240, %v7862_v40  ;;  %v2908_v39 = vsel %vm1170_vm5, %v2646_v33, 0.0  ;;  %v7917_v13 = vsub.s32 %v3257_v34, %v7873_v24  ;;  %v6452_v10 = vpop.eup %6451 }
 0x2e5   : > { %v2394_v27 = vadd.f32 %v7825_v11, %v2011_v25  ;;  %v7890_v38 = vpop.xlane.xlu0 %2711  ;;  %v2649_v25 = vmul.f32 %v7882_v18, %v6450_v31  ;;  %v7934_v33 = vadd.s32 4294967224, %v7862_v40  ;;  %v2393_v34 = vadd.f32 %v7864_v5, %v7825_v11  ;;  %v6454_v42 = vpop.eup %6453 }
 0x2e6   : > { %6455 = vtanh.f32 %v2395_v23  ;;  %v2647_v23 = vmul.f32 %v7882_v18, %v6448_v29  ;;  %v7946_v5 = vsub.s32 %v3264_v16, %v7873_v24 }
 0x2e7   : > { %6457 = vtanh.f32 %v2394_v27  ;;  %v7898_v36 = vpop.f32.mrb[80].mxu0 }
 0x2e8   : > { %2903 = vadd.xlane.f32.xlu0 %v2902_v20  ;;  %2915 = vadd.xlane.f32.xlu1 %v2914_v22  ;;  %v2021_v32 = vpop.f32.mrb[81].mxu0  ;;  %6459 = vtanh.f32 %v2391_v21  ;;  %v7931_v21 = vsub.s32 %v3250_v17, %v7873_v24  ;;  %v7939_v22 = vsub.s32 %v3271_v30, %v7873_v24  ;;  %v2911_v17 = vsel %vm1170_vm5, %v2647_v23, 0.0 }
 0x2e9   : > { %v2396_v26 = vadd.f32 %v7894_v14, %v2021_v32  ;;  %v2709_v12 = vpop.xlane.xlu0 %2708  ;;  %v2652_v32 = vmul.f32 %v7882_v18, %v6452_v10  ;;  %v2392_v30 = vadd.f32 %v7825_v11, %v7871_v35  ;;  %v3299_v23 = vadd.s32 4294967208, %v7862_v40 }
 0x2ea   : > { %v3228_v31 = vrot.slane %v2709_v12, %v7905_v7  ;;  %v3233_v12 = vrot.slane %v7890_v38, %v7888_v0  ;;  %v2651_v11 = vmul.f32 %v7882_v18, %v6454_v42 }
 0x2eb   : > { %6461 = vtanh.f32 %v2396_v26  ;;  %v7920_v19 = vpop.f32.mrb[82].mxu0  ;;  %v3278_v26 = vadd.s32 4294967232, %v7862_v40 }
 0x2ec   : > { %2909 = vadd.xlane.f32.xlu0 %v2908_v39  ;;  %2921 = vadd.xlane.f32.xlu1 %v2920_v37  ;;  %v7925_v27 = vpop.f32.mrb[83].mxu0  ;;  %6463 = vtanh.f32 %v2390_v9  ;;  %v2917_v9 = vsel %vm1170_vm5, %v2649_v25, 0.0  ;;  %v3235_v35 = vsel %vm3234_vm6, %v3233_v12, %v3228_v31 }
 0x2ed   : > { %v2718_v29 = vpop.xlane.xlu0 %2717  ;;  %v2724_v20 = vpop.xlane.xlu1 %2723  ;;  %6465 = vtanh.f32 %v2393_v34 }
 0x2ef   : > { %v5643_v8 = vpop.f32.mrb[84].mxu0 }
 0x2f0   : > { %v6456_v39 = vpop.eup %6455  ;;  %v2401_v10 = vadd.f32 %v5643_v8, %v7894_v14  ;;  %2912 = vadd.xlane.f32.xlu0 %v2911_v17  ;;  %2918 = vadd.xlane.f32.xlu1 %v2917_v9  ;;  %v2041_v37 = vpop.f32.mrb[85].mxu0  ;;  %v2926_v8 = vsel %vm1170_vm5, %v2652_v32, 0.0  ;;  %v3247_v17 = vrot.slane %v2718_v29, %v7912_v15  ;;  %v3292_v32 = vadd.s32 4294967216, %v7862_v40 }
 0x2f1   : > { %v6458_v25 = vpop.eup %6457  ;;  %v2400_v16 = vadd.f32 %v7894_v14, %v2041_v37  ;;  %v2715_v6 = vpop.xlane.xlu0 %2714  ;;  %v2658_v1 = vmul.f32 %v7882_v18, %v6456_v39  ;;  %v2397_v29 = vadd.f32 %v7898_v36, %v7894_v14 }
 0x2f2   : > { %v2721_v2 = vpop.xlane.xlu1 %2720  ;;  %6467 = vtanh.f32 %v2401_v10  ;;  %v3240_v38 = vrot.slane %v2715_v6, %v7928_v28  ;;  %v2657_v37 = vmul.f32 %v7882_v18, %v6458_v25  ;;  %v6460_v60 = vpop.eup %6459 }
 0x2f3   : > { %6469 = vtanh.f32 %v2400_v16  ;;  %v5646_v9 = vpop.f32.mrb[86].mxu0  ;;  %v2944_v34 = vsel %vm1170_vm5, %v2658_v1, 0.0  ;;  %v3254_v42 = vrot.slane %v2721_v2, %v7931_v21  ;;  %v3261_v1 = vrot.slane %v2724_v20, %v7917_v13 }
 0x2f4   : > { %v3242_v39 = vsel %vm3241_vm7, %v3240_v38, %v3235_v35  ;;  %v2403_v31 = vadd.f32 %v5646_v9, %v7894_v14  ;;  %2927 = vadd.xlane.f32.xlu1 %v2926_v8  ;;  %2945 = vadd.xlane.f32.xlu0 %v2944_v34  ;;  %v2051_v6 = vpop.f32.mrb[87].mxu0  ;;  %6471 = vtanh.f32 %v2392_v30  ;;  %v2923_v38 = vsel %vm1170_vm5, %v2651_v11, 0.0 }
 0x2f5   : > { %v6462_v12 = vpop.eup %6461  ;;  %v3249_v10 = vsel %vm3248_vm8, %v3247_v17, %v3242_v39  ;;  %v2730_v25 = vpop.xlane.xlu0 %2729  ;;  %v2402_v35 = vadd.f32 %v7894_v14, %v2051_v6  ;;  %v2941_v30 = vsel %vm1170_vm5, %v2657_v37, 0.0  ;;  %v2654_v36 = vmul.f32 %v7882_v18, %v6460_v60 }
 0x2f6   : > { %v2736_v16 = vpop.xlane.xlu1 %2735  ;;  %v3256_v2 = vsel %vm3255_vm9, %v3254_v42, %v3249_v10  ;;  %6473 = vtanh.f32 %v2403_v31  ;;  %v6464_v8 = vpop.eup %6463  ;;  %v2659_v20 = vmul.f32 %v7882_v18, %v6462_v12  ;;  %v7981_v17 = vsub.s32 %v7934_v33, %v7873_v24 }
 0x2f7   : > { %v5649_v9 = vpop.f32.mrb[88].mxu0  ;;  %v3263_v34 = vsel %vm3262_vm10, %v3261_v1, %v3256_v2  ;;  %v7984_v11 = vsub.s32 %v3278_v26, %v7873_v24  ;;  %6475 = vtanh.f32 %v2397_v29  ;;  %v2399_v37 = vadd.f32 %v7920_v19, %v7894_v14  ;;  %v6466_v1 = vpop.eup %6465 }
 0x2f8   : > { %2924 = vadd.xlane.f32.xlu1 %v2923_v38  ;;  %2942 = vadd.xlane.f32.xlu0 %v2941_v30  ;;  %v2061_v39 = vpop.f32.mrb[89].mxu0  ;;  %v7989_v31 = vsub.s32 %v3299_v23, %v7873_v24  ;;  %6477 = vtanh.f32 %v2402_v35  ;;  %v2405_v33 = vadd.f32 %v5649_v9, %v7894_v14  ;;  %v2653_v12 = vmul.f32 %v7882_v18, %v6464_v8 }
 0x2f9   : > { %v2727_v42 = vpop.xlane.xlu0 %2726  ;;  %v3275_v26 = vrot.slane %v2730_v25, %v7939_v22  ;;  %v2932_v10 = vsel %vm1170_vm5, %v2654_v36, 0.0  ;;  %v2947_v19 = vsel %vm1170_vm5, %v2659_v20, 0.0  ;;  %v7998_v2 = vsub.s32 %v3292_v32, %v7873_v24 }
 0x2fa   : > { %v2733_v60 = vpop.xlane.xlu1 %2732  ;;  %v3268_v6 = vrot.slane %v2727_v42, %v7946_v5  ;;  %v2398_v35 = vadd.f32 %v7894_v14, %v7925_v27  ;;  %6479 = vtanh.f32 %v2399_v37  ;;  %v3289_v30 = vrot.slane %v2736_v16, %v7981_v17 }
 0x2fb   : > { %v5652_v29 = vpop.f32.mrb[90].mxu0  ;;  %v3282_v9 = vrot.slane %v2733_v60, %v7984_v11  ;;  %6481 = vtanh.f32 %v2405_v33  ;;  %v2404_v27 = vadd.f32 %v7894_v14, %v2061_v39  ;;  %v2929_v42 = vsel %vm1170_vm5, %v2653_v12, 0.0 }
 0x2fc   : > { %v6468_v23 = vpop.eup %6467  ;;  %v3270_v38 = vsel %vm3269_vm11, %v3268_v6, %v3263_v34  ;;  %2933 = vadd.xlane.f32.xlu1 %v2932_v10  ;;  %2948 = vadd.xlane.f32.xlu0 %v2947_v19  ;;  %v2071_v8 = vpop.f32.mrb[91].mxu0  ;;  %v2656_v16 = vmul.f32 %v7882_v18, %v6466_v1  ;;  %v3313_v39 = vadd.s32 4294967192, %v7862_v40  ;;  %6483 = vtanh.f32 %v2398_v35 }
 0x2fd   : > { %v6470_v25 = vpop.eup %6469  ;;  %v3277_v36 = vsel %vm3276_vm12, %v3275_v26, %v3270_v38  ;;  %v2664_v20 = vmul.f32 %v7882_v18, %v6468_v23  ;;  %v2407_v12 = vadd.f32 %v5652_v29, %v7894_v14  ;;  %v3306_v38 = vadd.s32 4294967200, %v7862_v40 }
 0x2fe   : > { %v2742_v32 = vpop.xlane.xlu1 %2741  ;;  %v3284_v34 = vsel %vm3283_vm13, %v3282_v9, %v3277_v36  ;;  %v6472_v60 = vpop.eup %6471  ;;  %v2663_v26 = vmul.f32 %v7882_v18, %v6470_v25  ;;  %6485 = vtanh.f32 %v2404_v27 }
 0x2ff   : > { %v5655_v6 = vpop.f32.mrb[92].mxu0  ;;  %v2962_v10 = vsel %vm1170_vm5, %v2664_v20, 0.0  ;;  %v3291_v37 = vsel %vm8910_vm14, %v3289_v30, %v3284_v34  ;;  %v2655_v25 = vmul.f32 %v7882_v18, %v6472_v60  ;;  %v3303_v36 = vrot.slane %v2742_v32, %v7989_v31 }
 0x300   : > { %v6474_v19 = vpop.eup %6473  ;;  %2930 = vadd.xlane.f32.xlu1 %v2929_v42  ;;  %2963 = vadd.xlane.f32.xlu0 %v2962_v10  ;;  %v2081_v33 = vpop.f32.mrb[93].mxu0  ;;  %v2409_v9 = vadd.f32 %v5655_v6, %v7894_v14  ;;  %v2938_v34 = vsel %vm1170_vm5, %v2656_v16, 0.0  ;;  %v2959_v35 = vsel %vm1170_vm5, %v2663_v26, 0.0  ;;  %6487 = vtanh.f32 %v2407_v12 }
 0x301   : > { %v6476_v30 = vpop.eup %6475  ;;  %v2666_v29 = vmul.f32 %v7882_v18, %v6474_v19  ;;  %v2406_v6 = vadd.f32 %v7894_v14, %v2071_v8  ;;  %v8029_v16 = vsub.s32 %v3306_v38, %v7873_v24  ;;  %v2935_v8 = vsel %vm1170_vm5, %v2655_v25, 0.0 }
 0x302   : > { %v2739_v23 = vpop.xlane.xlu1 %2738  ;;  %v6478_v42 = vpop.eup %6477  ;;  %6489 = vtanh.f32 %v2409_v9  ;;  %v2660_v26 = vmul.f32 %v7882_v18, %v6476_v30  ;;  %v3327_v30 = vadd.s32 4294967176, %v7862_v40 }
 0x303   : > { %v3296_v1 = vrot.slane %v2739_v23, %v7998_v2  ;;  %v5658_v20 = vpop.f32.mrb[94].mxu0  ;;  %v2968_v12 = vsel %vm1170_vm5, %v2666_v29, 0.0  ;;  %v2665_v9 = vmul.f32 %v7882_v18, %v6478_v42  ;;  %6491 = vtanh.f32 %v2406_v6 }
 0x304   : > { %2939 = vadd.xlane.f32.xlu1 %v2938_v34  ;;  %2960 = vadd.xlane.f32.xlu0 %v2959_v35  ;;  %v2091_v27 = vpop.f32.mrb[95].mxu0  ;;  %v6480_v19 = vpop.eup %6479  ;;  %v8035_v34 = vld [vmem:[#allocation2 + $0x6] ss:$0 sm:$0xff]  ;;  %v2950_v42 = vsel %vm1170_vm5, %v2660_v26, 0.0  ;;  %v2411_v51 = vadd.f32 %v5658_v20, %v7894_v14  ;;  %v8061_v20 = vsub.s32 %v3327_v30, %v7873_v24 }
 0x305   : > { %v3298_v10 = vsel %vm3297_vm15, %v3296_v1, %v3291_v37  ;;  %v2410_v32 = vadd.f32 %v7894_v14, %v2091_v27  ;;  %v8033_v37 = vsub.s32 %v3313_v39, %v7873_v24  ;;  %v2408_v39 = vadd.f32 %v7894_v14, %v2081_v33 }
 0x306   : > { %v2748_v60 = vpop.xlane.xlu1 %2747  ;;  %v3305_v23 = vsel %vm3304_vm0, %v3303_v36, %v3298_v10  ;;  %v6482_v36 = vpop.eup %6481  ;;  %v3320_v10 = vadd.s32 4294967184, %v7862_v40  ;;  %v2965_v56 = vsel %vm1170_vm5, %v2665_v9, 0.0  ;;  %v2662_v6 = vmul.f32 %v7882_v18, %v6480_v19 }
 0x307   : > { %v5661_v1 = vpop.f32.mrb[96].mxu0  ;;  %6493 = vtanh.f32 %v2410_v32  ;;  %v6484_v27 = vpop.eup %6483  ;;  %v2668_v33 = vmul.f32 %v7882_v18, %v6482_v36 }
 0x308   : > { %2936 = vadd.xlane.f32.xlu1 %v2935_v8  ;;  %2969 = vadd.xlane.f32.xlu0 %v2968_v12  ;;  %v2101_v38 = vpop.f32.mrb[97].mxu0  ;;  %v2413_v25 = vadd.f32 %v5661_v1, %v8035_v34  ;;  %v3317_v8 = vrot.slane %v2748_v60, %v8033_v37  ;;  %v6486_v55 = vpop.eup %6485  ;;  %6495 = vtanh.f32 %v2408_v39  ;;  %v8057_v19 = vsub.s32 %v3320_v10, %v7873_v24 }
 0x309   : > { %v2661_v36 = vmul.f32 %v7882_v18, %v6484_v27  ;;  %v2974_v39 = vsel %vm1170_vm5, %v2668_v33, 0.0  ;;  %v2412_v10 = vadd.f32 %v8035_v34, %v2101_v38 }
 0x30a   : > { %v2745_v35 = vpop.xlane.xlu1 %2744  ;;  %6497 = vtanh.f32 %v2413_v25  ;;  %v6488_v14 = vpop.eup %6487 }
 0x30b   : > { %v3310_v29 = vrot.slane %v2745_v35, %v8029_v16  ;;  %v5664_v12 = vpop.f32.mrb[98].mxu0  ;;  %6499 = vtanh.f32 %v2411_v51  ;;  %v2670_v38 = vmul.f32 %v7882_v18, %v6488_v14 }
 0x30c   : > { %2951 = vadd.xlane.f32.xlu1 %v2950_v42  ;;  %2966 = vadd.xlane.f32.xlu0 %v2965_v56  ;;  %v2111_v1 = vpop.f32.mrb[99].mxu0  ;;  %v2415_v9 = vadd.f32 %v5664_v12, %v8035_v34  ;;  %v6490_v42 = vpop.eup %6489 }
 0x30d   : > { %v3312_v32 = vsel %vm3311_vm1, %v3310_v29, %v3305_v23  ;;  %v8052_v35 = vpop.xlane.xlu0 %2771  ;;  %v2956_v23 = vsel %vm1170_vm5, %v2662_v6, 0.0  ;;  %v2667_v29 = vmul.f32 %v7882_v18, %v6486_v55  ;;  %v2953_v6 = vsel %vm1170_vm5, %v2661_v36, 0.0  ;;  %v6492_v55 = vpop.eup %6491 }
 0x30e   : > { %v2754_v26 = vpop.xlane.xlu1 %2753  ;;  %v3319_v60 = vsel %vm3318_vm2, %v3317_v8, %v3312_v32  ;;  %6501 = vtanh.f32 %v2415_v9  ;;  %v2980_v46 = vsel %vm1170_vm5, %v2670_v38, 0.0 }
 0x30f   : > { %v5667_v56 = vpop.f32.mrb[100].mxu0  ;;  %v3331_v51 = vrot.slane %v2754_v26, %v8061_v20  ;;  %v2971_v32 = vsel %vm1170_vm5, %v2667_v29, 0.0  ;;  %6503 = vtanh.f32 %v2412_v10 }
 0x310   : > { %2957 = vadd.xlane.f32.xlu1 %v2956_v23  ;;  %2975 = vadd.xlane.f32.xlu0 %v2974_v39  ;;  %v2121_v25 = vpop.f32.mrb[101].mxu0  ;;  %v2417_v30 = vadd.f32 %v5667_v56, %v8035_v34  ;;  %v2672_v23 = vmul.f32 %v7882_v18, %v6490_v42  ;;  %v2414_v56 = vadd.f32 %v8035_v34, %v2111_v1 }
 0x311   : > { %v8067_v8 = vpop.xlane.xlu0 %2768  ;;  %v6494_v39 = vpop.eup %6493  ;;  %v2416_v14 = vadd.f32 %v8035_v34, %v2121_v25 }
 0x312   : > { %v2751_v27 = vpop.xlane.xlu1 %2750  ;;  %6505 = vtanh.f32 %v2417_v30  ;;  %v6496_v29 = vpop.eup %6495  ;;  %v2673_v10 = vmul.f32 %v7882_v18, %v6494_v39 }
 0x313   : > { %v3324_v12 = vrot.slane %v2751_v27, %v8057_v19  ;;  %v5670_v33 = vpop.f32.mrb[102].mxu0  ;;  %6507 = vtanh.f32 %v2414_v56 }
 0x314   : > { %2954 = vadd.xlane.f32.xlu1 %v2953_v6  ;;  %2972 = vadd.xlane.f32.xlu0 %v2971_v32  ;;  %v2131_v9 = vpop.f32.mrb[103].mxu0  ;;  %v6498_v1 = vpop.eup %6497  ;;  %v2419_v6 = vadd.f32 %v5670_v33, %v8035_v34  ;;  %6509 = vtanh.f32 %v2416_v14  ;;  %v2989_v39 = vsel %vm1170_vm5, %v2673_v10, 0.0 }
 0x315   : > { %v3326_v47 = vsel %vm3325_vm3, %v3324_v12, %v3319_v60  ;;  %v8081_v27 = vpop.xlane.xlu0 %2783  ;;  %v2986_v60 = vsel %vm1170_vm5, %v2672_v23, 0.0  ;;  %v2669_v12 = vmul.f32 %v7882_v18, %v6492_v55  ;;  %v6500_v25 = vpop.eup %6499  ;;  %v2676_v56 = vmul.f32 %v7882_v18, %v6498_v1 }
 0x316   : > { %v8079_v36 = vsel %vm3332_vm4, %v3331_v51, %v3326_v47  ;;  %v2760_v26 = vpop.xlane.xlu1 %2759  ;;  %v2418_v33 = vadd.f32 %v8035_v34, %v2131_v9  ;;  %6511 = vtanh.f32 %v2419_v6 }
 0x317   : > { %v5673_v42 = vpop.f32.mrb[104].mxu0  ;;  %v3341_v32 = vrot.slane %v2760_v26, %v7888_v0  ;;  %v2977_v55 = vsel %vm1170_vm5, %v2669_v12, 0.0  ;;  %v2674_v12 = vmul.f32 %v7882_v18, %v6500_v25  ;;  %v2998_v1 = vsel %vm1170_vm5, %v2676_v56, 0.0 }
 0x318   : > { %2981 = vadd.xlane.f32.xlu0 %v2980_v46  ;;  %2987 = vadd.xlane.f32.xlu1 %v2986_v60  ;;  %v2141_v47 = vpop.f32.mrb[105].mxu0  ;;  %v2671_v46 = vmul.f32 %v7882_v18, %v6496_v29  ;;  %v6502_v60 = vpop.eup %6501  ;;  %6513 = vtanh.f32 %v2418_v33 }
 0x319   : > { %v8089_v51 = vpop.xlane.xlu0 %2780  ;;  %v6504_v10 = vpop.eup %6503  ;;  %v2678_v9 = vmul.f32 %v7882_v18, %v6502_v60  ;;  %v2992_v25 = vsel %vm1170_vm5, %v2674_v12, 0.0  ;;  %v3356_v12 = vrot.slane %v8067_v8, %v7931_v21 }
 0x31a   : > { %v2757_v30 = vpop.xlane.xlu1 %2756  ;;  %v2983_v29 = vsel %vm1170_vm5, %v2671_v46, 0.0  ;;  %v2421_v46 = vadd.f32 %v5673_v42, %v8035_v34  ;;  %v2675_v60 = vmul.f32 %v7882_v18, %v6504_v10  ;;  %v2420_v42 = vadd.f32 %v8035_v34, %v2141_v47 }
 0x31b   : > { %v3337_v38 = vrot.slane %v2757_v30, %v7905_v7  ;;  %v5676_v23 = vpop.f32.mrb[106].mxu0 }
 0x31c   : > { %2978 = vadd.xlane.f32.xlu0 %v2977_v55  ;;  %2990 = vadd.xlane.f32.xlu1 %v2989_v39  ;;  %v8099_v14 = vpop.f32.mrb[107].mxu0  ;;  %v6506_v62 = vpop.eup %6505 }
 0x31d   : > { %v3342_v3 = vsel %vm3234_vm6, %v3341_v32, %v3337_v38  ;;  %v8101_v30 = vpop.xlane.xlu0 %2789  ;;  %v6508_v33 = vpop.eup %6507 }
 0x31e   : > { %v2766_v26 = vpop.xlane.xlu1 %2765  ;;  %v6510_v63 = vpop.eup %6509  ;;  %v2677_v47 = vmul.f32 %v7882_v18, %v6508_v33  ;;  %v3381_v33 = vrot.slane %v8081_v27, %v7981_v17 }
 0x31f   : > { %v5679_v4 = vpop.f32.mrb[108].mxu0 }
 0x320   : > { %v2425_v32 = vadd.f32 %v5679_v4, %v8035_v34  ;;  %2984 = vadd.xlane.f32.xlu0 %v2983_v29  ;;  %2999 = vadd.xlane.f32.xlu1 %v2998_v1  ;;  %v2161_v6 = vpop.f32.mrb[109].mxu0  ;;  %v3351_v4 = vrot.slane %v2766_v26, %v7912_v15  ;;  %v3004_v1 = vsel %vm1170_vm5, %v2678_v9, 0.0  ;;  %v3361_v26 = vrot.slane %v8052_v35, %v7917_v13  ;;  %v6512_v59 = vpop.eup %6511 }
 0x321   : > { %v2424_v38 = vadd.f32 %v8035_v34, %v2161_v6  ;;  %v8109_v39 = vpop.xlane.xlu0 %2786  ;;  %v2680_v6 = vmul.f32 %v7882_v18, %v6506_v62  ;;  %v8129_v62 = vld [vmem:[#allocation2 + $0x7] ss:$0 sm:$0xff] }
 0x322   : > { %v2763_v55 = vpop.xlane.xlu1 %2762  ;;  %6515 = vtanh.f32 %v2425_v32 }
 0x323   : > { %v3346_v56 = vrot.slane %v2763_v55, %v7928_v28  ;;  %6517 = vtanh.f32 %v2424_v38  ;;  %v8116_v29 = vpop.f32.mrb[110].mxu0 }
 0x324   : > { %2993 = vadd.xlane.f32.xlu0 %v2992_v25  ;;  %3005 = vadd.xlane.f32.xlu1 %v3004_v1  ;;  %v2171_v10 = vpop.f32.mrb[111].mxu0  ;;  %6519 = vtanh.f32 %v2421_v46  ;;  %v2995_v25 = vsel %vm1170_vm5, %v2675_v60, 0.0  ;;  %v2423_v1 = vadd.f32 %v5676_v23, %v8035_v34  ;;  %v3376_v60 = vrot.slane %v8089_v51, %v7984_v11 }
 0x325   : > { %v3347_v32 = vsel %vm3241_vm7, %v3346_v56, %v3342_v3  ;;  %v8127_v9 = vpop.xlane.xlu0 %2795  ;;  %v3010_v56 = vsel %vm1170_vm5, %v2680_v6, 0.0  ;;  %6521 = vtanh.f32 %v2420_v42  ;;  %v3001_v23 = vsel %vm1170_vm5, %v2677_v47, 0.0 }
 0x326   : > { %v3352_v38 = vsel %vm3248_vm8, %v3351_v4, %v3347_v32  ;;  %v2778_v55 = vpop.xlane.xlu1 %2777  ;;  %v2679_v4 = vmul.f32 %v7882_v18, %v6510_v63  ;;  %v2682_v42 = vmul.f32 %v7882_v18, %v6512_v59 }
 0x327   : > { %v3357_v8 = vsel %vm3255_vm9, %v3356_v12, %v3352_v38  ;;  %v5685_v3 = vpop.f32.mrb[112].mxu0  ;;  %v2422_v38 = vadd.f32 %v8035_v34, %v8099_v14  ;;  %v3371_v27 = vrot.slane %v2778_v55, %v7939_v22 }
 0x328   : > { %v3362_v35 = vsel %vm3262_vm10, %v3361_v26, %v3357_v8  ;;  %v2429_v32 = vadd.f32 %v5685_v3, %v8129_v62  ;;  %2996 = vadd.xlane.f32.xlu0 %v2995_v25  ;;  %3011 = vadd.xlane.f32.xlu1 %v3010_v56  ;;  %v8139_v46 = vpop.f32.mrb[113].mxu0  ;;  %v6514_v26 = vpop.eup %6513  ;;  %v3391_v8 = vrot.slane %v8101_v30, %v7989_v31  ;;  %v3007_v51 = vsel %vm1170_vm5, %v2679_v4, 0.0 }
 0x329   : > { %v2793_v12 = vpop.xlane.xlu0 %2792  ;;  %v3386_v56 = vrot.slane %v8109_v39, %v7998_v2  ;;  %v2426_v39 = vadd.f32 %v8035_v34, %v2171_v10 }
 0x32a   : > { %v2775_v6 = vpop.xlane.xlu1 %2774  ;;  %6523 = vtanh.f32 %v2429_v32 }
 0x32b   : > { %v3366_v63 = vrot.slane %v2775_v6, %v7946_v5  ;;  %v5688_v3 = vpop.f32.mrb[114].mxu0  ;;  %6525 = vtanh.f32 %v2423_v1  ;;  %v2681_v1 = vmul.f32 %v7882_v18, %v6514_v26  ;;  %v3396_v26 = vrot.slane %v2793_v12, %v8029_v16 }
 0x32c   : > { %v6516_v25 = vpop.eup %6515  ;;  %v2431_v59 = vadd.f32 %v5688_v3, %v8129_v62  ;;  %3002 = vadd.xlane.f32.xlu0 %v3001_v23  ;;  %3008 = vadd.xlane.f32.xlu1 %v3007_v51  ;;  %v2191_v14 = vpop.f32.mrb[115].mxu0 }
 0x32d   : > { %v3367_v47 = vsel %vm3269_vm11, %v3366_v63, %v3362_v35  ;;  %v6518_v32 = vpop.eup %6517  ;;  %v2430_v55 = vadd.f32 %v8129_v62, %v2191_v14  ;;  %v2802_v6 = vpop.xlane.xlu0 %2801  ;;  %v2688_v4 = vmul.f32 %v7882_v18, %v6516_v25  ;;  %v3016_v63 = vsel %vm1170_vm5, %v2682_v42, 0.0 }
 0x32e   : > { %v3372_v30 = vsel %vm3276_vm12, %v3371_v27, %v3367_v47  ;;  %v8160_v61 = vpop.xlane.xlu1 %2807  ;;  %6527 = vtanh.f32 %v2431_v59  ;;  %v2687_v51 = vmul.f32 %v7882_v18, %v6518_v32  ;;  %v6520_v47 = vpop.eup %6519  ;;  %v3013_v32 = vsel %vm1170_vm5, %v2681_v1, 0.0 }
 0x32f   : > { %v3377_v35 = vsel %vm3283_vm13, %v3376_v60, %v3372_v30  ;;  %6529 = vtanh.f32 %v2430_v55  ;;  %v3034_v27 = vsel %vm1170_vm5, %v2688_v4, 0.0  ;;  %v5691_v3 = vpop.f32.mrb[116].mxu0  ;;  %v3411_v55 = vrot.slane %v2802_v6, %v8061_v20 }
 0x330   : > { %v3382_v23 = vsel %vm8910_vm14, %v3381_v33, %v3377_v35  ;;  %6531 = vtanh.f32 %v2422_v38  ;;  %3017 = vadd.xlane.f32.xlu1 %v3016_v63  ;;  %3035 = vadd.xlane.f32.xlu0 %v3034_v27  ;;  %v2433_v10 = vadd.f32 %v5691_v3, %v8129_v62  ;;  %v2201_v60 = vpop.f32.mrb[117].mxu0  ;;  %v3401_v33 = vrot.slane %v8127_v9, %v8033_v37  ;;  %v6522_v38 = vpop.eup %6521 }
 0x331   : > { %v3387_v25 = vsel %vm3297_vm15, %v3386_v56, %v3382_v23  ;;  %vm3887_vm14 = vcmask 1041409   ;;  %v2799_v59 = vpop.xlane.xlu0 %2798  ;;  %v2432_v30 = vadd.f32 %v8129_v62, %v2201_v60  ;;  %v3031_v9 = vsel %vm1170_vm5, %v2687_v51, 0.0 }
 0x332   : > { %v3392_v42 = vsel %vm3304_vm0, %v3391_v8, %v3387_v25  ;;  %v2814_v14 = vpop.xlane.xlu1 %2813  ;;  %v3406_v12 = vrot.slane %v2799_v59, %v8057_v19  ;;  %6533 = vtanh.f32 %v2433_v10  ;;  %v2684_v8 = vmul.f32 %v7882_v18, %v6520_v47 }
 0x333   : > { %v3397_v56 = vsel %vm3311_vm1, %v3396_v26, %v3392_v42  ;;  %6535 = vtanh.f32 %v2426_v39  ;;  %v2683_v26 = vmul.f32 %v7882_v18, %v6522_v38  ;;  %v2428_v47 = vadd.f32 %v8129_v62, %v8139_v46 }
 0x334   : > { %v3402_v4 = vsel %vm3318_vm2, %v3401_v33, %v3397_v56  ;;  %v6524_v35 = vpop.eup %6523  ;;  %3014 = vadd.xlane.f32.xlu1 %v3013_v32  ;;  %3032 = vadd.xlane.f32.xlu0 %v3031_v9  ;;  %v5694_v63 = vpop.f32.mrb[118].mxu0  ;;  %6537 = vtanh.f32 %v2432_v30  ;;  %v3022_v33 = vsel %vm1170_vm5, %v2684_v8, 0.0  ;;  %v2427_v32 = vadd.f32 %v8116_v29, %v8035_v34 }
 0x335   : > { %v3407_v1 = vsel %vm3325_vm3, %v3406_v12, %v3402_v4  ;;  %v2805_v27 = vpop.xlane.xlu0 %2804  ;;  %v2692_v25 = vmul.f32 %v7882_v18, %v6524_v35  ;;  %v2435_v6 = vadd.f32 %v5694_v63, %v8129_v62  ;;  %v6526_v51 = vpop.eup %6525  ;;  %v3019_v30 = vsel %vm1170_vm5, %v2683_v26, 0.0 }
 0x336   : > { %v3412_v23 = vsel %vm3332_vm4, %v3411_v55, %v3407_v1  ;;  %v2817_v3 = vpop.xlane.xlu1 %2816  ;;  %v2211_v10 = vpop.f32.mrb[119].mxu0  ;;  %v3416_v60 = vrot.slane %v2805_v27, %v7905_v7  ;;  %v2686_v4 = vmul.f32 %v7882_v18, %v6526_v51  ;;  %v3430_v34 = vrot.slane %v2814_v14, %v7912_v15 }
 0x337   : > { %v8193_v39 = vsel %vm3887_vm14, %v3412_v23, %v8079_v36  ;;  %v3046_v42 = vsel %vm1170_vm5, %v2692_v25, 0.0  ;;  %6539 = vtanh.f32 %v2435_v6  ;;  %v3420_v36 = vrot.slane %v8160_v61, %v7888_v0 }
 0x338   : > { %v6528_v59 = vpop.eup %6527  ;;  %3023 = vadd.xlane.f32.xlu1 %v3022_v33  ;;  %3047 = vadd.xlane.f32.xlu0 %v3046_v42  ;;  %v5697_v46 = vpop.f32.mrb[120].mxu0  ;;  %6541 = vtanh.f32 %v2428_v47  ;;  %v2434_v8 = vadd.f32 %v8129_v62, %v2211_v10  ;;  %v3435_v42 = vrot.slane %v2817_v3, %v7931_v21  ;;  %vm8928_vm14 = vcmask 654912  }
 0x339   : > { %v6530_v38 = vpop.eup %6529  ;;  %v2811_v56 = vpop.xlane.xlu0 %2810  ;;  %v2694_v55 = vmul.f32 %v7882_v18, %v6528_v59  ;;  %v3421_v1 = vsel %vm3234_vm6, %v3420_v36, %v3416_v60  ;;  %v2437_v23 = vadd.f32 %v5697_v46, %v8129_v62  ;;  %6543 = vtanh.f32 %v2427_v32 }
 0x33a   : > { %v2826_v12 = vpop.xlane.xlu1 %2825  ;;  %v6532_v9 = vpop.eup %6531  ;;  %v3425_v29 = vrot.slane %v2811_v56, %v7928_v28  ;;  %v2693_v63 = vmul.f32 %v7882_v18, %v6530_v38  ;;  %6545 = vtanh.f32 %v2434_v8  ;;  %v3028_v46 = vsel %vm1170_vm5, %v2686_v4, 0.0 }
 0x33b   : > { %v2221_v35 = vpop.f32.mrb[121].mxu0  ;;  %v3052_v61 = vsel %vm1170_vm5, %v2694_v55, 0.0  ;;  %v2685_v47 = vmul.f32 %v7882_v18, %v6532_v9  ;;  %6547 = vtanh.f32 %v2437_v23  ;;  %v3450_v8 = vrot.slane %v2826_v12, %v7939_v22 }
 0x33c   : > { %v6534_v27 = vpop.eup %6533  ;;  %v3426_v25 = vsel %vm3241_vm7, %v3425_v29, %v3421_v1  ;;  %3020 = vadd.xlane.f32.xlu1 %v3019_v30  ;;  %3053 = vadd.xlane.f32.xlu0 %v3052_v61  ;;  %v5700_v14 = vpop.f32.mrb[122].mxu0  ;;  %v3049_v38 = vsel %vm1170_vm5, %v2693_v63, 0.0  ;;  %v2436_v1 = vadd.f32 %v8129_v62, %v2221_v35 }
 0x33d   : > { %v3431_v6 = vsel %vm3248_vm8, %v3430_v34, %v3426_v25  ;;  %v2820_v26 = vpop.xlane.xlu0 %2819  ;;  %v2696_v10 = vmul.f32 %v7882_v18, %v6534_v27  ;;  %v2439_v60 = vadd.f32 %v5700_v14, %v8129_v62  ;;  %v6536_v33 = vpop.eup %6535  ;;  %v3025_v3 = vsel %vm1170_vm5, %v2685_v47, 0.0 }
 0x33e   : > { %v8214_v51 = vpop.xlane.xlu1 %2831  ;;  %v2231_v59 = vpop.f32.mrb[123].mxu0  ;;  %v3440_v32 = vrot.slane %v2820_v26, %v7917_v13  ;;  %v3436_v56 = vsel %vm3255_vm9, %v3435_v42, %v3431_v6  ;;  %v2689_v61 = vmul.f32 %v7882_v18, %v6536_v33 }
 0x33f   : > { %v6538_v36 = vpop.eup %6537  ;;  %6549 = vtanh.f32 %v2439_v60  ;;  %v3058_v34 = vsel %vm1170_vm5, %v2696_v10, 0.0  ;;  %v2438_v25 = vadd.f32 %v8129_v62, %v2231_v59  ;;  %v8241_v60 = vld [vmem:[%s8896_s5] ss:$0 sm:$0xff] }
 0x340   : > { %3029 = vadd.xlane.f32.xlu1 %v3028_v46  ;;  %3050 = vadd.xlane.f32.xlu0 %v3049_v38  ;;  %v5703_v30 = vpop.f32.mrb[124].mxu0  ;;  %v3441_v23 = vsel %vm3262_vm10, %v3440_v32, %v3436_v56  ;;  %v2695_v27 = vmul.f32 %v7882_v18, %v6538_v36  ;;  %v3037_v46 = vsel %vm1170_vm5, %v2689_v61, 0.0 }
 0x341   : > { %v2823_v55 = vpop.xlane.xlu0 %2822  ;;  %v6540_v29 = vpop.eup %6539 }
 0x342   : > { %v2829_v9 = vpop.xlane.xlu1 %2828  ;;  %v3445_v4 = vrot.slane %v2823_v55, %v7946_v5  ;;  %v2241_v63 = vpop.f32.mrb[125].mxu0  ;;  %v2698_v18 = vmul.f32 %v8241_v60, %v6540_v29  ;;  %v3055_v38 = vsel %vm1170_vm5, %v2695_v27, 0.0 }
 0x343   : > { %v2440_v14 = vadd.f32 %v8129_v62, %v2241_v63  ;;  %v6542_v6 = vpop.eup %6541  ;;  %v3455_v59 = vrot.slane %v2829_v9, %v7984_v11  ;;  %v3460_v9 = vrot.slane %v8214_v51, %v7981_v17 }
 0x344   : > { %v3446_v26 = vsel %vm3269_vm11, %v3445_v4, %v3441_v23  ;;  %3026 = vadd.xlane.f32.xlu1 %v3025_v3  ;;  %3059 = vadd.xlane.f32.xlu0 %v3058_v34  ;;  %v5706_v12 = vpop.f32.mrb[126].mxu0  ;;  %v6544_v42 = vpop.eup %6543  ;;  %v2691_v36 = vmul.f32 %v8241_v60, %v6542_v6  ;;  %v2441_v3 = vadd.f32 %v5703_v30, %v8129_v62  ;;  %v3064_v4 = vsel %vm1170_vm5, %v2698_v18, 0.0 }
 0x345   : > { %v3451_v47 = vsel %vm3276_vm12, %v3450_v8, %v3446_v26  ;;  %v8236_v10 = vpop.xlane.xlu0 %2855  ;;  %6551 = vtanh.f32 %v2440_v14  ;;  %v2443_v33 = vadd.f32 %v5706_v12, %v8129_v62  ;;  %v2251_v32 = vpop.f32.mrb[127].mxu0  ;;  %v2690_v27 = vmul.f32 %v8241_v60, %v6544_v42 }
 0x346   : > { %v2838_v35 = vpop.xlane.xlu1 %2837  ;;  %6553 = vtanh.f32 %v2436_v1  ;;  %v6546_v56 = vpop.eup %6545  ;;  %v3456_v55 = vsel %vm3283_vm13, %v3455_v59, %v3451_v47  ;;  %v3043_v23 = vsel %vm1170_vm5, %v2691_v36, 0.0  ;;  %v2442_v51 = vadd.f32 %v8129_v62, %v2251_v32 }
 0x347   : > { %6555 = vtanh.f32 %v2438_v25  ;;  %v6548_v34 = vpop.eup %6547  ;;  %v3461_v63 = vsel %vm8928_vm14, %v3460_v9, %v3456_v55  ;;  %v2697_v30 = vmul.f32 %v8241_v60, %v6546_v56  ;;  %v3040_v18 = vsel %vm1170_vm5, %v2690_v27, 0.0 }
 0x348   : > { %3038 = vadd.xlane.f32.xlu1 %v3037_v46  ;;  %3056 = vadd.xlane.f32.xlu0 %v3055_v38  ;;  %6557 = vtanh.f32 %v2443_v33  ;;  %v2700_v26 = vmul.f32 %v8241_v60, %v6548_v34  ;;  %v3470_v46 = vrot.slane %v2838_v35, %v7989_v31  ;;  %vm3889_vm14 = vcmask 1042434  }
 0x349   : > { %v8253_v8 = vpop.xlane.xlu0 %2861  ;;  %v6550_v1 = vpop.eup %6549  ;;  %6559 = vtanh.f32 %v2441_v3  ;;  %v3061_v33 = vsel %vm1170_vm5, %v2697_v30, 0.0 }
 0x34a   : > { %v2835_v29 = vpop.xlane.xlu1 %2834  ;;  %v2702_v12 = vmul.f32 %v8241_v60, %v6550_v1  ;;  %6561 = vtanh.f32 %v2442_v51  ;;  %v3070_v32 = vsel %vm1170_vm5, %v2700_v26, 0.0 }
 0x34b   : > { %v3465_v61 = vrot.slane %v2835_v29, %v7998_v2 }
 0x34c   : > { %3044 = vadd.xlane.f32.xlu1 %v3043_v23  ;;  %3065 = vadd.xlane.f32.xlu0 %v3064_v4  ;;  %v3076_v36 = vsel %vm1170_vm5, %v2702_v12, 0.0 }
 0x34d   : > { %v3466_v25 = vsel %vm3297_vm15, %v3465_v61, %v3461_v63  ;;  %v2859_v6 = vpop.xlane.xlu0 %2858 }
 0x34e   : > { %v2844_v14 = vpop.xlane.xlu1 %2843  ;;  %v3471_v9 = vsel %vm3304_vm0, %v3470_v46, %v3466_v25 }
 0x34f   : > { %v6552_v47 = vpop.eup %6551  ;;  %v3480_v34 = vrot.slane %v2844_v14, %v8033_v37 }
 0x350   : > { %v6554_v42 = vpop.eup %6553  ;;  %3041 = vadd.xlane.f32.xlu1 %v3040_v18  ;;  %3062 = vadd.xlane.f32.xlu0 %v3061_v33  ;;  %v2703_v56 = vmul.f32 %v8241_v60, %v6552_v47 }
 0x351   : > { %v6556_v59 = vpop.eup %6555  ;;  %v8268_v62 = vpop.xlane.xlu0 %2873  ;;  %v2699_v29 = vmul.f32 %v8241_v60, %v6554_v42 }
 0x352   : > { %v2841_v38 = vpop.xlane.xlu1 %2840  ;;  %v6558_v55 = vpop.eup %6557  ;;  %v2701_v63 = vmul.f32 %v8241_v60, %v6556_v59  ;;  %v3079_v23 = vsel %vm1170_vm5, %v2703_v56, 0.0 }
 0x353   : > { %v3475_v3 = vrot.slane %v2841_v38, %v8029_v16  ;;  %v2706_v27 = vmul.f32 %v8241_v60, %v6558_v55  ;;  %v6560_v30 = vpop.eup %6559  ;;  %v3067_v51 = vsel %vm1170_vm5, %v2699_v29, 0.0  ;;  %v3499_v55 = vrot.slane %v8236_v10, %v7888_v0 }
 0x354   : > { %3071 = vadd.xlane.f32.xlu0 %v3070_v32  ;;  %3077 = vadd.xlane.f32.xlu1 %v3076_v36  ;;  %v3073_v26 = vsel %vm1170_vm5, %v2701_v63, 0.0  ;;  %v2704_v12 = vmul.f32 %v8241_v60, %v6560_v30  ;;  %v6562_v18 = vpop.eup %6561  ;;  %v3509_v29 = vrot.slane %v8253_v8, %v7912_v15 }
 0x355   : > { %v3476_v35 = vsel %vm3311_vm1, %v3475_v3, %v3471_v9  ;;  %v2871_v1 = vpop.xlane.xlu0 %2870  ;;  %v3088_v47 = vsel %vm1170_vm5, %v2706_v27, 0.0  ;;  %v2705_v56 = vmul.f32 %v8241_v60, %v6562_v18  ;;  %v3504_v9 = vrot.slane %v2859_v6, %v7928_v28 }
 0x356   : > { %v2850_v4 = vpop.xlane.xlu1 %2849  ;;  %v3481_v61 = vsel %vm3318_vm2, %v3480_v34, %v3476_v35  ;;  %v3082_v36 = vsel %vm1170_vm5, %v2704_v12, 0.0  ;;  %v3524_v8 = vrot.slane %v2871_v1, %v7946_v5 }
 0x357   : > { %v3490_v42 = vrot.slane %v2850_v4, %v8061_v20  ;;  %v3085_v60 = vsel %vm1170_vm5, %v2705_v56, 0.0  ;;  %vm8929_vm5 = vcmask 654912  }
 0x358   : > { %3068 = vadd.xlane.f32.xlu0 %v3067_v51  ;;  %3080 = vadd.xlane.f32.xlu1 %v3079_v23  ;;  %v3529_v51 = vrot.slane %v8268_v62, %v7939_v22 }
 0x359   : > { %v2880_v14 = vpop.xlane.xlu0 %2879 }
 0x35a   : > { %v2847_v25 = vpop.xlane.xlu1 %2846 }
 0x35b   : > { %v3485_v33 = vrot.slane %v2847_v25, %v8057_v19 }
 0x35c   : > { %3074 = vadd.xlane.f32.xlu0 %v3073_v26  ;;  %3089 = vadd.xlane.f32.xlu1 %v3088_v47 }
 0x35d   : > { %v3486_v59 = vsel %vm3325_vm3, %v3485_v33, %v3481_v61  ;;  %v2877_v32 = vpop.xlane.xlu0 %2876  ;;  %v3539_v33 = vrot.slane %v2880_v14, %v7981_v17 }
 0x35e   : > { %v3491_v46 = vsel %vm3332_vm4, %v3490_v42, %v3486_v59  ;;  %v2853_v38 = vpop.xlane.xlu1 %2852  ;;  %v3534_v47 = vrot.slane %v2877_v32, %v7984_v11 }
 0x35f   : > { %v3890_v3 = vsel %vm3889_vm14, %v3491_v46, %v8193_v39  ;;  %v3495_v34 = vrot.slane %v2853_v38, %v7905_v7  ;;  %vm3891_vm14 = vcmask 1043459  }
 0x360   : > { %3083 = vadd.xlane.f32.xlu0 %v3082_v36 }
 0x361   : > { %v3500_v35 = vsel %vm3234_vm6, %v3499_v55, %v3495_v34  ;;  %v2886_v63 = vpop.xlane.xlu0 %2885 }
 0x362   : > { %v3505_v4 = vsel %vm3241_vm7, %v3504_v9, %v3500_v35  ;;  %v2868_v61 = vpop.xlane.xlu1 %2867  ;;  %v3549_v46 = vrot.slane %v2886_v63, %v7989_v31 }
 0x363   : > { %v3510_v10 = vsel %vm3248_vm8, %v3509_v29, %v3505_v4  ;;  %v3519_v6 = vrot.slane %v2868_v61, %v7917_v13 }
 0x364   : > { %3086 = vadd.xlane.f32.xlu0 %v3085_v60 }
 0x365   : > { %v2883_v23 = vpop.xlane.xlu0 %2882 }
 0x366   : > { %v2865_v39 = vpop.xlane.xlu1 %2864  ;;  %v3544_v1 = vrot.slane %v2883_v23, %v7998_v2 }
 0x367   : > { %v3514_v27 = vrot.slane %v2865_v39, %v7931_v21 }
 0x369   : > { %v3515_v30 = vsel %vm3255_vm9, %v3514_v27, %v3510_v10  ;;  %v2892_v26 = vpop.xlane.xlu0 %2891 }
 0x36a   : > { %v3520_v25 = vsel %vm3262_vm10, %v3519_v6, %v3515_v30  ;;  %v2898_v12 = vpop.xlane.xlu1 %2897  ;;  %v3559_v55 = vrot.slane %v2892_v26, %v8033_v37 }
 0x36b   : > { %v3525_v18 = vsel %vm3269_vm11, %v3524_v8, %v3520_v25  ;;  %v3569_v61 = vrot.slane %v2898_v12, %v8061_v20 }
 0x36c   : > { %v3530_v42 = vsel %vm3276_vm12, %v3529_v51, %v3525_v18 }
 0x36d   : > { %v3535_v59 = vsel %vm3283_vm13, %v3534_v47, %v3530_v42  ;;  %v2889_v38 = vpop.xlane.xlu0 %2888 }
 0x36e   : > { %v3540_v62 = vsel %vm8929_vm5, %v3539_v33, %v3535_v59  ;;  %v2901_v36 = vpop.xlane.xlu1 %2900  ;;  %v3554_v32 = vrot.slane %v2889_v38, %v8029_v16 }
 0x36f   : > { %v3545_v56 = vsel %vm3297_vm15, %v3544_v1, %v3540_v62  ;;  %v3574_v23 = vrot.slane %v2901_v36, %v7905_v7 }
 0x370   : > { %v3550_v14 = vsel %vm3304_vm0, %v3549_v46, %v3545_v56 }
 0x371   : > { %v3555_v34 = vsel %vm3311_vm1, %v3554_v32, %v3550_v14  ;;  %v2895_v29 = vpop.xlane.xlu0 %2894 }
 0x372   : > { %v3560_v9 = vsel %vm3318_vm2, %v3559_v55, %v3555_v34  ;;  %v2907_v35 = vpop.xlane.xlu1 %2906  ;;  %v3564_v4 = vrot.slane %v2895_v29, %v8057_v19 }
 0x373   : > { %v3583_v8 = vrot.slane %v2907_v35, %v7928_v28 }
 0x374   : > { %v3565_v63 = vsel %vm3325_vm3, %v3564_v4, %v3560_v9 }
 0x375   : > { %v3570_v60 = vsel %vm3332_vm4, %v3569_v61, %v3565_v63  ;;  %v2904_v10 = vpop.xlane.xlu0 %2903 }
 0x376   : > { %v2916_v39 = vpop.xlane.xlu1 %2915  ;;  %v3892_v27 = vsel %vm3891_vm14, %v3570_v60, %v3890_v3  ;;  %v3578_v6 = vrot.slane %v2904_v10, %v7888_v0  ;;  %vm3893_vm14 = vcmask 1044484  }
 0x377   : > { %v3598_v3 = vrot.slane %v2916_v39, %v7917_v13 }
 0x378   : > { %v3579_v30 = vsel %vm3234_vm6, %v3578_v6, %v3574_v23 }
 0x379   : > { %v2910_v51 = vpop.xlane.xlu0 %2909  ;;  %v3584_v25 = vsel %vm3241_vm7, %v3583_v8, %v3579_v30 }
 0x37a   : > { %v2922_v26 = vpop.xlane.xlu1 %2921  ;;  %v3588_v12 = vrot.slane %v2910_v51, %v7912_v15 }
 0x37b   : > { %v3608_v46 = vrot.slane %v2922_v26, %v7939_v22 }
 0x37c   : > { %v3589_v47 = vsel %vm3248_vm8, %v3588_v12, %v3584_v25 }
 0x37d   : > { %v2913_v18 = vpop.xlane.xlu0 %2912 }
 0x37e   : > { %v2919_v33 = vpop.xlane.xlu1 %2918  ;;  %v3593_v42 = vrot.slane %v2913_v18, %v7931_v21 }
 0x37f   : > { %v3603_v1 = vrot.slane %v2919_v33, %v7946_v5 }
 0x380   : > { %v3594_v59 = vsel %vm3255_vm9, %v3593_v42, %v3589_v47 }
 0x381   : > { %v3599_v62 = vsel %vm3262_vm10, %v3598_v3, %v3594_v59  ;;  %v2946_v36 = vpop.xlane.xlu0 %2945 }
 0x382   : > { %v2928_v38 = vpop.xlane.xlu1 %2927  ;;  %v3604_v56 = vsel %vm3269_vm11, %v3603_v1, %v3599_v62  ;;  %v3648_v33 = vrot.slane %v2946_v36, %v8061_v20 }
 0x383   : > { %v3609_v32 = vsel %vm3276_vm12, %v3608_v46, %v3604_v56  ;;  %v3618_v9 = vrot.slane %v2928_v38, %v7981_v17 }
 0x385   : > { %v2943_v14 = vpop.xlane.xlu0 %2942 }
 0x386   : > { %v2925_v55 = vpop.xlane.xlu1 %2924  ;;  %v3643_v47 = vrot.slane %v2943_v14, %v8057_v19 }
 0x387   : > { %v3613_v34 = vrot.slane %v2925_v55, %v7984_v11 }
 0x389   : > { %v3614_v29 = vsel %vm3283_vm13, %v3613_v34, %v3609_v32  ;;  %v2949_v4 = vpop.xlane.xlu0 %2948 }
 0x38a   : > { %v2934_v35 = vpop.xlane.xlu1 %2933  ;;  %v3619_v61 = vsel %vm8929_vm5, %v3618_v9, %v3614_v29  ;;  %v3653_v1 = vrot.slane %v2949_v4, %v7905_v7 }
 0x38b   : > { %v3628_v39 = vrot.slane %v2934_v35, %v7989_v31 }
 0x38d   : > { %v2964_v60 = vpop.xlane.xlu0 %2963 }
 0x38e   : > { %v2931_v63 = vpop.xlane.xlu1 %2930 }
 0x38f   : > { %v3623_v10 = vrot.slane %v2931_v63, %v7998_v2 }
 0x391   : > { %v3624_v23 = vsel %vm3297_vm15, %v3623_v10, %v3619_v61  ;;  %v2961_v8 = vpop.xlane.xlu0 %2960  ;;  %v3677_v61 = vrot.slane %v2964_v60, %v7917_v13 }
 0x392   : > { %v2940_v6 = vpop.xlane.xlu1 %2939  ;;  %v3629_v30 = vsel %vm3304_vm0, %v3628_v39, %v3624_v23  ;;  %v3672_v35 = vrot.slane %v2961_v8, %v7931_v21 }
 0x393   : > { %v3638_v12 = vrot.slane %v2940_v6, %v8033_v37 }
 0x395   : > { %v2970_v25 = vpop.xlane.xlu0 %2969 }
 0x396   : > { %v2937_v51 = vpop.xlane.xlu1 %2936  ;;  %v3687_v6 = vrot.slane %v2970_v25, %v7939_v22 }
 0x397   : > { %v3633_v26 = vrot.slane %v2937_v51, %v8029_v16 }
 0x399   : > { %v3634_v18 = vsel %vm3311_vm1, %v3633_v26, %v3629_v30  ;;  %v2967_v59 = vpop.xlane.xlu0 %2966 }
 0x39a   : > { %v3639_v42 = vsel %vm3318_vm2, %v3638_v12, %v3634_v18  ;;  %v2952_v3 = vpop.xlane.xlu1 %2951 }
 0x39b   : > { %v3644_v46 = vsel %vm3325_vm3, %v3643_v47, %v3639_v42  ;;  %v3657_v62 = vrot.slane %v2952_v3, %v7888_v0 }
 0x39c   : > { %v3649_v38 = vsel %vm3332_vm4, %v3648_v33, %v3644_v46 }
 0x39d   : > { %v3658_v56 = vsel %vm3234_vm6, %v3657_v62, %v3653_v1  ;;  %v3894_v32 = vsel %vm3893_vm14, %v3649_v38, %v3892_v27  ;;  %v2976_v14 = vpop.xlane.xlu0 %2975  ;;  %v3682_v27 = vrot.slane %v2967_v59, %v7946_v5  ;;  %vm3895_vm14 = vcmask 1045509  }
 0x39e   : > { %v2958_v55 = vpop.xlane.xlu1 %2957  ;;  %v3697_v26 = vrot.slane %v2976_v14, %v7981_v17 }
 0x39f   : > { %v3667_v29 = vrot.slane %v2958_v55, %v7912_v15 }
 0x3a1   : > { %v2973_v36 = vpop.xlane.xlu0 %2972 }
 0x3a2   : > { %v2955_v34 = vpop.xlane.xlu1 %2954  ;;  %v3692_v8 = vrot.slane %v2973_v36, %v7984_v11 }
 0x3a3   : > { %v3662_v9 = vrot.slane %v2955_v34, %v7928_v28 }
 0x3a5   : > { %v3663_v4 = vsel %vm3241_vm7, %v3662_v9, %v3658_v56  ;;  %v2982_v10 = vpop.xlane.xlu0 %2981 }
 0x3a6   : > { %v3668_v63 = vsel %vm3248_vm8, %v3667_v29, %v3663_v4  ;;  %v2988_v39 = vpop.xlane.xlu1 %2987  ;;  %v3707_v42 = vrot.slane %v2982_v10, %v7989_v31 }
 0x3a7   : > { %v3673_v23 = vsel %vm3255_vm9, %v3672_v35, %v3668_v63  ;;  %v3717_v38 = vrot.slane %v2988_v39, %v8033_v37 }
 0x3a8   : > { %v3678_v30 = vsel %vm3262_vm10, %v3677_v61, %v3673_v23 }
 0x3a9   : > { %v3683_v51 = vsel %vm3269_vm11, %v3682_v27, %v3678_v30  ;;  %v2979_v12 = vpop.xlane.xlu0 %2978 }
 0x3aa   : > { %v3688_v60 = vsel %vm3276_vm12, %v3687_v6, %v3683_v51  ;;  %v2991_v47 = vpop.xlane.xlu1 %2990  ;;  %v3702_v33 = vrot.slane %v2979_v12, %v7998_v2 }
 0x3ab   : > { %v3693_v18 = vsel %vm3283_vm13, %v3692_v8, %v3688_v60  ;;  %v3722_v56 = vrot.slane %v2991_v47, %v8057_v19 }
 0x3ac   : > { %v3698_v25 = vsel %vm8929_vm5, %v3697_v26, %v3693_v18 }
 0x3ad   : > { %v3703_v3 = vsel %vm3297_vm15, %v3702_v33, %v3698_v25  ;;  %v2985_v1 = vpop.xlane.xlu0 %2984 }
 0x3ae   : > { %v3708_v59 = vsel %vm3304_vm0, %v3707_v42, %v3703_v3  ;;  %v3000_v46 = vpop.xlane.xlu1 %2999  ;;  %v3712_v62 = vrot.slane %v2985_v1, %v8029_v16 }
 0x3b0   : > { %v3713_v55 = vsel %vm3311_vm1, %v3712_v62, %v3708_v59 }
 0x3b1   : > { %v3718_v14 = vsel %vm3318_vm2, %v3717_v38, %v3713_v55  ;;  %v2994_v34 = vpop.xlane.xlu0 %2993 }
 0x3b2   : > { %v3006_v36 = vpop.xlane.xlu1 %3005  ;;  %v3723_v9 = vsel %vm3325_vm3, %v3722_v56, %v3718_v14  ;;  %v3727_v29 = vrot.slane %v2994_v34, %v8061_v20 }
 0x3b3   : > { %v3746_v1 = vrot.slane %v3006_v36, %v7912_v15 }
 0x3b4   : > { %v3728_v35 = vsel %vm3332_vm4, %v3727_v29, %v3723_v9 }
 0x3b5   : > { %v2997_v4 = vpop.xlane.xlu0 %2996  ;;  %v8390_v63 = vsel %vm3895_vm14, %v3728_v35, %v3894_v32  ;;  %v3736_v32 = vrot.slane %v3000_v46, %v7888_v0 }
 0x3b6   : > { %v3012_v61 = vpop.xlane.xlu1 %3011  ;;  %v3732_v18 = vrot.slane %v2997_v4, %v7905_v7 }
 0x3b7   : > { %v3756_v29 = vrot.slane %v3012_v61, %v7917_v13 }
 0x3b8   : > { %v3737_v3 = vsel %vm3234_vm6, %v3736_v32, %v3732_v18 }
 0x3b9   : > { %v3003_v10 = vpop.xlane.xlu0 %3002 }
 0x3ba   : > { %v3009_v39 = vpop.xlane.xlu1 %3008  ;;  %v3741_v33 = vrot.slane %v3003_v10, %v7928_v28 }
 0x3bb   : > { %v3751_v55 = vrot.slane %v3009_v39, %v7931_v21 }
 0x3bc   : > { %v3742_v59 = vsel %vm3241_vm7, %v3741_v33, %v3737_v3 }
 0x3bd   : > { %v8392_v23 = vpop.xlane.xlu0 %3035  ;;  %v3747_v56 = vsel %vm3248_vm8, %v3746_v1, %v3742_v59 }
 0x3be   : > { %v3018_v27 = vpop.xlane.xlu1 %3017  ;;  %v3752_v14 = vsel %vm3255_vm9, %v3751_v55, %v3747_v56 }
 0x3bf   : > { %v3757_v10 = vsel %vm3262_vm10, %v3756_v29, %v3752_v14 }
 0x3c1   : > { %v8394_v30 = vpop.xlane.xlu0 %3032 }
 0x3c2   : > { %v3015_v6 = vpop.xlane.xlu1 %3014  ;;  %v3791_v29 = vrot.slane %v8394_v30, %v8029_v16 }
 0x3c3   : > { %v3761_v34 = vrot.slane %v3015_v6, %v7946_v5 }
 0x3c5   : > { %v3048_v8 = vpop.xlane.xlu0 %3047  ;;  %v3762_v33 = vsel %vm3269_vm11, %v3761_v34, %v3757_v10  ;;  %v3796_v10 = vrot.slane %v8392_v23, %v8033_v37 }
 0x3c6   : > { %v3024_v51 = vpop.xlane.xlu1 %3023  ;;  %v3815_v35 = vrot.slane %v3048_v8, %v7888_v0  ;;  %v3766_v0 = vrot.slane %v3018_v27, %v7939_v22 }
 0x3c7   : > { %v3776_v27 = vrot.slane %v3024_v51, %v7981_v17 }
 0x3c9   : > { %v3054_v60 = vpop.xlane.xlu0 %3053 }
 0x3ca   : > { %v3021_v26 = vpop.xlane.xlu1 %3020  ;;  %v3825_v18 = vrot.slane %v3054_v60, %v7912_v15  ;;  %v3767_v60 = vsel %vm3276_vm12, %v3766_v0, %v3762_v33  ;;  %v3094_v33 = vstv %s5213_s13 }
 0x3cb   : > { %v3771_v6 = vrot.slane %v3021_v26, %v7984_v11 }
 0x3cd   : > { %v3051_v47 = vpop.xlane.xlu0 %3050  ;;  %v3772_v26 = vsel %vm3283_vm13, %v3771_v6, %v3767_v60 }
 0x3ce   : > { %v3030_v12 = vpop.xlane.xlu1 %3029  ;;  %v3820_v36 = vrot.slane %v3051_v47, %v7928_v28 }
 0x3cf   : > { %v3786_v14 = vrot.slane %v3030_v12, %v7989_v31 }
 0x3d1   : > { %v3060_v25 = vpop.xlane.xlu0 %3059 }
 0x3d2   : > { %v3027_v42 = vpop.xlane.xlu1 %3026  ;;  %v3835_v28 = vrot.slane %v3060_v25, %v7917_v13 }
 0x3d5   : > { %v3057_v38 = vpop.xlane.xlu0 %3056 }
 0x3d6   : > { %v8402_v62 = vpop.xlane.xlu1 %3038  ;;  %v3830_v32 = vrot.slane %v3057_v38, %v7931_v21  ;;  %v3781_v21 = vrot.slane %v3027_v42, %v7998_v2 }
 0x3d9   : > { %v3066_v9 = vpop.xlane.xlu0 %3065 }
 0x3da   : > { %v3045_v46 = vpop.xlane.xlu1 %3044  ;;  %v3845_v55 = vrot.slane %v3066_v9, %v7939_v22 }
 0x3db   : > { %v3811_v4 = vrot.slane %v3045_v46, %v7905_v7 }
 0x3dd   : > { %v3816_v39 = vsel %vm3234_vm6, %v3815_v35, %v3811_v4  ;;  %v3063_v3 = vpop.xlane.xlu0 %3062  ;;  %vm8930_vm6 = vmmov %vm8929_vm5 }
 0x3de   : > { %v3821_v61 = vsel %vm3241_vm7, %v3820_v36, %v3816_v39  ;;  %v3042_v8 = vpop.xlane.xlu1 %3041  ;;  %v3840_v47 = vrot.slane %v3063_v3, %v7946_v5  ;;  %v3777_v13 = vsel %vm8930_vm6, %v3776_v27, %v3772_v26  ;;  %vm8931_vm7 = vmmov %vm8929_vm5  ;;  %v3095_v3 = vadd.s32 %v3094_v33, %v7862_v40  ;;  %v6572_v27 = vld [vmem:[%s7269_s1 + $0x18] sm:$0xff] }
 0x3df   : > { %v3826_v7 = vsel %vm3248_vm8, %v3825_v18, %v3821_v61  ;;  %v3782_v56 = vsel %vm3297_vm15, %v3781_v21, %v3777_v13  ;;  %vm3897_vm8 = vcmask 1046534   ;;  %v6570_v21 = vld [vmem:[%s7269_s1 + $0x8] sm:$0xff]  ;;  %v6573_v13 = vld [vmem:[%s7269_s1 + $0x20] sm:$0xff] }
 0x3e0   : > { %v3831_v15 = vsel %vm3255_vm9, %v3830_v32, %v3826_v7  ;;  %v3787_v46 = vsel %vm3304_vm0, %v3786_v14, %v3782_v56  ;;  %vm3899_vm9 = vcmask 1047559  }
 0x3e1   : > { %v3836_v59 = vsel %vm3262_vm10, %v3835_v28, %v3831_v15  ;;  %v3072_v1 = vpop.xlane.xlu0 %3071  ;;  %v3792_v12 = vsel %vm3311_vm1, %v3791_v29, %v3787_v46  ;;  %vm3096_vm10 = vcmp.lt.s32.totalorder %v3095_v3, 320 }
 0x3e2   : > { %v3078_v38 = vpop.xlane.xlu1 %3077  ;;  %v3841_v25 = vsel %vm3269_vm11, %v3840_v47, %v3836_v59  ;;  %v3855_v35 = vrot.slane %v3072_v1, %v7981_v17  ;;  %v3801_v17 = vrot.slane %v8402_v62, %v8057_v19  ;;  %v3797_v6 = vsel %vm3318_vm2, %v3796_v10, %v3792_v12 }
 0x3e3   : > { %v3846_v34 = vsel %vm3276_vm12, %v3845_v55, %v3841_v25  ;;  %v6842_v1 = vmov 0.0|0.0   ;;  %v6574_v25 = vld [vmem:[%s7269_s1 + $0x28] sm:$0xff]  ;;  %v6575_v55 = vld [vmem:[%s7269_s1 + $0x30] sm:$0xff]  ;;  %vm3923_vm11 = vcmask 7168   ;;  %vm6844_vm12 = vmmov 0  }
 0x3e4   : > { %6001 = vmatprep.subr.bf16.mxu1 %v6842_v1  ;;  %v6008_v56 = vpack.c.bf16 %v6574_v25, %v6573_v13 }
 0x3e5   : > { %v3069_v5 = vpop.xlane.xlu0 %3068 }
 0x3e6   : > { %v3850_v42 = vrot.slane %v3069_v5, %v7984_v11  ;;  %v3081_v36 = vpop.xlane.xlu1 %3080  ;;  %v3865_v11 = vrot.slane %v3078_v38, %v7989_v31  ;;  %v3806_v31 = vrot.slane %v3042_v8, %v8061_v20  ;;  %v6576_v5 = vld [vmem:[%s7269_s1 + $0x38] sm:$0xff] }
 0x3e7   : > { %v3870_v30 = vrot.slane %v3081_v36, %v8029_v16  ;;  %v3802_v16 = vsel %vm3325_vm3, %v3801_v17, %v3797_v6  ;;  %v6011_v14 = vpack.c.bf16 %v6576_v5, %v6575_v55  ;;  %v6582_v17 = vld [vmem:[%s7269_s1 + $0x68] sm:$0xff]  ;;  %v6583_v6 = vld [vmem:[%s7269_s1 + $0x70] sm:$0xff]  ;;  %v8934_v55 = vpack.c.bf16 %v7344_v49, %v7341_v48  ;;  %v8939_v48 = vld [vmem:[#allocation20_spill] sm:$0xff] }
 0x3e8   : > { %v3851_v51 = vsel %vm3283_vm13, %v3850_v42, %v3846_v34  ;;  %v3807_v62 = vsel %vm3332_vm4, %v3806_v31, %v3802_v16  ;;  %v3903_v42 = vld [vmem:[#allocation3] sm:$0xff]  ;;  %v6584_v31 = vld [vmem:[%s7269_s1 + $0x78] sm:$0xff] }
 0x3e9   : > { %v3075_v4 = vpop.xlane.xlu0 %3074  ;;  %v3856_v9 = vsel %vm8931_vm7, %v3855_v35, %v3851_v51  ;;  %v3898_v60 = vsel %vm3897_vm8, %v3807_v62, %v8390_v63  ;;  %v6571_v63 = vld [vmem:[%s7269_s1 + $0x10] sm:$0xff]  ;;  %v6577_v35 = vld [vmem:[%s7269_s1 + $0x40] sm:$0xff]  ;;  %v6586_v5 = vld [vmem:[%s7269_s1 + $0x118] sm:$0xff] }
 0x3ea   : > { %v3860_v22 = vrot.slane %v3075_v4, %v7998_v2  ;;  %v3090_v61 = vpop.xlane.xlu1 %3089  ;;  %v6005_v38 = vpack.c.bf16 %v6572_v27, %v6571_v63  ;;  %v6578_v4 = vld [vmem:[%s7269_s1 + $0x48] sm:$0xff] }
 0x3eb   : > { %v3885_v8 = vrot.slane %v3090_v61, %v8061_v20  ;;  %v6569_v20 = vld [vmem:[%s7269_s1] sm:$0xff]  ;;  %v6014_v36 = vpack.c.bf16 %v6578_v4, %v6577_v35  ;;  %v6845_v61 = vmov 0.0   ;;  %v6589_v4 = vld [vmem:[%s7269_s1 + $0x130] sm:$0xff] }
 0x3ec   : > { %v3861_v18 = vsel %vm3297_vm15, %v3860_v22, %v3856_v9  ;;  %v6002_v59 = vpack.c.bf16 %v6570_v21, %v6569_v20  ;;  %v6843_v22 = vmov 1966171168   ;;  %v6580_v9 = vld [vmem:[%s7269_s1 + $0x58] sm:$0xff]  ;;  %5739 = vmatprep.mubr.msk.f32.mxu1 %vm6844_vm12, %v6845_v61  ;;  %v4691_v20 = vstv %s6818_s29 }
 0x3ed   : > { %v3866_v39 = vsel %vm3304_vm0, %v3865_v11, %v3861_v18  ;;  %v3084_v2 = vpop.xlane.xlu0 %3083  ;;  %v3928_v12 = vunpack.c.l.s4 %v6843_v22  ;;  %v6579_v11 = vld [vmem:[%s7269_s1 + $0x50] sm:$0xff]  ;;  %vm4692_vm13 = vcmp.eq.s32.totalorder %v7862_v40, %v4691_v20  ;;  %v4693_v21 = vld [vmem:[#allocation6] sm:$0xff]  ;;  %vm4695_vm15 = vcmask 23552  }
 0x3ee   : > { %v3875_v32 = vrot.slane %v3084_v2, %v8033_v37  ;;  %v3871_v23 = vsel %vm3311_vm1, %v3870_v30, %v3866_v39  ;;  %6003 = vmatpush3.bf16.msra.mxu1 %v6002_v59  ;;  %v6017_v10 = vpack.c.bf16 %v6580_v9, %v6579_v11  ;;  %v6581_v30 = vld [vmem:[%s7269_s1 + $0x60] sm:$0xff]  ;;  %v6592_v11 = vld [vmem:[%s7269_s1 + $0x148] sm:$0xff]  ;;  %vm4681_vm0 = vcmask 253952  }
 0x3ef   : > { %6004 = vmatprep.subr.bf16.mxu1 %v6842_v1  ;;  %v3929_v18 = vunpack.c.0.s8 %v3928_v12  ;;  %v6020_v39 = vpack.c.bf16 %v6582_v17, %v6581_v30  ;;  %v6591_v12 = vld [vmem:[%s7269_s1 + $0x140] sm:$0xff] }
 0x3f0   : > { %v3876_v28 = vsel %vm3318_vm2, %v3875_v32, %v3871_v23  ;;  %v6023_v32 = vpack.c.bf16 %v6584_v31, %v6583_v6  ;;  %v6062_v9 = vpack.c.bf16 %v6592_v11, %v6591_v12  ;;  %v6595_v17 = vld [vmem:[%s7269_s1 + $0x160] sm:$0xff]  ;;  %v6597_v31 = vld [vmem:[%s7269_s1 + $0x170] sm:$0xff] }
 0x3f1   : > { %v3087_v0 = vpop.xlane.xlu0 %3086  ;;  %v8494_v2 = vsub.s32 %v3929_v18, %v7873_v24  ;;  %v6594_v18 = vld [vmem:[%s7269_s1 + $0x158] sm:$0xff] }
 0x3f2   : > { %v3880_v7 = vrot.slane %v3087_v0, %v8057_v19  ;;  %v6841_v19 = vmov 0   ;;  %6006 = vmatpush3.bf16.msra.mxu1 %v6005_v38 }
 0x3f3   : > { %6305 = vset.pattern.permute.xlu1 %v6841_v19  ;;  %6306 = vset.pattern.permute.xlu0 %v6841_v19 }
 0x3f4   : > { %v3881_v37 = vsel %vm3325_vm3, %v3880_v7, %v3876_v28  ;;  %6007 = vmatprep.subr.bf16.mxu1 %v6842_v1 }
 0x3f5   : > { %v3886_v15 = vsel %vm3332_vm4, %v3885_v8, %v3881_v37 }
 0x3f6   : > { %v3900_v47 = vsel %vm3899_vm9, %v3886_v15, %v3898_v60  ;;  %6009 = vmatpush3.bf16.msra.mxu1 %v6008_v56  ;;  %v8933_v56 = vpack.c.bf16 %v7334_v45, %v7331_v44  ;;  %v8937_v44 = vpack.c.bf16 %v7368_v58, %v7365_v57  ;;  %v8938_v45 = vld [vmem:[#allocation21_spill] sm:$0xff]  ;;  %v6585_v58 = vld [vmem:[%s7269_s1 + $0x110] sm:$0xff] }
 0x3f7   : > { %v8468_v26 = vsel %vm3096_vm10, %v3900_v47, -inf  ;;  %6010 = vmatprep.subr.bf16.mxu1 %v6842_v1  ;;  %v8940_v49 = vpack.c.bf16 %v8938_v45, %v8939_v48  ;;  %v6616_v45 = vld [vmem:[%s7269_s1 + $0x208] sm:$0xff] }
 0x3f8   : > { %3904 = vmax.xlane.f32.xlu0 %v8468_v26 }
 0x3fa   : > { %6012 = vmatpush3.bf16.msra.mxu1 %v6011_v14  ;;  %v6053_v14 = vpack.c.bf16 %v6586_v5, %v6585_v58  ;;  %v6620_v58 = vld [vmem:[%s7269_s1 + $0x228] sm:$0xff] }
 0x3fb   : > { %6013 = vmatprep.subr.bf16.mxu1 %v6842_v1 }
 0x3fe   : > { %6015 = vmatpush3.bf16.msra.mxu1 %v6014_v36  ;;  %v6590_v36 = vld [vmem:[%s7269_s1 + $0x138] sm:$0xff] }
 0x3ff   : > { %6016 = vmatprep.subr.bf16.mxu1 %v6842_v1  ;;  %v6059_v22 = vpack.c.bf16 %v6590_v36, %v6589_v4  ;;  %v6627_v36 = vld [vmem:[%s7269_s1 + $0x260] sm:$0xff] }
 0x402   : > { %6018 = vmatpush3.bf16.msra.mxu1 %v6017_v10  ;;  %v6593_v10 = vld [vmem:[%s7269_s1 + $0x150] sm:$0xff] }
 0x403   : > { %6019 = vmatprep.subr.bf16.mxu1 %v6842_v1  ;;  %v6065_v30 = vpack.c.bf16 %v6594_v18, %v6593_v10  ;;  %v6630_v10 = vld [vmem:[%s7269_s1 + $0x278] sm:$0xff] }
 0x406   : > { %6021 = vmatpush3.bf16.msra.mxu1 %v6020_v39  ;;  %v6596_v39 = vld [vmem:[%s7269_s1 + $0x168] sm:$0xff] }
 0x407   : > { %6022 = vmatprep.subr.bf16.mxu1 %v6842_v1  ;;  %v6068_v6 = vpack.c.bf16 %v6596_v39, %v6595_v17  ;;  %v6631_v17 = vld [vmem:[%s7269_s1 + $0x280] sm:$0xff]  ;;  %v6632_v39 = vld [vmem:[%s7269_s1 + $0x288] sm:$0xff] }
 0x40a   : > { %6024 = vmatpush3.bf16.msra.mxu1 %v6023_v32  ;;  %v6598_v32 = vld [vmem:[%s7269_s1 + $0x178] sm:$0xff] }
 0x40b   : > { %6025 = vmatprep.subr.bf16.mxu1 %v6842_v1 }
 0x485   : > { %v3905_v34 = vpop.xlane.xlu0 %3904 }
 0x486   : > { %v3906_v46 = vmax.f32 %v3903_v42, %v3905_v34  ;;  %v8945_v34 = vld [vmem:[#allocation24_spill] sm:$0xff] }
 0x488   : > { %v3907_v51 = vsub.f32 %v3903_v42, %v3906_v46  ;;  %4690 = vst.msk [vmem:[#allocation3] sm:$0xff] %vm3923_vm11, %v3906_v46  ;;  %3912 = vperm.xlu1 %6305, %v3906_v46   ;;  %v8944_v42 = vld [vmem:[#allocation25_spill] sm:$0xff] }
 0x489   : > { %v8946_v46 = vpack.c.bf16 %v8944_v42, %v8945_v34  ;;  %v6623_v34 = vld [vmem:[%s7269_s1 + $0x240] sm:$0xff] }
 0x48a   : > { %v3908_v29 = vmul.f32 1.442695, %v3907_v51  ;;  %v6587_v51 = vld [vmem:[%s7269_s1 + $0x120] sm:$0xff] }
 0x48c   : > { %6563 = vpow2.f32 %v3908_v29  ;;  %v6588_v29 = vld [vmem:[%s7269_s1 + $0x128] sm:$0xff] }
 0x48d   : > { %v6056_v35 = vpack.c.bf16 %v6588_v29, %v6587_v51  ;;  %v6625_v29 = vld [vmem:[%s7269_s1 + $0x250] sm:$0xff] }
 0x496   : > { %v8497_v33 = vpop.eup %6563 }
 0x497   : > { %v4551_v23 = vrot.slane %v8497_v33, %v8494_v2  ;;  %v4544_v7 = vcombine.high %v8497_v33, %v8497_v33 }
 0x499   : > { %v4559_v3 = vcombine.high %v4551_v23, %v4551_v23  ;;  %v4567_v0 = vrot.slane %v4551_v23, %v8494_v2  ;;  %v4558_v8 = vrot.slane %v4544_v7, %v8494_v2  ;;  %v6071_v23 = vpack.c.bf16 %v6598_v32, %v6597_v31  ;;  %v6601_v7 = vld [vmem:[%s7269_s1 + $0x190] sm:$0xff]  ;;  %v6634_v32 = vld [vmem:[%s7269_s1 + $0x298] sm:$0xff] }
 0x49b   : > { %v4581_v16 = vrot.slane %v4559_v3, %v8494_v2  ;;  %v4589_v62 = vcombine.high %v4567_v0, %v4567_v0  ;;  %v4574_v37 = vrot.slane %v4558_v8, %v8494_v2  ;;  %v4560_v15 = vcombine.high %v4558_v8, %v4558_v8  ;;  %v6599_v3 = vld [vmem:[%s7269_s1 + $0x180] sm:$0xff] }
 0x49d   : > { %4610 = vperm.xlu1 %6305, %v4581_v16   ;;  %v4591_v28 = vcombine.high %v4581_v16, %v4581_v16  ;;  %v4588_v60 = vrot.slane %v4560_v15, %v8494_v2  ;;  %v4590_v47 = vcombine.high %v4574_v37, %v4574_v37  ;;  %v6600_v16 = vld [vmem:[%s7269_s1 + $0x188] sm:$0xff] }
 0x49e   : > { %v6604_v15 = vld [vmem:[%s7269_s1 + $0x1a8] sm:$0xff] }
 0x49f   : > { %v4592_v19 = vcombine.high %v4588_v60, %v4588_v60 }
 0x4a1   : > { %4618 = vperm.xlu1 %6305, %v4589_v62  }
 0x4a5   : > { %4626 = vperm.xlu1 %6305, %v4591_v28   ;;  %v6602_v28 = vld [vmem:[%s7269_s1 + $0x198] sm:$0xff] }
 0x4a6   : > { %v6077_v8 = vpack.c.bf16 %v6602_v28, %v6601_v7  ;;  %v6637_v28 = vld [vmem:[%s7269_s1 + $0x2b0] sm:$0xff] }
 0x4a9   : > { %4634 = vperm.xlu1 %6305, %v4574_v37   ;;  %v6603_v37 = vld [vmem:[%s7269_s1 + $0x1a0] sm:$0xff] }
 0x4ad   : > { %4642 = vperm.xlu1 %6305, %v4588_v60   ;;  %v6080_v60 = vpack.c.bf16 %v6604_v15, %v6603_v37 }
 0x4b1   : > { %4650 = vperm.xlu1 %6305, %v4590_v47   ;;  %v6605_v47 = vld [vmem:[%s7269_s1 + $0x1b0] sm:$0xff] }
 0x4b5   : > { %4658 = vperm.xlu1 %6305, %v4592_v19   ;;  %v6606_v19 = vld [vmem:[%s7269_s1 + $0x1b8] sm:$0xff] }
 0x4b6   : > { %v6083_v20 = vpack.c.bf16 %v6606_v19, %v6605_v47  ;;  %v6639_v47 = vld [vmem:[%s7269_s1 + $0x2c0] sm:$0xff]  ;;  %v6640_v19 = vld [vmem:[%s7269_s1 + $0x2c8] sm:$0xff] }
 0x507   : > { %v3913_v59 = vpop.permute.xlu1 %3912 }
 0x508   : > { %v3915_v63 = vsub.f32 %v8468_v26, %v3913_v59  ;;  %v4694_v27 = vsel %vm4692_vm13, %v3913_v59, %v4693_v21  ;;  %v8932_v26 = vpack.c.bf16 %v7328_v43, %v7324_v41  ;;  %v8935_v41 = vpack.c.bf16 %v7352_v52, %v7347_v50  ;;  %v8941_v52 = vld [vmem:[#allocation23_spill] sm:$0xff]  ;;  %v6607_v21 = vld [vmem:[%s7269_s1 + $0x1c0] sm:$0xff]  ;;  %v6608_v59 = vld [vmem:[%s7269_s1 + $0x1c8] sm:$0xff] }
 0x509   : > { %4696 = vst.msk [vmem:[#allocation6] sm:$0xff] %vm4695_vm15, %v4694_v27  ;;  %v8936_v43 = vpack.c.bf16 %v7358_v54, %v7355_v53  ;;  %v8942_v53 = vld [vmem:[#allocation22_spill] sm:$0xff] }
 0x50a   : > { %v3916_v38 = vmul.f32 1.442695, %v3915_v63  ;;  %v8943_v54 = vpack.c.bf16 %v8941_v52, %v8942_v53  ;;  %v6086_v63 = vpack.c.bf16 %v6608_v59, %v6607_v21  ;;  %v6609_v27 = vld [vmem:[%s7269_s1 + $0x1d0] sm:$0xff]  ;;  %v6618_v52 = vld [vmem:[%s7269_s1 + $0x218] sm:$0xff] }
 0x50b   : > { %v6642_v21 = vld [vmem:[%s7269_s1 + $0x2d8] sm:$0xff] }
 0x50c   : > { %6565 = vpow2.f32 %v3916_v38  ;;  %v6610_v38 = vld [vmem:[%s7269_s1 + $0x1d8] sm:$0xff] }
 0x516   : > { %v8519_v13 = vpop.eup %6565 }
 0x517   : > { %4701 = vst [vmem:[%s4700_s21] sm:$0xff] %v8519_v13  ;;  %3920 = vadd.xlane.f32.xlu0 %v8519_v13  ;;  %v3933_v40 = vrot.slane %v8519_v13, %v8494_v2  ;;  %v3926_v11 = vcombine.high %v8519_v13, %v8519_v13  ;;  %v6633_v13 = vld [vmem:[%s7269_s1 + $0x290] sm:$0xff] }
 0x519   : > { %v8526_v25 = vrot.slane %v3933_v40, %v8494_v2  ;;  %v3941_v50 = vcombine.high %v3933_v40, %v3933_v40  ;;  %v6089_v40 = vpack.c.bf16 %v6610_v38, %v6609_v27  ;;  %v6644_v27 = vld [vmem:[%s7269_s1 + $0x2e8] sm:$0xff] }
 0x51b   : > { %5740 = vmatmul.mubr.f32.vlgmr.msra.gmra.mrb[0].mxu1 %v8526_v25  ;;  %v8563_v57 = vrot.slane %v3941_v50, %v8494_v2  ;;  %v3971_v62 = vcombine.high %v8526_v25, %v8526_v25  ;;  %v6611_v25 = vld [vmem:[%s7269_s1 + $0x1e0] sm:$0xff]  ;;  %v6617_v50 = vld [vmem:[%s7269_s1 + $0x210] sm:$0xff] }
 0x51c   : > { %6027 = vmatpush3.bf16.msra.mxu1 %v8932_v26  ;;  %5774 = vmatprep.mubr.msk.f32.mxu1 %vm6844_vm12, %v6845_v61  ;;  %v6612_v26 = vld [vmem:[%s7269_s1 + $0x1e8] sm:$0xff]  ;;  %v6101_v53 = vpack.c.bf16 %v6618_v52, %v6617_v50  ;;  %v6651_v50 = vld [vmem:[%s7269_s1 + $0x320] sm:$0xff] }
 0x51d   : > { %6028 = vmatprep.subr.bf16.mxu1 %v6842_v1  ;;  %v6652_v52 = vld [vmem:[%s7269_s1 + $0x328] sm:$0xff] }
 0x520   : > { %6030 = vmatpush3.bf16.msra.mxu1 %v8933_v56  ;;  %v6092_v56 = vpack.c.bf16 %v6612_v26, %v6611_v25  ;;  %v6646_v25 = vld [vmem:[%s7269_s1 + $0x2f8] sm:$0xff] }
 0x521   : > { %6031 = vmatprep.subr.bf16.mxu1 %v6842_v1 }
 0x524   : > { %6033 = vmatpush3.bf16.msra.mxu1 %v8934_v55  ;;  %v6613_v55 = vld [vmem:[%s7269_s1 + $0x1f0] sm:$0xff] }
 0x525   : > { %6034 = vmatprep.subr.bf16.mxu1 %v6842_v1 }
 0x528   : > { %6036 = vmatpush3.bf16.msra.mxu1 %v8935_v41  ;;  %v6614_v41 = vld [vmem:[%s7269_s1 + $0x1f8] sm:$0xff] }
 0x529   : > { %6037 = vmatprep.subr.bf16.mxu1 %v6842_v1 }
 0x52c   : > { %6039 = vmatpush3.bf16.msra.mxu1 %v8936_v43  ;;  %v6095_v43 = vpack.c.bf16 %v6614_v41, %v6613_v55  ;;  %v6647_v55 = vld [vmem:[%s7269_s1 + $0x300] sm:$0xff]  ;;  %v6648_v41 = vld [vmem:[%s7269_s1 + $0x308] sm:$0xff] }
 0x52d   : > { %4602 = vperm.xlu0 %6306, %v4567_v0   ;;  %6040 = vmatprep.subr.bf16.mxu1 %v6842_v1  ;;  %v6074_v0 = vpack.c.bf16 %v6600_v16, %v6599_v3  ;;  %v6635_v3 = vld [vmem:[%s7269_s1 + $0x2a0] sm:$0xff]  ;;  %v6636_v16 = vld [vmem:[%s7269_s1 + $0x2a8] sm:$0xff] }
 0x530   : > { %6042 = vmatpush3.bf16.msra.mxu1 %v8937_v44  ;;  %v6615_v44 = vld [vmem:[%s7269_s1 + $0x200] sm:$0xff] }
 0x531   : > { %6043 = vmatprep.subr.bf16.mxu1 %v6842_v1  ;;  %v6098_v48 = vpack.c.bf16 %v6616_v45, %v6615_v44  ;;  %v6649_v45 = vld [vmem:[%s7269_s1 + $0x310] sm:$0xff] }
 0x534   : > { %6045 = vmatpush3.bf16.msra.mxu1 %v8940_v49  ;;  %v3973_v49 = vcombine.high %v8563_v57, %v8563_v57 }
 0x535   : > { %6046 = vmatprep.subr.bf16.mxu1 %v6842_v1 }
 0x538   : > { %6048 = vmatpush3.bf16.msra.mxu1 %v8943_v54  ;;  %v6619_v54 = vld [vmem:[%s7269_s1 + $0x220] sm:$0xff] }
 0x539   : > { %6049 = vmatprep.subr.bf16.mxu1 %v6842_v1  ;;  %v6104_v5 = vpack.c.bf16 %v6620_v58, %v6619_v54  ;;  %v6653_v54 = vld [vmem:[%s7269_s1 + $0x330] sm:$0xff]  ;;  %v6654_v58 = vld [vmem:[%s7269_s1 + $0x338] sm:$0xff] }
 0x53b   : > { %5775 = vmatmul.mubr.f32.vlgmr.msra.gmra.mrb[2].mxu1 %v8563_v57  ;;  %v6621_v57 = vld [vmem:[%s7269_s1 + $0x230] sm:$0xff] }
 0x53c   : > { %6051 = vmatpush3.bf16.msra.mxu1 %v8946_v46  ;;  %5809 = vmatprep.mubr.msk.f32.mxu1 %vm6844_vm12, %v6845_v61  ;;  %v6624_v46 = vld [vmem:[%s7269_s1 + $0x248] sm:$0xff] }
 0x53d   : > { %6052 = vmatprep.subr.bf16.mxu1 %v6842_v1  ;;  %v6110_v51 = vpack.c.bf16 %v6624_v46, %v6623_v34  ;;  %v6657_v34 = vld [vmem:[%s7269_s1 + $0x350] sm:$0xff]  ;;  %v6658_v46 = vld [vmem:[%s7269_s1 + $0x358] sm:$0xff] }
 0x540   : > { %6054 = vmatpush3.bf16.msra.mxu1 %v6053_v14  ;;  %v6622_v14 = vld [vmem:[%s7269_s1 + $0x238] sm:$0xff] }
 0x541   : > { %6055 = vmatprep.subr.bf16.mxu1 %v6842_v1  ;;  %v6107_v42 = vpack.c.bf16 %v6622_v14, %v6621_v57  ;;  %v6655_v57 = vld [vmem:[%s7269_s1 + $0x340] sm:$0xff]  ;;  %v6656_v14 = vld [vmem:[%s7269_s1 + $0x348] sm:$0xff] }
 0x544   : > { %6057 = vmatpush3.bf16.msra.mxu1 %v6056_v35  ;;  %v6626_v35 = vld [vmem:[%s7269_s1 + $0x258] sm:$0xff] }
 0x545   : > { %6058 = vmatprep.subr.bf16.mxu1 %v6842_v1  ;;  %v6113_v4 = vpack.c.bf16 %v6626_v35, %v6625_v29  ;;  %v6659_v29 = vld [vmem:[%s7269_s1 + $0x360] sm:$0xff]  ;;  %v6660_v35 = vld [vmem:[%s7269_s1 + $0x368] sm:$0xff] }
 0x548   : > { %6060 = vmatpush3.bf16.msra.mxu1 %v6059_v22  ;;  %v6628_v22 = vld [vmem:[%s7269_s1 + $0x268] sm:$0xff] }
 0x549   : > { %6061 = vmatprep.subr.bf16.mxu1 %v6842_v1  ;;  %v6116_v12 = vpack.c.bf16 %v6628_v22, %v6627_v36  ;;  %v6661_v36 = vld [vmem:[%s7269_s1 + $0x370] sm:$0xff]  ;;  %v6662_v22 = vld [vmem:[%s7269_s1 + $0x378] sm:$0xff] }
 0x54c   : > { %6063 = vmatpush3.bf16.msra.mxu1 %v6062_v9  ;;  %v6629_v9 = vld [vmem:[%s7269_s1 + $0x270] sm:$0xff] }
 0x54d   : > { %6064 = vmatprep.subr.bf16.mxu1 %v6842_v1  ;;  %v6119_v18 = vpack.c.bf16 %v6630_v10, %v6629_v9  ;;  %v6664_v9 = vld [vmem:[%s7269_s1 + $0x388] sm:$0xff] }
 0x550   : > { %6066 = vmatpush3.bf16.msra.mxu1 %v6065_v30  ;;  %v3940_v30 = vrot.slane %v3926_v11, %v8494_v2  ;;  %v6663_v11 = vld [vmem:[%s7269_s1 + $0x380] sm:$0xff] }
 0x551   : > { %6067 = vmatprep.subr.bf16.mxu1 %v6842_v1  ;;  %v6170_v10 = vpack.c.bf16 %v6664_v9, %v6663_v11  ;;  %v4598_v9 = vld [vmem:[#allocation5 + $0x5] sm:$0x1] }
 0x552   : > { %v8655_v31 = vrot.slane %v3940_v30, %v8494_v2 }
 0x554   : > { %6069 = vmatpush3.bf16.msra.mxu1 %v6068_v6  ;;  %v6122_v6 = vpack.c.bf16 %v6632_v39, %v6631_v17  ;;  %v6666_v17 = vld [vmem:[%s7269_s1 + $0x398] sm:$0xff] }
 0x555   : > { %6070 = vmatprep.subr.bf16.mxu1 %v6842_v1 }
 0x558   : > { %6072 = vmatpush3.bf16.msra.mxu1 %v6071_v23  ;;  %v6125_v23 = vpack.c.bf16 %v6634_v32, %v6633_v13  ;;  %v6668_v13 = vld [vmem:[%s7269_s1 + $0x3a8] sm:$0xff] }
 0x559   : > { %6073 = vmatprep.subr.bf16.mxu1 %v6842_v1 }
 0x55b   : > { %5810 = vmatmul.mubr.f32.vlgmr.msra.gmra.mrb[4].mxu1 %v3971_v62  ;;  %v3918_v62 = vld [vmem:[#allocation4] sm:$0xff] }
 0x55c   : > { %6075 = vmatpush3.bf16.msra.mxu1 %v6074_v0  ;;  %5844 = vmatprep.mubr.msk.f32.mxu1 %vm6844_vm12, %v6845_v61  ;;  %v6128_v0 = vpack.c.bf16 %v6636_v16, %v6635_v3  ;;  %v3919_v7 = vmul.f32 %v8497_v33, %v3918_v62  ;;  %v6641_v33 = vld [vmem:[%s7269_s1 + $0x2d0] sm:$0xff]  ;;  %v6672_v62 = vld [vmem:[%s7269_s1 + $0x3c8] sm:$0xff] }
 0x55d   : > { %6076 = vmatprep.subr.bf16.mxu1 %v6842_v1  ;;  %v6137_v59 = vpack.c.bf16 %v6642_v21, %v6641_v33  ;;  %v6675_v33 = vld [vmem:[%s7269_s1 + $0x3e0] sm:$0xff]  ;;  %v6676_v21 = vld [vmem:[%s7269_s1 + $0x3e8] sm:$0xff] }
 0x560   : > { %6078 = vmatpush3.bf16.msra.mxu1 %v6077_v8  ;;  %v6638_v8 = vld [vmem:[%s7269_s1 + $0x2b8] sm:$0xff] }
 0x561   : > { %6079 = vmatprep.subr.bf16.mxu1 %v6842_v1  ;;  %v6131_v37 = vpack.c.bf16 %v6638_v8, %v6637_v28  ;;  %v4593_v8 = vld [vmem:[#allocation5] sm:$0x1] }
 0x564   : > { %6081 = vmatpush3.bf16.msra.mxu1 %v6080_v60 }
 0x565   : > { %6082 = vmatprep.subr.bf16.mxu1 %v6842_v1 }
 0x568   : > { %6084 = vmatpush3.bf16.msra.mxu1 %v6083_v20  ;;  %v6134_v20 = vpack.c.bf16 %v6640_v19, %v6639_v47 }
 0x569   : > { %6085 = vmatprep.subr.bf16.mxu1 %v6842_v1 }
 0x56c   : > { %6087 = vmatpush3.bf16.msra.mxu1 %v6086_v63  ;;  %v6643_v63 = vld [vmem:[%s7269_s1 + $0x2e0] sm:$0xff] }
 0x56d   : > { %6088 = vmatprep.subr.bf16.mxu1 %v6842_v1  ;;  %v6140_v38 = vpack.c.bf16 %v6644_v27, %v6643_v63  ;;  %v6677_v63 = vld [vmem:[%s7269_s1 + $0x3f0] sm:$0xff]  ;;  %v6678_v27 = vld [vmem:[%s7269_s1 + $0x3f8] sm:$0xff] }
 0x570   : > { %6090 = vmatpush3.bf16.msra.mxu1 %v6089_v40  ;;  %v6645_v40 = vld [vmem:[%s7269_s1 + $0x2f0] sm:$0xff] }
 0x571   : > { %6091 = vmatprep.subr.bf16.mxu1 %v6842_v1  ;;  %v6143_v26 = vpack.c.bf16 %v6646_v25, %v6645_v40  ;;  %v4611_v25 = vpop.permute.xlu1 %4610 }
 0x574   : > { %6093 = vmatpush3.bf16.msra.mxu1 %v6092_v56  ;;  %v3942_v56 = vcombine.high %v3940_v30, %v3940_v30  ;;  %v6665_v30 = vld [vmem:[%s7269_s1 + $0x390] sm:$0xff] }
 0x575   : > { %6094 = vmatprep.subr.bf16.mxu1 %v6842_v1  ;;  %v6173_v39 = vpack.c.bf16 %v6666_v17, %v6665_v30 }
 0x576   : > { %v8687_v44 = vrot.slane %v3942_v56, %v8494_v2  ;;  %v4594_v56 = vld [vmem:[#allocation5 + $0x1] sm:$0x1] }
 0x578   : > { %6096 = vmatpush3.bf16.msra.mxu1 %v6095_v43  ;;  %v6146_v43 = vpack.c.bf16 %v6648_v41, %v6647_v55  ;;  %v3974_v40 = vcombine.high %v8687_v44, %v8687_v44 }
 0x579   : > { %6097 = vmatprep.subr.bf16.mxu1 %v6842_v1 }
 0x57b   : > { %5845 = vmatmul.mubr.f32.vlgmr.msra.gmra.mrb[6].mxu1 %v3973_v49 }
 0x57c   : > { %6099 = vmatpush3.bf16.msra.mxu1 %v6098_v48  ;;  %5879 = vmatprep.mubr.msk.f32.mxu1 %vm6844_vm12, %v6845_v61  ;;  %v6650_v48 = vld [vmem:[%s7269_s1 + $0x318] sm:$0xff] }
 0x57d   : > { %6100 = vmatprep.subr.bf16.mxu1 %v6842_v1  ;;  %v6149_v49 = vpack.c.bf16 %v6650_v48, %v6649_v45  ;;  %v4619_v48 = vpop.permute.xlu1 %4618 }
 0x580   : > { %6102 = vmatpush3.bf16.msra.mxu1 %v6101_v53  ;;  %v6152_v53 = vpack.c.bf16 %v6652_v52, %v6651_v50  ;;  %v4595_v50 = vld [vmem:[#allocation5 + $0x2] sm:$0x1] }
 0x581   : > { %6103 = vmatprep.subr.bf16.mxu1 %v6842_v1 }
 0x584   : > { %6105 = vmatpush3.bf16.msra.mxu1 %v6104_v5  ;;  %v6155_v5 = vpack.c.bf16 %v6654_v58, %v6653_v54 }
 0x585   : > { %6106 = vmatprep.subr.bf16.mxu1 %v6842_v1 }
 0x588   : > { %6108 = vmatpush3.bf16.msra.mxu1 %v6107_v42  ;;  %v6158_v42 = vpack.c.bf16 %v6656_v14, %v6655_v57 }
 0x589   : > { %6109 = vmatprep.subr.bf16.mxu1 %v6842_v1 }
 0x58c   : > { %6111 = vmatpush3.bf16.msra.mxu1 %v6110_v51  ;;  %v6161_v51 = vpack.c.bf16 %v6658_v46, %v6657_v34 }
 0x58d   : > { %6112 = vmatprep.subr.bf16.mxu1 %v6842_v1 }
 0x590   : > { %6114 = vmatpush3.bf16.msra.mxu1 %v6113_v4  ;;  %v6164_v4 = vpack.c.bf16 %v6660_v35, %v6659_v29  ;;  %v4597_v29 = vld [vmem:[#allocation5 + $0x4] sm:$0x1] }
 0x591   : > { %6115 = vmatprep.subr.bf16.mxu1 %v6842_v1 }
 0x594   : > { %6117 = vmatpush3.bf16.msra.mxu1 %v6116_v12  ;;  %v6167_v12 = vpack.c.bf16 %v6662_v22, %v6661_v36 }
 0x595   : > { %6118 = vmatprep.subr.bf16.mxu1 %v6842_v1 }
 0x598   : > { %6120 = vmatpush3.bf16.msra.mxu1 %v6119_v18  ;;  %v3972_v18 = vcombine.high %v8655_v31, %v8655_v31 }
 0x599   : > { %6121 = vmatprep.subr.bf16.mxu1 %v6842_v1 }
 0x59b   : > { %5880 = vmatmul.mubr.f32.vlgmr.msra.gmra.mrb[8].mxu1 %v8655_v31  ;;  %v6669_v31 = vld [vmem:[%s7269_s1 + $0x3b0] sm:$0xff] }
 0x59c   : > { %6123 = vmatpush3.bf16.msra.mxu1 %v6122_v6  ;;  %5914 = vmatprep.mubr.msk.f32.mxu1 %vm6844_vm12, %v6845_v61  ;;  %v6667_v6 = vld [vmem:[%s7269_s1 + $0x3a0] sm:$0xff] }
 0x59d   : > { %6124 = vmatprep.subr.bf16.mxu1 %v6842_v1  ;;  %v6176_v32 = vpack.c.bf16 %v6668_v13, %v6667_v6  ;;  %v4599_v13 = vld [vmem:[#allocation5 + $0x6] sm:$0x1] }
 0x5a0   : > { %6126 = vmatpush3.bf16.msra.mxu1 %v6125_v23  ;;  %v6670_v23 = vld [vmem:[%s7269_s1 + $0x3b8] sm:$0xff] }
 0x5a1   : > { %6127 = vmatprep.subr.bf16.mxu1 %v6842_v1  ;;  %v6179_v3 = vpack.c.bf16 %v6670_v23, %v6669_v31 }
 0x5a4   : > { %6129 = vmatpush3.bf16.msra.mxu1 %v6128_v0  ;;  %v3921_v15 = vpop.xlane.xlu0 %3920  ;;  %v8731_v0 = vsub.s32 0, %v7873_v24 }
 0x5a5   : > { %v3922_v60 = vadd.f32 %v3921_v15, %v3919_v7  ;;  %6130 = vmatprep.subr.bf16.mxu1 %v6842_v1  ;;  %v6674_v15 = vld [vmem:[%s7269_s1 + $0x3d8] sm:$0xff] }
 0x5a7   : > { %3924 = vst.msk [vmem:[#allocation4] sm:$0xff] %vm3923_vm11, %v3922_v60 }
 0x5a8   : > { %6132 = vmatpush3.bf16.msra.mxu1 %v6131_v37  ;;  %v6673_v37 = vld [vmem:[%s7269_s1 + $0x3d0] sm:$0xff] }
 0x5a9   : > { %6133 = vmatprep.subr.bf16.mxu1 %v6842_v1  ;;  %v6185_v60 = vpack.c.bf16 %v6674_v15, %v6673_v37  ;;  %v4846_v15 = vld [vmem:[#allocation3] sm:$0xff] (!%p5215_p5) }
 0x5ac   : > { %6135 = vmatpush3.bf16.msra.mxu1 %v6134_v20  ;;  %v4603_v16 = vpop.permute.xlu0 %4602 }
 0x5ad   : > { %6136 = vmatprep.subr.bf16.mxu1 %v6842_v1  ;;  %v4608_v28 = vrot.slane %v4603_v16, %v8731_v0 }
 0x5af   : > { %v4665_v47 = vmul.f32 %v4608_v28, %v4593_v8 }
 0x5b0   : > { %6138 = vmatpush3.bf16.msra.mxu1 %v6137_v59  ;;  %v6188_v59 = vpack.c.bf16 %v6676_v21, %v6675_v33 }
 0x5b1   : > { %6139 = vmatprep.subr.bf16.mxu1 %v6842_v1 }
 0x5b4   : > { %6141 = vmatpush3.bf16.msra.mxu1 %v6140_v38  ;;  %v6191_v38 = vpack.c.bf16 %v6678_v27, %v6677_v63 }
 0x5b5   : > { %6142 = vmatprep.subr.bf16.mxu1 %v6842_v1 }
 0x5b8   : > { %6144 = vmatpush3.bf16.msra.mxu1 %v6143_v26  ;;  %v4616_v26 = vrot.slane %v4611_v25, %v8731_v0 }
 0x5b9   : > { %6145 = vmatprep.subr.bf16.mxu1 %v6842_v1 }
 0x5ba   : > { %v4666_v55 = vmul.f32 %v4616_v26, %v4594_v56 }
 0x5bb   : > { %5915 = vmatmul.mubr.f32.vlgmr.msra.gmra.mrb[10].mxu1 %v8687_v44  ;;  %v4627_v44 = vpop.permute.xlu1 %4626 }
 0x5bc   : > { %6147 = vmatpush3.bf16.msra.mxu1 %v6146_v43  ;;  %5949 = vmatprep.mubr.msk.f32.mxu1 %vm6844_vm12, %v6845_v61  ;;  %v4632_v58 = vrot.slane %v4627_v44, %v8731_v0 }
 0x5bd   : > { %6148 = vmatprep.subr.bf16.mxu1 %v6842_v1 }
 0x5bf   : > { %v4635_v46 = vpop.permute.xlu1 %4634 }
 0x5c0   : > { %6150 = vmatpush3.bf16.msra.mxu1 %v6149_v49  ;;  %v4624_v49 = vrot.slane %v4619_v48, %v8731_v0 }
 0x5c1   : > { %6151 = vmatprep.subr.bf16.mxu1 %v6842_v1 }
 0x5c4   : > { %6153 = vmatpush3.bf16.msra.mxu1 %v6152_v53 }
 0x5c5   : > { %6154 = vmatprep.subr.bf16.mxu1 %v6842_v1 }
 0x5c8   : > { %6156 = vmatpush3.bf16.msra.mxu1 %v6155_v5  ;;  %v4596_v5 = vld [vmem:[#allocation5 + $0x3] sm:$0x1] }
 0x5c9   : > { %6157 = vmatprep.subr.bf16.mxu1 %v6842_v1  ;;  %v4668_v57 = vmul.f32 %v4632_v58, %v4596_v5 }
 0x5cc   : > { %6159 = vmatpush3.bf16.msra.mxu1 %v6158_v42 }
 0x5cd   : > { %6160 = vmatprep.subr.bf16.mxu1 %v6842_v1 }
 0x5d0   : > { %6162 = vmatpush3.bf16.msra.mxu1 %v6161_v51  ;;  %v4640_v51 = vrot.slane %v4635_v46, %v8731_v0 }
 0x5d1   : > { %6163 = vmatprep.subr.bf16.mxu1 %v6842_v1 }
 0x5d2   : > { %v4669_v35 = vmul.f32 %v4640_v51, %v4597_v29 }
 0x5d4   : > { %6165 = vmatpush3.bf16.msra.mxu1 %v6164_v4 }
 0x5d5   : > { %6166 = vmatprep.subr.bf16.mxu1 %v6842_v1 }
 0x5d8   : > { %6168 = vmatpush3.bf16.msra.mxu1 %v6167_v12  ;;  %v4643_v12 = vpop.permute.xlu1 %4642 }
 0x5d9   : > { %6169 = vmatprep.subr.bf16.mxu1 %v6842_v1  ;;  %v4648_v11 = vrot.slane %v4643_v12, %v8731_v0 }
 0x5db   : > { %5950 = vmatmul.mubr.f32.vlgmr.msra.gmra.mrb[12].mxu1 %v3972_v18 }
 0x5dc   : > { %6171 = vmatpush3.bf16.msra.mxu1 %v6170_v10  ;;  %5984 = vmatprep.mubr.msk.f32.mxu1 %vm6844_vm12, %v6845_v61  ;;  %v6671_v61 = vld [vmem:[%s7269_s1 + $0x3c0] sm:$0xff]  ;;  %v4670_v10 = vmul.f32 %v4648_v11, %v4598_v9  ;;  %s6846_s1 = smov (!%p5215_p5), 1  }
 0x5dd   : > { %6172 = vmatprep.subr.bf16.mxu1 %v6842_v1  ;;  %v6182_v7 = vpack.c.bf16 %v6672_v62, %v6671_v61  ;;  %v4600_v62 = vld [vmem:[#allocation5 + $0x7] sm:$0x1]  ;;  %4862 = vrot.lane.b32.xlu0 (!%p5215_p5), %v4846_v15, %s6846_s1 }
 0x5e0   : > { %6174 = vmatpush3.bf16.msra.mxu1 %v6173_v39  ;;  %v4651_v39 = vpop.permute.xlu1 %4650 }
 0x5e1   : > { %6175 = vmatprep.subr.bf16.mxu1 %v6842_v1  ;;  %v4656_v6 = vrot.slane %v4651_v39, %v8731_v0  ;;  %4881 = vrot.lane.b32.xlu0 (!%p5215_p5), %v4846_v15, %s6848_s22 }
 0x5e4   : > { %6177 = vmatpush3.bf16.msra.mxu1 %v6176_v32  ;;  %v4671_v32 = vmul.f32 %v4656_v6, %v4599_v13  ;;  %v4659_v16 = vpop.permute.xlu1 %4658 }
 0x5e5   : > { %6178 = vmatprep.subr.bf16.mxu1 %v6842_v1  ;;  %v4664_v61 = vrot.slane %v4659_v16, %v8731_v0 }
 0x5e8   : > { %6180 = vmatpush3.bf16.msra.mxu1 %v6179_v3 }
 0x5e9   : > { %6181 = vmatprep.subr.bf16.mxu1 %v6842_v1 }
 0x5ec   : > { %6183 = vmatpush3.bf16.msra.mxu1 %v6182_v7  ;;  %v4672_v7 = vmul.f32 %v4664_v61, %v4600_v62 }
 0x5ed   : > { %6184 = vmatprep.subr.bf16.mxu1 %v6842_v1 }
 0x5ee   : > { %v4049_v24 = vpop.f32.mrb[0].mxu1 }
 0x5ef   : > { %v4673_v19 = vadd.f32 %v4665_v47, %v4049_v24  ;;  %v5741_v20 = vpop.f32.mrb[1].mxu1  ;;  %v6847_v47 = vmov (!%p5215_p5), 0   ;;  %v4847_v24 = vld [vmem:[#allocation6] sm:$0xff] (!%p5215_p5) }
 0x5f0   : > { %6186 = vmatpush3.bf16.msra.mxu1 %v6185_v60  ;;  %v4706_v60 = vld [vmem:[#allocation4] sm:$0xff] (!%p5215_p5)  ;;  %6680 = vset.pattern.permute.xlu1 (!%p5215_p5), %v6847_v47  ;;  %v4848_v20 = vsub.f32 (!%p5215_p5), %v4847_v24, %v4846_v15 }
 0x5f1   : > { %4682 = vst.msk [vmem:[#allocation5] sm:$0x1] %vm4681_vm0, %v4673_v19  ;;  %6187 = vmatprep.subr.bf16.mxu1 %v6842_v1  ;;  %6684 = vrcp.f32 (!%p5215_p5), %v4706_v60  ;;  %6679 = vset.pattern.permute.xlu0 (!%p5215_p5), %v6847_v47 }
 0x5f2   : > { %v4849_v27 = vmul.f32 (!%p5215_p5), 1.442695, %v4848_v20 }
 0x5f4   : > { %6189 = vmatpush3.bf16.msra.mxu1 %v6188_v59  ;;  %6686 = vpow2.f32 (!%p5215_p5), %v4849_v27 }
 0x5f5   : > { %6190 = vmatprep.subr.bf16.mxu1 %v6842_v1  ;;  %v4667_v1 = vmul.f32 %v4624_v49, %v4595_v50  ;;  %v6849_v50 = vmov (!%p5215_p5), 1  }
 0x5f8   : > { %6192 = vmatpush3.bf16.msra.mxu1 %v6191_v38  ;;  %v4708_v51 = vld [vmem:[#allocation5] sm:$0x1] (!%p5215_p5) }
 0x5fb   : > { %5985 = vmatmul.mubr.f32.vlgmr.msra.gmra.mrb[14].mxu1 %v3974_v40  ;;  %v6685_v19 = vpop.eup (!%p5215_p5), %6684 }
 0x5fc   : > { %4868 = vrot.lane.b32.xlu1 (!%p5215_p5), %v6685_v19, %s6846_s1  ;;  %v4724_v33 = vrot.slane (!%p5215_p5), %v6685_v19, %v8494_v2  ;;  %v4717_v21 = vcombine.high (!%p5215_p5), %v6685_v19, %v6685_v19 }
 0x5fe   : > { %v4732_v59 = vcombine.high (!%p5215_p5), %v4724_v33, %v4724_v33  ;;  %v4740_v63 = vrot.slane (!%p5215_p5), %v4724_v33, %v8494_v2  ;;  %v4731_v38 = vrot.slane (!%p5215_p5), %v4717_v21, %v8494_v2  ;;  %v6687_v48 = vpop.eup (!%p5215_p5), %6686 }
 0x5ff   : > { %v4851_v49 = vmul.f32 (!%p5215_p5), %v6687_v48, %v6685_v19 }
 0x600   : > { %4887 = vrot.lane.b32.xlu1 (!%p5215_p5), %v6685_v19, %s6848_s22  ;;  %v4754_v40 = vrot.slane (!%p5215_p5), %v4732_v59, %v8494_v2  ;;  %4767 = vperm.xlu0 (!%p5215_p5), %6679, %v4740_v63   ;;  %v4733_v25 = vcombine.high (!%p5215_p5), %v4731_v38, %v4731_v38  ;;  %v4762_v56 = vcombine.high (!%p5215_p5), %v4740_v63, %v4740_v63  ;;  %v4852_v19 = vld [vmem:[%s7273_s27] sm:$0xff] (!%p5215_p5)  ;;  %v4872_v59 = vld [vmem:[%s7273_s27 + $0x8] sm:$0xff] (!%p5215_p5) }
 0x602   : > { %v4764_v26 = vcombine.high (!%p5215_p5), %v4754_v40, %v4754_v40 }
 0x604   : > { %4775 = vperm.xlu1 (!%p5215_p5), %6680, %v4754_v40   ;;  %4791 = vperm.xlu0 (!%p5215_p5), %6679, %v4764_v26  }
 0x608   : > { %4783 = vperm.xlu1 (!%p5215_p5), %6680, %v4762_v56  }
 0x60e   : > { %v4119_v41 = vpop.f32.mrb[2].mxu1 }
 0x60f   : > { %v4674_v43 = vadd.f32 %v4666_v55, %v4119_v41  ;;  %v5776_v45 = vpop.f32.mrb[3].mxu1  ;;  %v4761_v55 = vrot.slane (!%p5215_p5), %v4733_v25, %v8494_v2  ;;  %v4747_v41 = vrot.slane (!%p5215_p5), %v4731_v38, %v8494_v2  ;;  %v4891_v38 = vld [vmem:[%s7273_s27 + $0x10] sm:$0xff] (!%p5215_p5) }
 0x611   : > { %4683 = vst.msk [vmem:[#allocation5 + $0x1] sm:$0x1] %vm4681_vm0, %v4674_v43  ;;  %4807 = vperm.xlu0 (!%p5215_p5), %6679, %v4761_v55   ;;  %v4765_v43 = vcombine.high (!%p5215_p5), %v4761_v55, %v4761_v55  ;;  %4799 = vperm.xlu1 (!%p5215_p5), %6680, %v4747_v41   ;;  %v4763_v45 = vcombine.high (!%p5215_p5), %v4747_v41, %v4747_v41 }
 0x615   : > { %4823 = vperm.xlu0 (!%p5215_p5), %6679, %v4765_v43   ;;  %4815 = vperm.xlu1 (!%p5215_p5), %6680, %v4763_v45  }
 0x619   : > { %6681 = vset.pattern.permute.xlu0 (!%p5215_p5), %v6849_v50  ;;  %4855 = vperm.xlu1 (!%p5215_p5), %6680, %v4851_v49  }
 0x62e   : > { %v4189_v52 = vpop.f32.mrb[4].mxu1 }
 0x62f   : > { %v4675_v53 = vadd.f32 %v4667_v1, %v4189_v52  ;;  %v5811_v54 = vpop.f32.mrb[5].mxu1  ;;  %v6850_v1 = vmov (!%p5215_p5), 2  }
 0x630   : > { %6682 = vset.pattern.permute.xlu1 (!%p5215_p5), %v6850_v1 }
 0x631   : > { %4684 = vst.msk [vmem:[#allocation5 + $0x2] sm:$0x1] %vm4681_vm0, %v4675_v53 }
 0x64e   : > { %v4259_v14 = vpop.f32.mrb[6].mxu1 }
 0x64f   : > { %v4676_v42 = vadd.f32 %v4668_v57, %v4259_v14  ;;  %v5846_v34 = vpop.f32.mrb[7].mxu1  ;;  %v4863_v52 = vpop.permute.xlu0 (!%p5215_p5), %4862 }
 0x650   : > { %v4865_v53 = vsub.f32 (!%p5215_p5), %v4847_v24, %v4863_v52 }
 0x651   : > { %4685 = vst.msk [vmem:[#allocation5 + $0x3] sm:$0x1] %vm4681_vm0, %v4676_v42 }
 0x652   : > { %v4866_v54 = vmul.f32 (!%p5215_p5), 1.442695, %v4865_v53 }
 0x653   : > { %v4882_v44 = vpop.permute.xlu0 (!%p5215_p5), %4881 }
 0x654   : > { %6688 = vpow2.f32 (!%p5215_p5), %v4866_v54  ;;  %v4884_v58 = vsub.f32 (!%p5215_p5), %v4847_v24, %v4882_v44 }
 0x656   : > { %v4885_v2 = vmul.f32 (!%p5215_p5), 1.442695, %v4884_v58 }
 0x658   : > { %6690 = vpow2.f32 (!%p5215_p5), %v4885_v2  ;;  %v4711_v12 = vld [vmem:[#allocation5 + $0x3] sm:$0x1] (!%p5215_p5) }
 0x65e   : > { %v6689_v57 = vpop.eup (!%p5215_p5), %6688 }
 0x662   : > { %v6691_v34 = vpop.eup (!%p5215_p5), %6690 }
 0x66e   : > { %v4329_v4 = vpop.f32.mrb[8].mxu1  ;;  %v4869_v5 = vpop.permute.xlu1 (!%p5215_p5), %4868 }
 0x66f   : > { %v4677_v36 = vadd.f32 %v4669_v35, %v4329_v4  ;;  %v5881_v22 = vpop.f32.mrb[9].mxu1  ;;  %v4871_v14 = vmul.f32 (!%p5215_p5), %v6689_v57, %v4869_v5 }
 0x671   : > { %4686 = vst.msk [vmem:[#allocation5 + $0x4] sm:$0x1] %vm4681_vm0, %v4677_v36  ;;  %4875 = vperm.xlu0 (!%p5215_p5), %6681, %v4871_v14   ;;  %v4709_v36 = vld [vmem:[#allocation5 + $0x1] sm:$0x1] (!%p5215_p5) }
 0x672   : > { %v4888_v42 = vpop.permute.xlu1 (!%p5215_p5), %4887 }
 0x673   : > { %v4890_v46 = vmul.f32 (!%p5215_p5), %v6691_v34, %v4888_v42 }
 0x675   : > { %4894 = vperm.xlu1 (!%p5215_p5), %6682, %v4890_v46   ;;  %6683 = vset.pattern.permute.xlu0 (!%p5215_p5), %v6850_v1 }
 0x678   : > { %v4712_v16 = vld [vmem:[#allocation5 + $0x4] sm:$0x1] (!%p5215_p5) }
 0x67f   : > { %v4768_v29 = vpop.permute.xlu0 (!%p5215_p5), %4767 }
 0x680   : > { %v4773_v35 = vrot.slane (!%p5215_p5), %v4768_v29, %v8731_v0 }
 0x682   : > { %v4830_v4 = vmul.f32 (!%p5215_p5), %v4773_v35, %v4708_v51 }
 0x683   : > { %v4776_v22 = vpop.permute.xlu1 (!%p5215_p5), %4775  ;;  %v4792_v11 = vpop.permute.xlu0 (!%p5215_p5), %4791 }
 0x684   : > { %v4781_v9 = vrot.slane (!%p5215_p5), %v4776_v22, %v8731_v0  ;;  %4838 = vst.msk [vmem:[%s7271_s9] sm:$0x1] (!%p5215_p5), %vm4681_vm0, %v4830_v4 }
 0x687   : > { %v4784_v39 = vpop.permute.xlu1 (!%p5215_p5), %4783 }
 0x68e   : > { %v4399_v18 = vpop.f32.mrb[10].mxu1 }
 0x68f   : > { %v4678_v30 = vadd.f32 %v4670_v10, %v4399_v18  ;;  %v5916_v17 = vpop.f32.mrb[11].mxu1  ;;  %v4797_v10 = vrot.slane (!%p5215_p5), %v4792_v11, %v8731_v0  ;;  %v4831_v18 = vmul.f32 (!%p5215_p5), %v4781_v9, %v4709_v36 }
 0x690   : > { %v4710_v17 = vld [vmem:[#allocation5 + $0x2] sm:$0x1] (!%p5215_p5)  ;;  %v4808_v13 = vpop.permute.xlu0 (!%p5215_p5), %4807  ;;  %v4800_v61 = vpop.permute.xlu1 (!%p5215_p5), %4799 }
 0x691   : > { %4687 = vst.msk [vmem:[#allocation5 + $0x5] sm:$0x1] %vm4681_vm0, %v4678_v30  ;;  %v4833_v30 = vmul.f32 (!%p5215_p5), %v4797_v10, %v4711_v12  ;;  %4839 = vst.msk [vmem:[%s7271_s9 + $0x1] sm:$0x1] (!%p5215_p5), %vm4681_vm0, %v4831_v18 }
 0x693   : > { %4841 = vst.msk [vmem:[%s7271_s9 + $0x3] sm:$0x1] (!%p5215_p5), %vm4681_vm0, %v4833_v30 }
 0x694   : > { %v4816_v47 = vpop.permute.xlu1 (!%p5215_p5), %4815 }
 0x695   : > { %v4821_v24 = vrot.slane (!%p5215_p5), %v4816_v47, %v8731_v0 }
 0x698   : > { %v4713_v6 = vld [vmem:[#allocation5 + $0x5] sm:$0x1] (!%p5215_p5)  ;;  %v4856_v33 = vpop.permute.xlu1 (!%p5215_p5), %4855 }
 0x699   : > { %v4858_v21 = vmul.f32 (!%p5215_p5), %v4856_v33, %v4852_v19 }
 0x69b   : > { %4859 = vst [vmem:[%s7273_s27] sm:$0xff] (!%p5215_p5), %v4858_v21 }
 0x6ae   : > { %v4469_v31 = vpop.f32.mrb[12].mxu1 }
 0x6af   : > { %v4679_v23 = vadd.f32 %v4671_v32, %v4469_v31  ;;  %v5951_v3 = vpop.f32.mrb[13].mxu1  ;;  %v4789_v32 = vrot.slane (!%p5215_p5), %v4784_v39, %v8731_v0  ;;  %v4813_v31 = vrot.slane (!%p5215_p5), %v4808_v13, %v8731_v0 }
 0x6b1   : > { %4688 = vst.msk [vmem:[#allocation5 + $0x6] sm:$0x1] %vm4681_vm0, %v4679_v23  ;;  %v4832_v23 = vmul.f32 (!%p5215_p5), %v4789_v32, %v4710_v17  ;;  %v4835_v3 = vmul.f32 (!%p5215_p5), %v4813_v31, %v4713_v6 }
 0x6b3   : > { %4840 = vst.msk [vmem:[%s7271_s9 + $0x2] sm:$0x1] (!%p5215_p5), %vm4681_vm0, %v4832_v23  ;;  %4843 = vst.msk [vmem:[%s7271_s9 + $0x5] sm:$0x1] (!%p5215_p5), %vm4681_vm0, %v4835_v3 }
 0x6b8   : > { %v4714_v60 = vld [vmem:[#allocation5 + $0x6] sm:$0x1] (!%p5215_p5) }
 0x6b9   : > { %v4836_v20 = vmul.f32 (!%p5215_p5), %v4821_v24, %v4714_v60 }
 0x6bb   : > { %4844 = vst.msk [vmem:[%s7271_s9 + $0x6] sm:$0x1] (!%p5215_p5), %vm4681_vm0, %v4836_v20 }
 0x6cb   : > { %4705 = sbr.rel (%p5215_p5) target bundleno = 1784 (0x6f8), region = 90 }
 0x6ce   : > { %v4539_v28 = vpop.f32.mrb[14].mxu1 }
 0x6cf   : > { %v4680_v8 = vadd.f32 %v4672_v7, %v4539_v28  ;;  %v5986_v37 = vpop.f32.mrb[15].mxu1  ;;  %v4824_v7 = vpop.permute.xlu0 (!%p5215_p5), %4823  ;;  %v4805_v28 = vrot.slane (!%p5215_p5), %v4800_v61, %v8731_v0 }
 0x6d1   : > { %4689 = vst.msk [vmem:[#allocation5 + $0x7] sm:$0x1] %vm4681_vm0, %v4680_v8  ;;  %v4829_v8 = vrot.slane (!%p5215_p5), %v4824_v7, %v8731_v0  ;;  %v4834_v37 = vmul.f32 (!%p5215_p5), %v4805_v28, %v4712_v16 }
 0x6d3   : > { %4842 = vst.msk [vmem:[%s7271_s9 + $0x4] sm:$0x1] %vm4681_vm0, %v4834_v37 }
 0x6d8   : > { %v4715_v62 = vld [vmem:[#allocation5 + $0x7] sm:$0x1] }
 0x6d9   : > { %v4837_v15 = vmul.f32 %v4829_v8, %v4715_v62 }
 0x6db   : > { %4845 = vst.msk [vmem:[%s7271_s9 + $0x7] sm:$0x1] %vm4681_vm0, %v4837_v15 }
 0x6f0   : > { %v4876_v63 = vpop.permute.xlu0 %4875 }
 0x6f1   : > { %v4878_v27 = vmul.f32 %v4876_v63, %v4872_v59 }
 0x6f3   : > { %4879 = vst [vmem:[%s7273_s27 + $0x8] sm:$0xff] %v4878_v27 }
 0x6f4   : > { %v4895_v40 = vpop.permute.xlu1 %4894 }
 0x6f5   : > { %v4897_v25 = vmul.f32 %v4895_v40, %v4891_v38 }
 0x6f7   : > { %4898 = vst [vmem:[%s7273_s27 + $0x10] sm:$0xff] %v4897_v25 }
 0x6f8 PF: > { %s5222_s29 = sshll.u32 %s6822_s30, 7  ;;  %s4918_s16 = sshll.u32 %s7271_s9, 4  ;;  %s8807_s16 = int_to_ptr.vmem [resolvable:$true] %s4918_s16 }
 0x6f9   : > { %s8804_s11 = scalar_lea.hbm %s8897_s6, %s5222_s29  ;;  %s4900_s15 = scalar_lea.sflag [#allocation9], %s7258_s14 }
 0x6fa   : > { %s6692_s17 = scalar_lea.vmem %s8807_s16, 128  ;;  %s6851_s13 = smov [#allocation8]  }
 0x6fb   : > { %p6693_p6 = scmp.ne.s32.totalorder %s8807_s16, %s6692_s17  ;;  %s6696_s20 = sshll.u32 %s6851_s13, 4  ;;  %s6697_s20 = int_to_ptr.vmem [resolvable:$false] %s6696_s20 }
 0x6fc   : > { %s6698_s18 = scalar_lea.vmem %s6697_s20, 256  ;;  %p6699_p10 = scmp.lt.s32.totalorder %s8807_s16, %s6697_s20 }
 0x6fd   : > { %p6694_p8 = pnand %p6693_p6, %p6967_p7  ;;  %p6700_p11 = scmp.lt.s32.totalorder %s6698_s18, %s6692_s17 }
 0x6ff   : > { %p6695_p9 = pneg %p6694_p8  ;;  %p6701_p13 = por %p6700_p11, %p6699_p10 }
 0x701   : > { %p6702_p0 = pnand %p6701_p13, %p6695_p9 }
 0x703   : > { %6705 = shalt.err (!%p6702_p0)
}
 0x704   : > { %s6706_s9 = scalar_lea.hbm %s8804_s11, 128  ;;  %s6710_s22 = scalar_lea.hbm %s8897_s6, 256 }
 0x705   : > { %p6707_p1 = scmp.ne.s32.totalorder %s8804_s11, %s6706_s9  ;;  %p6711_p4 = scmp.lt.u32.totalorder %s8804_s11, %s8897_s6 }
 0x706   : > { %p6712_p5 = scmp.lt.u32.totalorder %s6710_s22, %s6706_s9  ;;  %p6714_p8 = scmp.lt.u32.totalorder %s6706_s9, %s8804_s11 }
 0x707   : > { %p6708_p2 = pnand %p6707_p1, %p6967_p7 }
 0x708   : > { %p6713_p6 = por %p6712_p5, %p6711_p4 }
 0x709   : > { %p6709_p3 = pneg %p6708_p2 }
 0x70a   : > { %p6715_p9 = por %p6714_p8, %p6713_p6 }
 0x70c   : > { %p6716_p10 = pnand %p6715_p9, %p6709_p3 }
 0x70e   : > { %6719 = shalt.err (!%p6716_p10)
}
 0x70f   : > { %s6852_s8 = smov 16   ;;  %s6853_s17 = smov 1  }
 0x710   : > { %6196 = dma.vmem_to_hbm [thread:$0]  (%p6967_p7), %s8807_s16, 128, %s8804_s11, %s4900_s15, %s6852_s8, %s6852_s8, %s6853_s17  }
 0x711   : > { %s6195_s13 = smul.u32 384, %s6822_s30  ;;  %s4935_s20 = sshll.u32 %s7273_s27, 4  ;;  %s8835_s20 = int_to_ptr.vmem [resolvable:$true] %s4935_s20 }
 0x712   : > { %s4905_s1 = scalar_lea.sflag [#allocation11], %s7258_s14  ;;  %s6720_s22 = scalar_lea.vmem %s8835_s20, 384 }
 0x713   : > { %s4933_s21 = scalar_lea.hbm %s8898_s7, %s6195_s13  ;;  %p6721_p11 = scmp.ne.s32.totalorder %s8835_s20, %s6720_s22 }
 0x714   : > { %s6854_s29 = smov [#allocation10]  }
 0x715   : > { %p6722_p13 = pnand %p6721_p11, %p6967_p7  ;;  %s6724_s12 = sshll.u32 %s6854_s29, 4  ;;  %s6725_s12 = int_to_ptr.vmem [resolvable:$false] %s6724_s12 }
 0x716   : > { %s6726_s30 = scalar_lea.vmem %s6725_s12, 768  ;;  %p6727_p1 = scmp.lt.s32.totalorder %s8835_s20, %s6725_s12 }
 0x717   : > { %p6723_p0 = pneg %p6722_p13  ;;  %p6728_p2 = scmp.lt.s32.totalorder %s6726_s30, %s6720_s22 }
 0x719   : > { %p6729_p3 = por %p6728_p2, %p6727_p1 }
 0x71b   : > { %p6730_p4 = pnand %p6729_p3, %p6723_p0 }
 0x71d   : > { %6733 = shalt.err (!%p6730_p4)
}
 0x71e   : > { %s6734_s27 = scalar_lea.hbm %s4933_s21, 384  ;;  %s6738_s16 = scalar_lea.hbm %s8898_s7, 768 }
 0x71f   : > { %p6735_p5 = scmp.ne.s32.totalorder %s4933_s21, %s6734_s27  ;;  %p6739_p9 = scmp.lt.u32.totalorder %s4933_s21, %s8898_s7 }
 0x720   : > { %p6740_p10 = scmp.lt.u32.totalorder %s6738_s16, %s6734_s27  ;;  %p6742_p13 = scmp.lt.u32.totalorder %s6734_s27, %s4933_s21 }
 0x721   : > { %p6736_p6 = pnand %p6735_p5, %p6967_p7 }
 0x722   : > { %p6741_p11 = por %p6740_p10, %p6739_p9 }
 0x723   : > { %p6737_p8 = pneg %p6736_p6 }
 0x724   : > { %p6743_p1 = por %p6742_p13, %p6741_p11 }
 0x726   : > { %p6744_p0 = pnand %p6743_p1, %p6737_p8 }
 0x728   : > { %6747 = shalt.err (!%p6744_p0)
}
 0x729   : > { %6197 = dma.vmem_to_hbm [thread:$0]  (%p6967_p7), %s8835_s20, 384, %s4933_s21, %s4905_s1  }
 0x72a PF: > { %p6207_p2 = scmp.ge.s32.totalorder %s6834_s10, 2  ;;  %s4947_s13 = sand.u32 1, %s6798_s24  }
 0x72b   : > { %s4948_s18 = scalar_lea.sflag [#allocation9], %s4947_s13 }
 0x72c   : > { %p6201_p3 = pnand %p6207_p2, %p6975_p12 }
 0x72e   : > { %6789 = dma.done.wait (!%p6201_p3), %s4948_s18, 128  }
 0x72f   : > { %6791 = vsyncadd (!%p6201_p3), %s4948_s18, 4294967168  ;;  %s4957_s9 = scalar_lea.sflag [#allocation11], %s4947_s13 }
 0x730   : > { %6793 = dma.done.wait (!%p6201_p3), %s4957_s9, 384  }
 0x731   : > { %6795 = vsyncadd (!%p6201_p3), %s4957_s9, 4294966912  ;;  %s24_s10 = sadd.s32 1, %s6834_s10   ;;  %s8948_s19 = sld [smem:[#allocation19_spill]] }
 0x732   : > { %p21_p4 = scmp.ge.s32.totalorder %s24_s10, 8   ;;  %s8949_s29 = sld [smem:[#allocation14_spill]] }
 0x733   : > { %s8950_s30 = sld [smem:[#allocation15_spill]]  ;;  %s8951_s8 = sld [smem:[#allocation16_spill]] }
 0x734   : > { %s8952_s9 = sld [smem:[#allocation17_spill]]  ;;  %s8953_s24 = smov %s6802_s25 }
 0x735   : > { %s8954_s25 = smov %s6806_s26  ;;  %s8955_s26 = smov %s6980_s23 }
 0x736   : > { %s8956_s27 = smov %s6814_s28  ;;  %23 = sbr.rel (!%p21_p4) target bundleno = 10 (0xa), region = 151 }
 0x737   : > { %s8957_s28 = smov %s8948_s19 }
 0x73d   :  { %4962 = vsyncpa [#allocation9], 1 }
 0x73e   :  { %4964 = vsyncpa [#allocation9 + $0x1], 1 }
 0x73f   :  { %4965 = vsyncpa [#allocation11], 1 }
 0x740   :  { %4967 = vsyncpa [#allocation11 + $0x1], 1 }

</bundles_post_ra>
